<compile_context>
chip_gen: v5e
topology: v5e:2x2
jax: 0.10.0
libtpu: 0.0.40
codegen_flags: <defaults>
</compile_context>

<pallas_src>
import jax
import jax.numpy as jnp
import numpy as np
from jax.experimental import pallas as pl
from jax.experimental.pallas import tpu as pltpu


# ----------------------------------------------------------------------------
# Fused kernel: grid tiles the destination-node columns n (parallel axis).
# Block shapes (test config): xe (F*H=128, N=128), dT/normT (N=128, tn=128),
# out (C=8, tn=128) -> one vreg accumulator, unmasked lane-dense stores.
# ----------------------------------------------------------------------------
def _gnan_fused_kernel(rw1_ref, rb1_ref,                     # rho Linear1 (SMEM scalars)
                       xe_ref, w1_ref, b1_ref, w2T_ref, b2s_ref,   # feature MLPs
                       dT_ref, normT_ref, rw2T_ref, rb2_ref,       # rho Linear2 / dist
                       o_ref):
    H = rw2T_ref.shape[1]

    # ---- per-feature MLPs, summed over features, transposed: s_T (C, N) ----
    # h_T[f*H+k, n] = relu(x[n,f] * w1[f,k] + b1[f,k])
    hT = jnp.maximum(w1_ref[...] * xe_ref[...] + b1_ref[...], 0.0)        # (F*H, N)
    sT = jnp.dot(w2T_ref[...], hT,
                 preferred_element_type=jnp.float32) + b2s_ref[...]       # (C, N)

    # ---- rho on normalized pairwise distances, contracted over j on MXU ----
    dt = dT_ref[...] / normT_ref[...]            # (N, tn), dt[j, n] = d[n, j]
    rw2T = rw2T_ref[...]                         # (C, H)

    acc = jnp.zeros(o_ref.shape, jnp.float32)    # (C, tn)
    for h in range(H):                           # unrolled; h is a static int
        a = rw1_ref[h]                           # scalar from SMEM
        b = rb1_ref[h]
        Bh = jnp.maximum(dt * a + b, 0.0)                                  # (N, tn)
        yh = jnp.dot(sT, Bh, preferred_element_type=jnp.float32)          # (C, tn)
        acc = acc + rw2T[:, h:h + 1] * yh

    # rho bias term: rb2[c] * sum_j s[j, c]  (same for every destination node n)
    o_ref[...] = acc + rb2_ref[...] * jnp.sum(sT, axis=1, keepdims=True)


def tensor_gnan_forward(x, node_distances, normalization_matrix, params, *, tn=None):
    N, F = x.shape
    H = params["fs_w1"].shape[-1]
    C = params["fs_w2"].shape[-1]
    FH = F * H
    if tn is None:
        tn = N if N <= 256 else 256              # fat tiles; one step at N=128
    assert N % tn == 0

    # --- layout plumbing (wrapper-side, lane-dense kernel inputs) ---
    xe = jnp.repeat(x.T, H, axis=0)                             # (F*H, N)
    w1_col = params["fs_w1"].reshape(FH, 1)                     # (F*H, 1)
    b1_col = params["fs_b1"].reshape(FH, 1)
    w2T = params["fs_w2"].reshape(FH, C).T                      # (C, F*H)
    b2_sum = params["fs_b2"].reshape(F, C).sum(axis=0).reshape(C, 1)
    dT = node_distances.T                                       # (N, N), [j, n]
    normT = normalization_matrix.T
    rw1 = params["rho_w1"].reshape(H)                           # SMEM scalars
    rb1 = params["rho_b1"].reshape(H)
    rw2T = params["rho_w2"].T                                   # (C, H)
    rb2 = params["rho_b2"].reshape(C, 1)

    out_T = pl.pallas_call(
        _gnan_fused_kernel,
        out_shape=jax.ShapeDtypeStruct((C, N), jnp.float32),
        grid_spec=pltpu.PrefetchScalarGridSpec(
            num_scalar_prefetch=0,
            grid=(N // tn,),
            in_specs=[
                pl.BlockSpec(memory_space=pltpu.MemorySpace.SMEM),   # rho w1
                pl.BlockSpec(memory_space=pltpu.MemorySpace.SMEM),   # rho b1
                pl.BlockSpec((FH, N), lambda i: (0, 0)),             # x expanded
                pl.BlockSpec((FH, 1), lambda i: (0, 0)),             # feature w1
                pl.BlockSpec((FH, 1), lambda i: (0, 0)),             # feature b1
                pl.BlockSpec((C, FH), lambda i: (0, 0)),             # feature w2^T
                pl.BlockSpec((C, 1), lambda i: (0, 0)),              # sum_f b2_f
                pl.BlockSpec((N, tn), lambda i: (0, i)),             # d^T column strip
                pl.BlockSpec((N, tn), lambda i: (0, i)),             # norm^T column strip
                pl.BlockSpec((C, H), lambda i: (0, 0)),              # rho w2^T
                pl.BlockSpec((C, 1), lambda i: (0, 0)),              # rho b2
            ],
            out_specs=pl.BlockSpec((C, tn), lambda i: (0, i)),       # lane-dense out^T
        ),
        compiler_params=pltpu.CompilerParams(
            dimension_semantics=("parallel",)),                      # both TCs on v7x
    )(rw1, rb1, xe, w1_col, b1_col, w2T, b2_sum, dT, normT, rw2T, rb2)

    return out_T.T                                                    # (N, C) == PyTorch out.T


# ----------------------------------------------------------------------------
# Parameter init (matches shapes of TensorGNAN.__init__ with n_layers=2,
# bias=True, is_graph_task=False): xavier_normal_(gain), biases = 0.
# ----------------------------------------------------------------------------
def init_params(key, in_channels, hidden, out_channels, gain=0.01):
    def xavier(k, shape, fan_in, fan_out):
        std = gain * np.sqrt(2.0 / (fan_in + fan_out))
        return (std * jax.random.normal(k, shape)).astype(jnp.float32)

    k = jax.random.split(key, 4)
    return dict(
        # per-feature MLPs: Linear(1,H) -> ReLU -> (Dropout p=0) -> Linear(H,C)
        fs_w1=xavier(k[0], (in_channels, 1, hidden), 1, hidden),
        fs_b1=jnp.zeros((in_channels, 1, hidden), jnp.float32),
        fs_w2=xavier(k[1], (in_channels, hidden, out_channels), hidden, out_channels),
        fs_b2=jnp.zeros((in_channels, 1, out_channels), jnp.float32),
        # rho MLP: Linear(1,H) -> ReLU -> Linear(H,C), bias=True (not graph task)
        rho_w1=xavier(k[2], (1, hidden), 1, hidden),
        rho_b1=jnp.zeros((1, hidden), jnp.float32),
        rho_w2=xavier(k[3], (hidden, out_channels), hidden, out_channels),
        rho_b2=jnp.zeros((1, out_channels), jnp.float32),
    )


# pure-JAX reference for verification
def tensor_gnan_reference(x, node_distances, normalization_matrix, params):
    N, F = x.shape
    fx = []
    for f in range(F):
        col = x[:, f:f + 1]                                        # (N, 1)
        h = jnp.maximum(col @ params["fs_w1"][f] + params["fs_b1"][f], 0.0)
        fx.append(h @ params["fs_w2"][f] + params["fs_b2"][f])     # (N, C)
    fx = jnp.stack(fx, axis=1)                                     # (N, F, C)
    s = fx.sum(axis=1)                                             # (N, C)
    d = (node_distances / normalization_matrix).reshape(-1, 1)
    h = jnp.maximum(d @ params["rho_w1"] + params["rho_b1"], 0.0)
    m = (h @ params["rho_w2"] + params["rho_b2"]).reshape(N, N, -1)
    return jnp.einsum("njc,jc->nc", m, s)                          # == out.T in PyTorch


if __name__ == "__main__":
    # TODO(synk): only the is_graph_task=False readout path is implemented;
    #             dropout uses eval semantics (p=0.0); edge_index unused by forward.
    N, F, H, C = 128, 4, 32, 8        # nodes, in_channels, hidden, out_channels
    key = jax.random.PRNGKey(0)
    kx, kd, kn, kp = jax.random.split(key, 4)

    x = jax.random.normal(kx, (N, F), dtype=jnp.float32)
    node_distances = jax.random.uniform(kd, (N, N), dtype=jnp.float32,
                                        minval=0.0, maxval=4.0)
    normalization_matrix = jax.random.uniform(kn, (N, N), dtype=jnp.float32,
                                              minval=0.5, maxval=1.5)
    # larger gain than the module default (0.01) so the numerical check is meaningful
    params = init_params(kp, F, H, C, gain=0.5)

    out = tensor_gnan_forward(x, node_distances, normalization_matrix, params)
    out = jax.block_until_ready(out)

    ref = tensor_gnan_reference(x, node_distances, normalization_matrix, params)
    np.testing.assert_allclose(np.asarray(out), np.asarray(ref), rtol=1e-4, atol=1e-5)
    assert out.shape == (N, C)
    print("KERNEL_OK")
</pallas_src>

<mosaic_0001>
module attributes {stable_mosaic.version = 11 : i64} {
  func.func @_gnan_fused_kernel(%arg0: i32, %arg1: memref<32xf32, #tpu.memory_space<smem>>, %arg2: memref<32xf32, #tpu.memory_space<smem>>, %arg3: memref<128x128xf32, #tpu.memory_space<vmem>>, %arg4: memref<128x1xf32, #tpu.memory_space<vmem>>, %arg5: memref<128x1xf32, #tpu.memory_space<vmem>>, %arg6: memref<8x128xf32, #tpu.memory_space<vmem>>, %arg7: memref<8x1xf32, #tpu.memory_space<vmem>>, %arg8: memref<128x128xf32, #tpu.memory_space<vmem>>, %arg9: memref<128x128xf32, #tpu.memory_space<vmem>>, %arg10: memref<8x32xf32, #tpu.memory_space<vmem>>, %arg11: memref<8x1xf32, #tpu.memory_space<vmem>>, %arg12: memref<8x128xf32, #tpu.memory_space<vmem>>) attributes {dimension_semantics = [#tpu.dimension_semantics<parallel>], iteration_bounds = array<i64: 1>, scalar_prefetch = 0 : i64, scratch_operands = 0 : i64, tpu.core_type = #tpu.core_type<tc>, window_params = [{transform_indices = @transform_0, window_bounds = array<i64: 32>}, {transform_indices = @transform_1, window_bounds = array<i64: 32>}, {pipeline_mode = #tpu.pipeline_mode<synchronous>, transform_indices = @transform_2, window_bounds = array<i64: 128, 128>}, {pipeline_mode = #tpu.pipeline_mode<synchronous>, transform_indices = @transform_3, window_bounds = array<i64: 128, 1>}, {pipeline_mode = #tpu.pipeline_mode<synchronous>, transform_indices = @transform_4, window_bounds = array<i64: 128, 1>}, {pipeline_mode = #tpu.pipeline_mode<synchronous>, transform_indices = @transform_5, window_bounds = array<i64: 8, 128>}, {pipeline_mode = #tpu.pipeline_mode<synchronous>, transform_indices = @transform_6, window_bounds = array<i64: 8, 1>}, {transform_indices = @transform_7, window_bounds = array<i64: 128, 128>}, {transform_indices = @transform_8, window_bounds = array<i64: 128, 128>}, {pipeline_mode = #tpu.pipeline_mode<synchronous>, transform_indices = @transform_9, window_bounds = array<i64: 8, 32>}, {pipeline_mode = #tpu.pipeline_mode<synchronous>, transform_indices = @transform_10, window_bounds = array<i64: 8, 1>}, {transform_indices = @transform_11, window_bounds = array<i64: 8, 128>}]} {
    %c0 = arith.constant 0 : index
    %c0_0 = arith.constant 0 : index
    %0 = vector.load %arg4[%c0, %c0_0] : memref<128x1xf32, #tpu.memory_space<vmem>>, vector<128x1xf32>
    %c0_1 = arith.constant 0 : index
    %c0_2 = arith.constant 0 : index
    %1 = vector.load %arg3[%c0_1, %c0_2] : memref<128x128xf32, #tpu.memory_space<vmem>>, vector<128x128xf32>
    %2 = vector.broadcast %0 : vector<128x1xf32> to vector<128x128xf32>
    %3 = arith.mulf %2, %1 : vector<128x128xf32>
    %c0_3 = arith.constant 0 : index
    %c0_4 = arith.constant 0 : index
    %4 = vector.load %arg5[%c0_3, %c0_4] : memref<128x1xf32, #tpu.memory_space<vmem>>, vector<128x1xf32>
    %5 = vector.broadcast %4 : vector<128x1xf32> to vector<128x128xf32>
    %6 = arith.addf %3, %5 : vector<128x128xf32>
    %cst = arith.constant 0.000000e+00 : f32
    %7 = vector.broadcast %cst : f32 to vector<128x128xf32>
    %8 = arith.maximumf %6, %7 : vector<128x128xf32>
    %c0_5 = arith.constant 0 : index
    %c0_6 = arith.constant 0 : index
    %9 = vector.load %arg6[%c0_5, %c0_6] : memref<8x128xf32, #tpu.memory_space<vmem>>, vector<8x128xf32>
    %cst_7 = arith.constant dense<0.000000e+00> : vector<8x128xf32>
    %10 = tpu.matmul %9, %8, %cst_7 {dimension_numbers = #tpu.dot_dimension_numbers<[1], [0], [0], [1], [0, 0, 1, 1], [], []>} : vector<8x128xf32>, vector<128x128xf32>, vector<8x128xf32> -> vector<8x128xf32>
    %c0_8 = arith.constant 0 : index
    %c0_9 = arith.constant 0 : index
    %11 = vector.load %arg7[%c0_8, %c0_9] : memref<8x1xf32, #tpu.memory_space<vmem>>, vector<8x1xf32>
    %12 = vector.broadcast %11 : vector<8x1xf32> to vector<8x128xf32>
    %13 = arith.addf %10, %12 : vector<8x128xf32>
    %c0_10 = arith.constant 0 : index
    %c0_11 = arith.constant 0 : index
    %14 = vector.load %arg8[%c0_10, %c0_11] : memref<128x128xf32, #tpu.memory_space<vmem>>, vector<128x128xf32>
    %c0_12 = arith.constant 0 : index
    %c0_13 = arith.constant 0 : index
    %15 = vector.load %arg9[%c0_12, %c0_13] : memref<128x128xf32, #tpu.memory_space<vmem>>, vector<128x128xf32>
    %16 = arith.divf %14, %15 : vector<128x128xf32>
    %c0_14 = arith.constant 0 : index
    %c0_15 = arith.constant 0 : index
    %17 = vector.load %arg10[%c0_14, %c0_15] : memref<8x32xf32, #tpu.memory_space<vmem>>, vector<8x32xf32>
    %cst_16 = arith.constant 0.000000e+00 : f32
    %18 = vector.broadcast %cst_16 : f32 to vector<8x128xf32>
    %c0_17 = arith.constant 0 : index
    %19 = memref.load %arg1[%c0_17] : memref<32xf32, #tpu.memory_space<smem>>
    %c0_18 = arith.constant 0 : index
    %20 = memref.load %arg2[%c0_18] : memref<32xf32, #tpu.memory_space<smem>>
    %21 = vector.broadcast %19 : f32 to vector<128x128xf32>
    %22 = arith.mulf %16, %21 : vector<128x128xf32>
    %23 = vector.broadcast %20 : f32 to vector<128x128xf32>
    %24 = arith.addf %22, %23 : vector<128x128xf32>
    %cst_19 = arith.constant 0.000000e+00 : f32
    %25 = vector.broadcast %cst_19 : f32 to vector<128x128xf32>
    %26 = arith.maximumf %24, %25 : vector<128x128xf32>
    %cst_20 = arith.constant dense<0.000000e+00> : vector<8x128xf32>
    %27 = tpu.matmul %13, %26, %cst_20 {dimension_numbers = #tpu.dot_dimension_numbers<[1], [0], [0], [1], [0, 0, 1, 1], [], []>} : vector<8x128xf32>, vector<128x128xf32>, vector<8x128xf32> -> vector<8x128xf32>
    %28 = vector.extract_strided_slice %17 {offsets = [0, 0], sizes = [8, 1], strides = [1, 1]} : vector<8x32xf32> to vector<8x1xf32>
    %29 = vector.broadcast %28 : vector<8x1xf32> to vector<8x128xf32>
    %30 = arith.mulf %29, %27 : vector<8x128xf32>
    %31 = arith.addf %18, %30 : vector<8x128xf32>
    %c1 = arith.constant 1 : index
    %32 = memref.load %arg1[%c1] : memref<32xf32, #tpu.memory_space<smem>>
    %c1_21 = arith.constant 1 : index
    %33 = memref.load %arg2[%c1_21] : memref<32xf32, #tpu.memory_space<smem>>
    %34 = vector.broadcast %32 : f32 to vector<128x128xf32>
    %35 = arith.mulf %16, %34 : vector<128x128xf32>
    %36 = vector.broadcast %33 : f32 to vector<128x128xf32>
    %37 = arith.addf %35, %36 : vector<128x128xf32>
    %cst_22 = arith.constant 0.000000e+00 : f32
    %38 = vector.broadcast %cst_22 : f32 to vector<128x128xf32>
    %39 = arith.maximumf %37, %38 : vector<128x128xf32>
    %cst_23 = arith.constant dense<0.000000e+00> : vector<8x128xf32>
    %40 = tpu.matmul %13, %39, %cst_23 {dimension_numbers = #tpu.dot_dimension_numbers<[1], [0], [0], [1], [0, 0, 1, 1], [], []>} : vector<8x128xf32>, vector<128x128xf32>, vector<8x128xf32> -> vector<8x128xf32>
    %41 = vector.extract_strided_slice %17 {offsets = [0, 1], sizes = [8, 1], strides = [1, 1]} : vector<8x32xf32> to vector<8x1xf32>
    %42 = vector.broadcast %41 : vector<8x1xf32> to vector<8x128xf32>
    %43 = arith.mulf %42, %40 : vector<8x128xf32>
    %44 = arith.addf %31, %43 : vector<8x128xf32>
    %c2 = arith.constant 2 : index
    %45 = memref.load %arg1[%c2] : memref<32xf32, #tpu.memory_space<smem>>
    %c2_24 = arith.constant 2 : index
    %46 = memref.load %arg2[%c2_24] : memref<32xf32, #tpu.memory_space<smem>>
    %47 = vector.broadcast %45 : f32 to vector<128x128xf32>
    %48 = arith.mulf %16, %47 : vector<128x128xf32>
    %49 = vector.broadcast %46 : f32 to vector<128x128xf32>
    %50 = arith.addf %48, %49 : vector<128x128xf32>
    %cst_25 = arith.constant 0.000000e+00 : f32
    %51 = vector.broadcast %cst_25 : f32 to vector<128x128xf32>
    %52 = arith.maximumf %50, %51 : vector<128x128xf32>
    %cst_26 = arith.constant dense<0.000000e+00> : vector<8x128xf32>
    %53 = tpu.matmul %13, %52, %cst_26 {dimension_numbers = #tpu.dot_dimension_numbers<[1], [0], [0], [1], [0, 0, 1, 1], [], []>} : vector<8x128xf32>, vector<128x128xf32>, vector<8x128xf32> -> vector<8x128xf32>
    %54 = vector.extract_strided_slice %17 {offsets = [0, 2], sizes = [8, 1], strides = [1, 1]} : vector<8x32xf32> to vector<8x1xf32>
    %55 = vector.broadcast %54 : vector<8x1xf32> to vector<8x128xf32>
    %56 = arith.mulf %55, %53 : vector<8x128xf32>
    %57 = arith.addf %44, %56 : vector<8x128xf32>
    %c3 = arith.constant 3 : index
    %58 = memref.load %arg1[%c3] : memref<32xf32, #tpu.memory_space<smem>>
    %c3_27 = arith.constant 3 : index
    %59 = memref.load %arg2[%c3_27] : memref<32xf32, #tpu.memory_space<smem>>
    %60 = vector.broadcast %58 : f32 to vector<128x128xf32>
    %61 = arith.mulf %16, %60 : vector<128x128xf32>
    %62 = vector.broadcast %59 : f32 to vector<128x128xf32>
    %63 = arith.addf %61, %62 : vector<128x128xf32>
    %cst_28 = arith.constant 0.000000e+00 : f32
    %64 = vector.broadcast %cst_28 : f32 to vector<128x128xf32>
    %65 = arith.maximumf %63, %64 : vector<128x128xf32>
    %cst_29 = arith.constant dense<0.000000e+00> : vector<8x128xf32>
    %66 = tpu.matmul %13, %65, %cst_29 {dimension_numbers = #tpu.dot_dimension_numbers<[1], [0], [0], [1], [0, 0, 1, 1], [], []>} : vector<8x128xf32>, vector<128x128xf32>, vector<8x128xf32> -> vector<8x128xf32>
    %67 = vector.extract_strided_slice %17 {offsets = [0, 3], sizes = [8, 1], strides = [1, 1]} : vector<8x32xf32> to vector<8x1xf32>
    %68 = vector.broadcast %67 : vector<8x1xf32> to vector<8x128xf32>
    %69 = arith.mulf %68, %66 : vector<8x128xf32>
    %70 = arith.addf %57, %69 : vector<8x128xf32>
    %c4 = arith.constant 4 : index
    %71 = memref.load %arg1[%c4] : memref<32xf32, #tpu.memory_space<smem>>
    %c4_30 = arith.constant 4 : index
    %72 = memref.load %arg2[%c4_30] : memref<32xf32, #tpu.memory_space<smem>>
    %73 = vector.broadcast %71 : f32 to vector<128x128xf32>
    %74 = arith.mulf %16, %73 : vector<128x128xf32>
    %75 = vector.broadcast %72 : f32 to vector<128x128xf32>
    %76 = arith.addf %74, %75 : vector<128x128xf32>
    %cst_31 = arith.constant 0.000000e+00 : f32
    %77 = vector.broadcast %cst_31 : f32 to vector<128x128xf32>
    %78 = arith.maximumf %76, %77 : vector<128x128xf32>
    %cst_32 = arith.constant dense<0.000000e+00> : vector<8x128xf32>
    %79 = tpu.matmul %13, %78, %cst_32 {dimension_numbers = #tpu.dot_dimension_numbers<[1], [0], [0], [1], [0, 0, 1, 1], [], []>} : vector<8x128xf32>, vector<128x128xf32>, vector<8x128xf32> -> vector<8x128xf32>
    %80 = vector.extract_strided_slice %17 {offsets = [0, 4], sizes = [8, 1], strides = [1, 1]} : vector<8x32xf32> to vector<8x1xf32>
    %81 = vector.broadcast %80 : vector<8x1xf32> to vector<8x128xf32>
    %82 = arith.mulf %81, %79 : vector<8x128xf32>
    %83 = arith.addf %70, %82 : vector<8x128xf32>
    %c5 = arith.constant 5 : index
    %84 = memref.load %arg1[%c5] : memref<32xf32, #tpu.memory_space<smem>>
    %c5_33 = arith.constant 5 : index
    %85 = memref.load %arg2[%c5_33] : memref<32xf32, #tpu.memory_space<smem>>
    %86 = vector.broadcast %84 : f32 to vector<128x128xf32>
    %87 = arith.mulf %16, %86 : vector<128x128xf32>
    %88 = vector.broadcast %85 : f32 to vector<128x128xf32>
    %89 = arith.addf %87, %88 : vector<128x128xf32>
    %cst_34 = arith.constant 0.000000e+00 : f32
    %90 = vector.broadcast %cst_34 : f32 to vector<128x128xf32>
    %91 = arith.maximumf %89, %90 : vector<128x128xf32>
    %cst_35 = arith.constant dense<0.000000e+00> : vector<8x128xf32>
    %92 = tpu.matmul %13, %91, %cst_35 {dimension_numbers = #tpu.dot_dimension_numbers<[1], [0], [0], [1], [0, 0, 1, 1], [], []>} : vector<8x128xf32>, vector<128x128xf32>, vector<8x128xf32> -> vector<8x128xf32>
    %93 = vector.extract_strided_slice %17 {offsets = [0, 5], sizes = [8, 1], strides = [1, 1]} : vector<8x32xf32> to vector<8x1xf32>
    %94 = vector.broadcast %93 : vector<8x1xf32> to vector<8x128xf32>
    %95 = arith.mulf %94, %92 : vector<8x128xf32>
    %96 = arith.addf %83, %95 : vector<8x128xf32>
    %c6 = arith.constant 6 : index
    %97 = memref.load %arg1[%c6] : memref<32xf32, #tpu.memory_space<smem>>
    %c6_36 = arith.constant 6 : index
    %98 = memref.load %arg2[%c6_36] : memref<32xf32, #tpu.memory_space<smem>>
    %99 = vector.broadcast %97 : f32 to vector<128x128xf32>
    %100 = arith.mulf %16, %99 : vector<128x128xf32>
    %101 = vector.broadcast %98 : f32 to vector<128x128xf32>
    %102 = arith.addf %100, %101 : vector<128x128xf32>
    %cst_37 = arith.constant 0.000000e+00 : f32
    %103 = vector.broadcast %cst_37 : f32 to vector<128x128xf32>
    %104 = arith.maximumf %102, %103 : vector<128x128xf32>
    %cst_38 = arith.constant dense<0.000000e+00> : vector<8x128xf32>
    %105 = tpu.matmul %13, %104, %cst_38 {dimension_numbers = #tpu.dot_dimension_numbers<[1], [0], [0], [1], [0, 0, 1, 1], [], []>} : vector<8x128xf32>, vector<128x128xf32>, vector<8x128xf32> -> vector<8x128xf32>
    %106 = vector.extract_strided_slice %17 {offsets = [0, 6], sizes = [8, 1], strides = [1, 1]} : vector<8x32xf32> to vector<8x1xf32>
    %107 = vector.broadcast %106 : vector<8x1xf32> to vector<8x128xf32>
    %108 = arith.mulf %107, %105 : vector<8x128xf32>
    %109 = arith.addf %96, %108 : vector<8x128xf32>
    %c7 = arith.constant 7 : index
    %110 = memref.load %arg1[%c7] : memref<32xf32, #tpu.memory_space<smem>>
    %c7_39 = arith.constant 7 : index
    %111 = memref.load %arg2[%c7_39] : memref<32xf32, #tpu.memory_space<smem>>
    %112 = vector.broadcast %110 : f32 to vector<128x128xf32>
    %113 = arith.mulf %16, %112 : vector<128x128xf32>
    %114 = vector.broadcast %111 : f32 to vector<128x128xf32>
    %115 = arith.addf %113, %114 : vector<128x128xf32>
    %cst_40 = arith.constant 0.000000e+00 : f32
    %116 = vector.broadcast %cst_40 : f32 to vector<128x128xf32>
    %117 = arith.maximumf %115, %116 : vector<128x128xf32>
    %cst_41 = arith.constant dense<0.000000e+00> : vector<8x128xf32>
    %118 = tpu.matmul %13, %117, %cst_41 {dimension_numbers = #tpu.dot_dimension_numbers<[1], [0], [0], [1], [0, 0, 1, 1], [], []>} : vector<8x128xf32>, vector<128x128xf32>, vector<8x128xf32> -> vector<8x128xf32>
    %119 = vector.extract_strided_slice %17 {offsets = [0, 7], sizes = [8, 1], strides = [1, 1]} : vector<8x32xf32> to vector<8x1xf32>
    %120 = vector.broadcast %119 : vector<8x1xf32> to vector<8x128xf32>
    %121 = arith.mulf %120, %118 : vector<8x128xf32>
    %122 = arith.addf %109, %121 : vector<8x128xf32>
    %c8 = arith.constant 8 : index
    %123 = memref.load %arg1[%c8] : memref<32xf32, #tpu.memory_space<smem>>
    %c8_42 = arith.constant 8 : index
    %124 = memref.load %arg2[%c8_42] : memref<32xf32, #tpu.memory_space<smem>>
    %125 = vector.broadcast %123 : f32 to vector<128x128xf32>
    %126 = arith.mulf %16, %125 : vector<128x128xf32>
    %127 = vector.broadcast %124 : f32 to vector<128x128xf32>
    %128 = arith.addf %126, %127 : vector<128x128xf32>
    %cst_43 = arith.constant 0.000000e+00 : f32
    %129 = vector.broadcast %cst_43 : f32 to vector<128x128xf32>
    %130 = arith.maximumf %128, %129 : vector<128x128xf32>
    %cst_44 = arith.constant dense<0.000000e+00> : vector<8x128xf32>
    %131 = tpu.matmul %13, %130, %cst_44 {dimension_numbers = #tpu.dot_dimension_numbers<[1], [0], [0], [1], [0, 0, 1, 1], [], []>} : vector<8x128xf32>, vector<128x128xf32>, vector<8x128xf32> -> vector<8x128xf32>
    %132 = vector.extract_strided_slice %17 {offsets = [0, 8], sizes = [8, 1], strides = [1, 1]} : vector<8x32xf32> to vector<8x1xf32>
    %133 = vector.broadcast %132 : vector<8x1xf32> to vector<8x128xf32>
    %134 = arith.mulf %133, %131 : vector<8x128xf32>
    %135 = arith.addf %122, %134 : vector<8x128xf32>
    %c9 = arith.constant 9 : index
    %136 = memref.load %arg1[%c9] : memref<32xf32, #tpu.memory_space<smem>>
    %c9_45 = arith.constant 9 : index
    %137 = memref.load %arg2[%c9_45] : memref<32xf32, #tpu.memory_space<smem>>
    %138 = vector.broadcast %136 : f32 to vector<128x128xf32>
    %139 = arith.mulf %16, %138 : vector<128x128xf32>
    %140 = vector.broadcast %137 : f32 to vector<128x128xf32>
    %141 = arith.addf %139, %140 : vector<128x128xf32>
    %cst_46 = arith.constant 0.000000e+00 : f32
    %142 = vector.broadcast %cst_46 : f32 to vector<128x128xf32>
    %143 = arith.maximumf %141, %142 : vector<128x128xf32>
    %cst_47 = arith.constant dense<0.000000e+00> : vector<8x128xf32>
    %144 = tpu.matmul %13, %143, %cst_47 {dimension_numbers = #tpu.dot_dimension_numbers<[1], [0], [0], [1], [0, 0, 1, 1], [], []>} : vector<8x128xf32>, vector<128x128xf32>, vector<8x128xf32> -> vector<8x128xf32>
    %145 = vector.extract_strided_slice %17 {offsets = [0, 9], sizes = [8, 1], strides = [1, 1]} : vector<8x32xf32> to vector<8x1xf32>
    %146 = vector.broadcast %145 : vector<8x1xf32> to vector<8x128xf32>
    %147 = arith.mulf %146, %144 : vector<8x128xf32>
    %148 = arith.addf %135, %147 : vector<8x128xf32>
    %c10 = arith.constant 10 : index
    %149 = memref.load %arg1[%c10] : memref<32xf32, #tpu.memory_space<smem>>
    %c10_48 = arith.constant 10 : index
    %150 = memref.load %arg2[%c10_48] : memref<32xf32, #tpu.memory_space<smem>>
    %151 = vector.broadcast %149 : f32 to vector<128x128xf32>
    %152 = arith.mulf %16, %151 : vector<128x128xf32>
    %153 = vector.broadcast %150 : f32 to vector<128x128xf32>
    %154 = arith.addf %152, %153 : vector<128x128xf32>
    %cst_49 = arith.constant 0.000000e+00 : f32
    %155 = vector.broadcast %cst_49 : f32 to vector<128x128xf32>
    %156 = arith.maximumf %154, %155 : vector<128x128xf32>
    %cst_50 = arith.constant dense<0.000000e+00> : vector<8x128xf32>
    %157 = tpu.matmul %13, %156, %cst_50 {dimension_numbers = #tpu.dot_dimension_numbers<[1], [0], [0], [1], [0, 0, 1, 1], [], []>} : vector<8x128xf32>, vector<128x128xf32>, vector<8x128xf32> -> vector<8x128xf32>
    %158 = vector.extract_strided_slice %17 {offsets = [0, 10], sizes = [8, 1], strides = [1, 1]} : vector<8x32xf32> to vector<8x1xf32>
    %159 = vector.broadcast %158 : vector<8x1xf32> to vector<8x128xf32>
    %160 = arith.mulf %159, %157 : vector<8x128xf32>
    %161 = arith.addf %148, %160 : vector<8x128xf32>
    %c11 = arith.constant 11 : index
    %162 = memref.load %arg1[%c11] : memref<32xf32, #tpu.memory_space<smem>>
    %c11_51 = arith.constant 11 : index
    %163 = memref.load %arg2[%c11_51] : memref<32xf32, #tpu.memory_space<smem>>
    %164 = vector.broadcast %162 : f32 to vector<128x128xf32>
    %165 = arith.mulf %16, %164 : vector<128x128xf32>
    %166 = vector.broadcast %163 : f32 to vector<128x128xf32>
    %167 = arith.addf %165, %166 : vector<128x128xf32>
    %cst_52 = arith.constant 0.000000e+00 : f32
    %168 = vector.broadcast %cst_52 : f32 to vector<128x128xf32>
    %169 = arith.maximumf %167, %168 : vector<128x128xf32>
    %cst_53 = arith.constant dense<0.000000e+00> : vector<8x128xf32>
    %170 = tpu.matmul %13, %169, %cst_53 {dimension_numbers = #tpu.dot_dimension_numbers<[1], [0], [0], [1], [0, 0, 1, 1], [], []>} : vector<8x128xf32>, vector<128x128xf32>, vector<8x128xf32> -> vector<8x128xf32>
    %171 = vector.extract_strided_slice %17 {offsets = [0, 11], sizes = [8, 1], strides = [1, 1]} : vector<8x32xf32> to vector<8x1xf32>
    %172 = vector.broadcast %171 : vector<8x1xf32> to vector<8x128xf32>
    %173 = arith.mulf %172, %170 : vector<8x128xf32>
    %174 = arith.addf %161, %173 : vector<8x128xf32>
    %c12 = arith.constant 12 : index
    %175 = memref.load %arg1[%c12] : memref<32xf32, #tpu.memory_space<smem>>
    %c12_54 = arith.constant 12 : index
    %176 = memref.load %arg2[%c12_54] : memref<32xf32, #tpu.memory_space<smem>>
    %177 = vector.broadcast %175 : f32 to vector<128x128xf32>
    %178 = arith.mulf %16, %177 : vector<128x128xf32>
    %179 = vector.broadcast %176 : f32 to vector<128x128xf32>
    %180 = arith.addf %178, %179 : vector<128x128xf32>
    %cst_55 = arith.constant 0.000000e+00 : f32
    %181 = vector.broadcast %cst_55 : f32 to vector<128x128xf32>
    %182 = arith.maximumf %180, %181 : vector<128x128xf32>
    %cst_56 = arith.constant dense<0.000000e+00> : vector<8x128xf32>
    %183 = tpu.matmul %13, %182, %cst_56 {dimension_numbers = #tpu.dot_dimension_numbers<[1], [0], [0], [1], [0, 0, 1, 1], [], []>} : vector<8x128xf32>, vector<128x128xf32>, vector<8x128xf32> -> vector<8x128xf32>
    %184 = vector.extract_strided_slice %17 {offsets = [0, 12], sizes = [8, 1], strides = [1, 1]} : vector<8x32xf32> to vector<8x1xf32>
    %185 = vector.broadcast %184 : vector<8x1xf32> to vector<8x128xf32>
    %186 = arith.mulf %185, %183 : vector<8x128xf32>
    %187 = arith.addf %174, %186 : vector<8x128xf32>
    %c13 = arith.constant 13 : index
    %188 = memref.load %arg1[%c13] : memref<32xf32, #tpu.memory_space<smem>>
    %c13_57 = arith.constant 13 : index
    %189 = memref.load %arg2[%c13_57] : memref<32xf32, #tpu.memory_space<smem>>
    %190 = vector.broadcast %188 : f32 to vector<128x128xf32>
    %191 = arith.mulf %16, %190 : vector<128x128xf32>
    %192 = vector.broadcast %189 : f32 to vector<128x128xf32>
    %193 = arith.addf %191, %192 : vector<128x128xf32>
    %cst_58 = arith.constant 0.000000e+00 : f32
    %194 = vector.broadcast %cst_58 : f32 to vector<128x128xf32>
    %195 = arith.maximumf %193, %194 : vector<128x128xf32>
    %cst_59 = arith.constant dense<0.000000e+00> : vector<8x128xf32>
    %196 = tpu.matmul %13, %195, %cst_59 {dimension_numbers = #tpu.dot_dimension_numbers<[1], [0], [0], [1], [0, 0, 1, 1], [], []>} : vector<8x128xf32>, vector<128x128xf32>, vector<8x128xf32> -> vector<8x128xf32>
    %197 = vector.extract_strided_slice %17 {offsets = [0, 13], sizes = [8, 1], strides = [1, 1]} : vector<8x32xf32> to vector<8x1xf32>
    %198 = vector.broadcast %197 : vector<8x1xf32> to vector<8x128xf32>
    %199 = arith.mulf %198, %196 : vector<8x128xf32>
    %200 = arith.addf %187, %199 : vector<8x128xf32>
    %c14 = arith.constant 14 : index
    %201 = memref.load %arg1[%c14] : memref<32xf32, #tpu.memory_space<smem>>
    %c14_60 = arith.constant 14 : index
    %202 = memref.load %arg2[%c14_60] : memref<32xf32, #tpu.memory_space<smem>>
    %203 = vector.broadcast %201 : f32 to vector<128x128xf32>
    %204 = arith.mulf %16, %203 : vector<128x128xf32>
    %205 = vector.broadcast %202 : f32 to vector<128x128xf32>
    %206 = arith.addf %204, %205 : vector<128x128xf32>
    %cst_61 = arith.constant 0.000000e+00 : f32
    %207 = vector.broadcast %cst_61 : f32 to vector<128x128xf32>
    %208 = arith.maximumf %206, %207 : vector<128x128xf32>
    %cst_62 = arith.constant dense<0.000000e+00> : vector<8x128xf32>
    %209 = tpu.matmul %13, %208, %cst_62 {dimension_numbers = #tpu.dot_dimension_numbers<[1], [0], [0], [1], [0, 0, 1, 1], [], []>} : vector<8x128xf32>, vector<128x128xf32>, vector<8x128xf32> -> vector<8x128xf32>
    %210 = vector.extract_strided_slice %17 {offsets = [0, 14], sizes = [8, 1], strides = [1, 1]} : vector<8x32xf32> to vector<8x1xf32>
    %211 = vector.broadcast %210 : vector<8x1xf32> to vector<8x128xf32>
    %212 = arith.mulf %211, %209 : vector<8x128xf32>
    %213 = arith.addf %200, %212 : vector<8x128xf32>
    %c15 = arith.constant 15 : index
    %214 = memref.load %arg1[%c15] : memref<32xf32, #tpu.memory_space<smem>>
    %c15_63 = arith.constant 15 : index
    %215 = memref.load %arg2[%c15_63] : memref<32xf32, #tpu.memory_space<smem>>
    %216 = vector.broadcast %214 : f32 to vector<128x128xf32>
    %217 = arith.mulf %16, %216 : vector<128x128xf32>
    %218 = vector.broadcast %215 : f32 to vector<128x128xf32>
    %219 = arith.addf %217, %218 : vector<128x128xf32>
    %cst_64 = arith.constant 0.000000e+00 : f32
    %220 = vector.broadcast %cst_64 : f32 to vector<128x128xf32>
    %221 = arith.maximumf %219, %220 : vector<128x128xf32>
    %cst_65 = arith.constant dense<0.000000e+00> : vector<8x128xf32>
    %222 = tpu.matmul %13, %221, %cst_65 {dimension_numbers = #tpu.dot_dimension_numbers<[1], [0], [0], [1], [0, 0, 1, 1], [], []>} : vector<8x128xf32>, vector<128x128xf32>, vector<8x128xf32> -> vector<8x128xf32>
    %223 = vector.extract_strided_slice %17 {offsets = [0, 15], sizes = [8, 1], strides = [1, 1]} : vector<8x32xf32> to vector<8x1xf32>
    %224 = vector.broadcast %223 : vector<8x1xf32> to vector<8x128xf32>
    %225 = arith.mulf %224, %222 : vector<8x128xf32>
    %226 = arith.addf %213, %225 : vector<8x128xf32>
    %c16 = arith.constant 16 : index
    %227 = memref.load %arg1[%c16] : memref<32xf32, #tpu.memory_space<smem>>
    %c16_66 = arith.constant 16 : index
    %228 = memref.load %arg2[%c16_66] : memref<32xf32, #tpu.memory_space<smem>>
    %229 = vector.broadcast %227 : f32 to vector<128x128xf32>
    %230 = arith.mulf %16, %229 : vector<128x128xf32>
    %231 = vector.broadcast %228 : f32 to vector<128x128xf32>
    %232 = arith.addf %230, %231 : vector<128x128xf32>
    %cst_67 = arith.constant 0.000000e+00 : f32
    %233 = vector.broadcast %cst_67 : f32 to vector<128x128xf32>
    %234 = arith.maximumf %232, %233 : vector<128x128xf32>
    %cst_68 = arith.constant dense<0.000000e+00> : vector<8x128xf32>
    %235 = tpu.matmul %13, %234, %cst_68 {dimension_numbers = #tpu.dot_dimension_numbers<[1], [0], [0], [1], [0, 0, 1, 1], [], []>} : vector<8x128xf32>, vector<128x128xf32>, vector<8x128xf32> -> vector<8x128xf32>
    %236 = vector.extract_strided_slice %17 {offsets = [0, 16], sizes = [8, 1], strides = [1, 1]} : vector<8x32xf32> to vector<8x1xf32>
    %237 = vector.broadcast %236 : vector<8x1xf32> to vector<8x128xf32>
    %238 = arith.mulf %237, %235 : vector<8x128xf32>
    %239 = arith.addf %226, %238 : vector<8x128xf32>
    %c17 = arith.constant 17 : index
    %240 = memref.load %arg1[%c17] : memref<32xf32, #tpu.memory_space<smem>>
    %c17_69 = arith.constant 17 : index
    %241 = memref.load %arg2[%c17_69] : memref<32xf32, #tpu.memory_space<smem>>
    %242 = vector.broadcast %240 : f32 to vector<128x128xf32>
    %243 = arith.mulf %16, %242 : vector<128x128xf32>
    %244 = vector.broadcast %241 : f32 to vector<128x128xf32>
    %245 = arith.addf %243, %244 : vector<128x128xf32>
    %cst_70 = arith.constant 0.000000e+00 : f32
    %246 = vector.broadcast %cst_70 : f32 to vector<128x128xf32>
    %247 = arith.maximumf %245, %246 : vector<128x128xf32>
    %cst_71 = arith.constant dense<0.000000e+00> : vector<8x128xf32>
    %248 = tpu.matmul %13, %247, %cst_71 {dimension_numbers = #tpu.dot_dimension_numbers<[1], [0], [0], [1], [0, 0, 1, 1], [], []>} : vector<8x128xf32>, vector<128x128xf32>, vector<8x128xf32> -> vector<8x128xf32>
    %249 = vector.extract_strided_slice %17 {offsets = [0, 17], sizes = [8, 1], strides = [1, 1]} : vector<8x32xf32> to vector<8x1xf32>
    %250 = vector.broadcast %249 : vector<8x1xf32> to vector<8x128xf32>
    %251 = arith.mulf %250, %248 : vector<8x128xf32>
    %252 = arith.addf %239, %251 : vector<8x128xf32>
    %c18 = arith.constant 18 : index
    %253 = memref.load %arg1[%c18] : memref<32xf32, #tpu.memory_space<smem>>
    %c18_72 = arith.constant 18 : index
    %254 = memref.load %arg2[%c18_72] : memref<32xf32, #tpu.memory_space<smem>>
    %255 = vector.broadcast %253 : f32 to vector<128x128xf32>
    %256 = arith.mulf %16, %255 : vector<128x128xf32>
    %257 = vector.broadcast %254 : f32 to vector<128x128xf32>
    %258 = arith.addf %256, %257 : vector<128x128xf32>
    %cst_73 = arith.constant 0.000000e+00 : f32
    %259 = vector.broadcast %cst_73 : f32 to vector<128x128xf32>
    %260 = arith.maximumf %258, %259 : vector<128x128xf32>
    %cst_74 = arith.constant dense<0.000000e+00> : vector<8x128xf32>
    %261 = tpu.matmul %13, %260, %cst_74 {dimension_numbers = #tpu.dot_dimension_numbers<[1], [0], [0], [1], [0, 0, 1, 1], [], []>} : vector<8x128xf32>, vector<128x128xf32>, vector<8x128xf32> -> vector<8x128xf32>
    %262 = vector.extract_strided_slice %17 {offsets = [0, 18], sizes = [8, 1], strides = [1, 1]} : vector<8x32xf32> to vector<8x1xf32>
    %263 = vector.broadcast %262 : vector<8x1xf32> to vector<8x128xf32>
    %264 = arith.mulf %263, %261 : vector<8x128xf32>
    %265 = arith.addf %252, %264 : vector<8x128xf32>
    %c19 = arith.constant 19 : index
    %266 = memref.load %arg1[%c19] : memref<32xf32, #tpu.memory_space<smem>>
    %c19_75 = arith.constant 19 : index
    %267 = memref.load %arg2[%c19_75] : memref<32xf32, #tpu.memory_space<smem>>
    %268 = vector.broadcast %266 : f32 to vector<128x128xf32>
    %269 = arith.mulf %16, %268 : vector<128x128xf32>
    %270 = vector.broadcast %267 : f32 to vector<128x128xf32>
    %271 = arith.addf %269, %270 : vector<128x128xf32>
    %cst_76 = arith.constant 0.000000e+00 : f32
    %272 = vector.broadcast %cst_76 : f32 to vector<128x128xf32>
    %273 = arith.maximumf %271, %272 : vector<128x128xf32>
    %cst_77 = arith.constant dense<0.000000e+00> : vector<8x128xf32>
    %274 = tpu.matmul %13, %273, %cst_77 {dimension_numbers = #tpu.dot_dimension_numbers<[1], [0], [0], [1], [0, 0, 1, 1], [], []>} : vector<8x128xf32>, vector<128x128xf32>, vector<8x128xf32> -> vector<8x128xf32>
    %275 = vector.extract_strided_slice %17 {offsets = [0, 19], sizes = [8, 1], strides = [1, 1]} : vector<8x32xf32> to vector<8x1xf32>
    %276 = vector.broadcast %275 : vector<8x1xf32> to vector<8x128xf32>
    %277 = arith.mulf %276, %274 : vector<8x128xf32>
    %278 = arith.addf %265, %277 : vector<8x128xf32>
    %c20 = arith.constant 20 : index
    %279 = memref.load %arg1[%c20] : memref<32xf32, #tpu.memory_space<smem>>
    %c20_78 = arith.constant 20 : index
    %280 = memref.load %arg2[%c20_78] : memref<32xf32, #tpu.memory_space<smem>>
    %281 = vector.broadcast %279 : f32 to vector<128x128xf32>
    %282 = arith.mulf %16, %281 : vector<128x128xf32>
    %283 = vector.broadcast %280 : f32 to vector<128x128xf32>
    %284 = arith.addf %282, %283 : vector<128x128xf32>
    %cst_79 = arith.constant 0.000000e+00 : f32
    %285 = vector.broadcast %cst_79 : f32 to vector<128x128xf32>
    %286 = arith.maximumf %284, %285 : vector<128x128xf32>
    %cst_80 = arith.constant dense<0.000000e+00> : vector<8x128xf32>
    %287 = tpu.matmul %13, %286, %cst_80 {dimension_numbers = #tpu.dot_dimension_numbers<[1], [0], [0], [1], [0, 0, 1, 1], [], []>} : vector<8x128xf32>, vector<128x128xf32>, vector<8x128xf32> -> vector<8x128xf32>
    %288 = vector.extract_strided_slice %17 {offsets = [0, 20], sizes = [8, 1], strides = [1, 1]} : vector<8x32xf32> to vector<8x1xf32>
    %289 = vector.broadcast %288 : vector<8x1xf32> to vector<8x128xf32>
    %290 = arith.mulf %289, %287 : vector<8x128xf32>
    %291 = arith.addf %278, %290 : vector<8x128xf32>
    %c21 = arith.constant 21 : index
    %292 = memref.load %arg1[%c21] : memref<32xf32, #tpu.memory_space<smem>>
    %c21_81 = arith.constant 21 : index
    %293 = memref.load %arg2[%c21_81] : memref<32xf32, #tpu.memory_space<smem>>
    %294 = vector.broadcast %292 : f32 to vector<128x128xf32>
    %295 = arith.mulf %16, %294 : vector<128x128xf32>
    %296 = vector.broadcast %293 : f32 to vector<128x128xf32>
    %297 = arith.addf %295, %296 : vector<128x128xf32>
    %cst_82 = arith.constant 0.000000e+00 : f32
    %298 = vector.broadcast %cst_82 : f32 to vector<128x128xf32>
    %299 = arith.maximumf %297, %298 : vector<128x128xf32>
    %cst_83 = arith.constant dense<0.000000e+00> : vector<8x128xf32>
    %300 = tpu.matmul %13, %299, %cst_83 {dimension_numbers = #tpu.dot_dimension_numbers<[1], [0], [0], [1], [0, 0, 1, 1], [], []>} : vector<8x128xf32>, vector<128x128xf32>, vector<8x128xf32> -> vector<8x128xf32>
    %301 = vector.extract_strided_slice %17 {offsets = [0, 21], sizes = [8, 1], strides = [1, 1]} : vector<8x32xf32> to vector<8x1xf32>
    %302 = vector.broadcast %301 : vector<8x1xf32> to vector<8x128xf32>
    %303 = arith.mulf %302, %300 : vector<8x128xf32>
    %304 = arith.addf %291, %303 : vector<8x128xf32>
    %c22 = arith.constant 22 : index
    %305 = memref.load %arg1[%c22] : memref<32xf32, #tpu.memory_space<smem>>
    %c22_84 = arith.constant 22 : index
    %306 = memref.load %arg2[%c22_84] : memref<32xf32, #tpu.memory_space<smem>>
    %307 = vector.broadcast %305 : f32 to vector<128x128xf32>
    %308 = arith.mulf %16, %307 : vector<128x128xf32>
    %309 = vector.broadcast %306 : f32 to vector<128x128xf32>
    %310 = arith.addf %308, %309 : vector<128x128xf32>
    %cst_85 = arith.constant 0.000000e+00 : f32
    %311 = vector.broadcast %cst_85 : f32 to vector<128x128xf32>
    %312 = arith.maximumf %310, %311 : vector<128x128xf32>
    %cst_86 = arith.constant dense<0.000000e+00> : vector<8x128xf32>
    %313 = tpu.matmul %13, %312, %cst_86 {dimension_numbers = #tpu.dot_dimension_numbers<[1], [0], [0], [1], [0, 0, 1, 1], [], []>} : vector<8x128xf32>, vector<128x128xf32>, vector<8x128xf32> -> vector<8x128xf32>
    %314 = vector.extract_strided_slice %17 {offsets = [0, 22], sizes = [8, 1], strides = [1, 1]} : vector<8x32xf32> to vector<8x1xf32>
    %315 = vector.broadcast %314 : vector<8x1xf32> to vector<8x128xf32>
    %316 = arith.mulf %315, %313 : vector<8x128xf32>
    %317 = arith.addf %304, %316 : vector<8x128xf32>
    %c23 = arith.constant 23 : index
    %318 = memref.load %arg1[%c23] : memref<32xf32, #tpu.memory_space<smem>>
    %c23_87 = arith.constant 23 : index
    %319 = memref.load %arg2[%c23_87] : memref<32xf32, #tpu.memory_space<smem>>
    %320 = vector.broadcast %318 : f32 to vector<128x128xf32>
    %321 = arith.mulf %16, %320 : vector<128x128xf32>
    %322 = vector.broadcast %319 : f32 to vector<128x128xf32>
    %323 = arith.addf %321, %322 : vector<128x128xf32>
    %cst_88 = arith.constant 0.000000e+00 : f32
    %324 = vector.broadcast %cst_88 : f32 to vector<128x128xf32>
    %325 = arith.maximumf %323, %324 : vector<128x128xf32>
    %cst_89 = arith.constant dense<0.000000e+00> : vector<8x128xf32>
    %326 = tpu.matmul %13, %325, %cst_89 {dimension_numbers = #tpu.dot_dimension_numbers<[1], [0], [0], [1], [0, 0, 1, 1], [], []>} : vector<8x128xf32>, vector<128x128xf32>, vector<8x128xf32> -> vector<8x128xf32>
    %327 = vector.extract_strided_slice %17 {offsets = [0, 23], sizes = [8, 1], strides = [1, 1]} : vector<8x32xf32> to vector<8x1xf32>
    %328 = vector.broadcast %327 : vector<8x1xf32> to vector<8x128xf32>
    %329 = arith.mulf %328, %326 : vector<8x128xf32>
    %330 = arith.addf %317, %329 : vector<8x128xf32>
    %c24 = arith.constant 24 : index
    %331 = memref.load %arg1[%c24] : memref<32xf32, #tpu.memory_space<smem>>
    %c24_90 = arith.constant 24 : index
    %332 = memref.load %arg2[%c24_90] : memref<32xf32, #tpu.memory_space<smem>>
    %333 = vector.broadcast %331 : f32 to vector<128x128xf32>
    %334 = arith.mulf %16, %333 : vector<128x128xf32>
    %335 = vector.broadcast %332 : f32 to vector<128x128xf32>
    %336 = arith.addf %334, %335 : vector<128x128xf32>
    %cst_91 = arith.constant 0.000000e+00 : f32
    %337 = vector.broadcast %cst_91 : f32 to vector<128x128xf32>
    %338 = arith.maximumf %336, %337 : vector<128x128xf32>
    %cst_92 = arith.constant dense<0.000000e+00> : vector<8x128xf32>
    %339 = tpu.matmul %13, %338, %cst_92 {dimension_numbers = #tpu.dot_dimension_numbers<[1], [0], [0], [1], [0, 0, 1, 1], [], []>} : vector<8x128xf32>, vector<128x128xf32>, vector<8x128xf32> -> vector<8x128xf32>
    %340 = vector.extract_strided_slice %17 {offsets = [0, 24], sizes = [8, 1], strides = [1, 1]} : vector<8x32xf32> to vector<8x1xf32>
    %341 = vector.broadcast %340 : vector<8x1xf32> to vector<8x128xf32>
    %342 = arith.mulf %341, %339 : vector<8x128xf32>
    %343 = arith.addf %330, %342 : vector<8x128xf32>
    %c25 = arith.constant 25 : index
    %344 = memref.load %arg1[%c25] : memref<32xf32, #tpu.memory_space<smem>>
    %c25_93 = arith.constant 25 : index
    %345 = memref.load %arg2[%c25_93] : memref<32xf32, #tpu.memory_space<smem>>
    %346 = vector.broadcast %344 : f32 to vector<128x128xf32>
    %347 = arith.mulf %16, %346 : vector<128x128xf32>
    %348 = vector.broadcast %345 : f32 to vector<128x128xf32>
    %349 = arith.addf %347, %348 : vector<128x128xf32>
    %cst_94 = arith.constant 0.000000e+00 : f32
    %350 = vector.broadcast %cst_94 : f32 to vector<128x128xf32>
    %351 = arith.maximumf %349, %350 : vector<128x128xf32>
    %cst_95 = arith.constant dense<0.000000e+00> : vector<8x128xf32>
    %352 = tpu.matmul %13, %351, %cst_95 {dimension_numbers = #tpu.dot_dimension_numbers<[1], [0], [0], [1], [0, 0, 1, 1], [], []>} : vector<8x128xf32>, vector<128x128xf32>, vector<8x128xf32> -> vector<8x128xf32>
    %353 = vector.extract_strided_slice %17 {offsets = [0, 25], sizes = [8, 1], strides = [1, 1]} : vector<8x32xf32> to vector<8x1xf32>
    %354 = vector.broadcast %353 : vector<8x1xf32> to vector<8x128xf32>
    %355 = arith.mulf %354, %352 : vector<8x128xf32>
    %356 = arith.addf %343, %355 : vector<8x128xf32>
    %c26 = arith.constant 26 : index
    %357 = memref.load %arg1[%c26] : memref<32xf32, #tpu.memory_space<smem>>
    %c26_96 = arith.constant 26 : index
    %358 = memref.load %arg2[%c26_96] : memref<32xf32, #tpu.memory_space<smem>>
    %359 = vector.broadcast %357 : f32 to vector<128x128xf32>
    %360 = arith.mulf %16, %359 : vector<128x128xf32>
    %361 = vector.broadcast %358 : f32 to vector<128x128xf32>
    %362 = arith.addf %360, %361 : vector<128x128xf32>
    %cst_97 = arith.constant 0.000000e+00 : f32
    %363 = vector.broadcast %cst_97 : f32 to vector<128x128xf32>
    %364 = arith.maximumf %362, %363 : vector<128x128xf32>
    %cst_98 = arith.constant dense<0.000000e+00> : vector<8x128xf32>
    %365 = tpu.matmul %13, %364, %cst_98 {dimension_numbers = #tpu.dot_dimension_numbers<[1], [0], [0], [1], [0, 0, 1, 1], [], []>} : vector<8x128xf32>, vector<128x128xf32>, vector<8x128xf32> -> vector<8x128xf32>
    %366 = vector.extract_strided_slice %17 {offsets = [0, 26], sizes = [8, 1], strides = [1, 1]} : vector<8x32xf32> to vector<8x1xf32>
    %367 = vector.broadcast %366 : vector<8x1xf32> to vector<8x128xf32>
    %368 = arith.mulf %367, %365 : vector<8x128xf32>
    %369 = arith.addf %356, %368 : vector<8x128xf32>
    %c27 = arith.constant 27 : index
    %370 = memref.load %arg1[%c27] : memref<32xf32, #tpu.memory_space<smem>>
    %c27_99 = arith.constant 27 : index
    %371 = memref.load %arg2[%c27_99] : memref<32xf32, #tpu.memory_space<smem>>
    %372 = vector.broadcast %370 : f32 to vector<128x128xf32>
    %373 = arith.mulf %16, %372 : vector<128x128xf32>
    %374 = vector.broadcast %371 : f32 to vector<128x128xf32>
    %375 = arith.addf %373, %374 : vector<128x128xf32>
    %cst_100 = arith.constant 0.000000e+00 : f32
    %376 = vector.broadcast %cst_100 : f32 to vector<128x128xf32>
    %377 = arith.maximumf %375, %376 : vector<128x128xf32>
    %cst_101 = arith.constant dense<0.000000e+00> : vector<8x128xf32>
    %378 = tpu.matmul %13, %377, %cst_101 {dimension_numbers = #tpu.dot_dimension_numbers<[1], [0], [0], [1], [0, 0, 1, 1], [], []>} : vector<8x128xf32>, vector<128x128xf32>, vector<8x128xf32> -> vector<8x128xf32>
    %379 = vector.extract_strided_slice %17 {offsets = [0, 27], sizes = [8, 1], strides = [1, 1]} : vector<8x32xf32> to vector<8x1xf32>
    %380 = vector.broadcast %379 : vector<8x1xf32> to vector<8x128xf32>
    %381 = arith.mulf %380, %378 : vector<8x128xf32>
    %382 = arith.addf %369, %381 : vector<8x128xf32>
    %c28 = arith.constant 28 : index
    %383 = memref.load %arg1[%c28] : memref<32xf32, #tpu.memory_space<smem>>
    %c28_102 = arith.constant 28 : index
    %384 = memref.load %arg2[%c28_102] : memref<32xf32, #tpu.memory_space<smem>>
    %385 = vector.broadcast %383 : f32 to vector<128x128xf32>
    %386 = arith.mulf %16, %385 : vector<128x128xf32>
    %387 = vector.broadcast %384 : f32 to vector<128x128xf32>
    %388 = arith.addf %386, %387 : vector<128x128xf32>
    %cst_103 = arith.constant 0.000000e+00 : f32
    %389 = vector.broadcast %cst_103 : f32 to vector<128x128xf32>
    %390 = arith.maximumf %388, %389 : vector<128x128xf32>
    %cst_104 = arith.constant dense<0.000000e+00> : vector<8x128xf32>
    %391 = tpu.matmul %13, %390, %cst_104 {dimension_numbers = #tpu.dot_dimension_numbers<[1], [0], [0], [1], [0, 0, 1, 1], [], []>} : vector<8x128xf32>, vector<128x128xf32>, vector<8x128xf32> -> vector<8x128xf32>
    %392 = vector.extract_strided_slice %17 {offsets = [0, 28], sizes = [8, 1], strides = [1, 1]} : vector<8x32xf32> to vector<8x1xf32>
    %393 = vector.broadcast %392 : vector<8x1xf32> to vector<8x128xf32>
    %394 = arith.mulf %393, %391 : vector<8x128xf32>
    %395 = arith.addf %382, %394 : vector<8x128xf32>
    %c29 = arith.constant 29 : index
    %396 = memref.load %arg1[%c29] : memref<32xf32, #tpu.memory_space<smem>>
    %c29_105 = arith.constant 29 : index
    %397 = memref.load %arg2[%c29_105] : memref<32xf32, #tpu.memory_space<smem>>
    %398 = vector.broadcast %396 : f32 to vector<128x128xf32>
    %399 = arith.mulf %16, %398 : vector<128x128xf32>
    %400 = vector.broadcast %397 : f32 to vector<128x128xf32>
    %401 = arith.addf %399, %400 : vector<128x128xf32>
    %cst_106 = arith.constant 0.000000e+00 : f32
    %402 = vector.broadcast %cst_106 : f32 to vector<128x128xf32>
    %403 = arith.maximumf %401, %402 : vector<128x128xf32>
    %cst_107 = arith.constant dense<0.000000e+00> : vector<8x128xf32>
    %404 = tpu.matmul %13, %403, %cst_107 {dimension_numbers = #tpu.dot_dimension_numbers<[1], [0], [0], [1], [0, 0, 1, 1], [], []>} : vector<8x128xf32>, vector<128x128xf32>, vector<8x128xf32> -> vector<8x128xf32>
    %405 = vector.extract_strided_slice %17 {offsets = [0, 29], sizes = [8, 1], strides = [1, 1]} : vector<8x32xf32> to vector<8x1xf32>
    %406 = vector.broadcast %405 : vector<8x1xf32> to vector<8x128xf32>
    %407 = arith.mulf %406, %404 : vector<8x128xf32>
    %408 = arith.addf %395, %407 : vector<8x128xf32>
    %c30 = arith.constant 30 : index
    %409 = memref.load %arg1[%c30] : memref<32xf32, #tpu.memory_space<smem>>
    %c30_108 = arith.constant 30 : index
    %410 = memref.load %arg2[%c30_108] : memref<32xf32, #tpu.memory_space<smem>>
    %411 = vector.broadcast %409 : f32 to vector<128x128xf32>
    %412 = arith.mulf %16, %411 : vector<128x128xf32>
    %413 = vector.broadcast %410 : f32 to vector<128x128xf32>
    %414 = arith.addf %412, %413 : vector<128x128xf32>
    %cst_109 = arith.constant 0.000000e+00 : f32
    %415 = vector.broadcast %cst_109 : f32 to vector<128x128xf32>
    %416 = arith.maximumf %414, %415 : vector<128x128xf32>
    %cst_110 = arith.constant dense<0.000000e+00> : vector<8x128xf32>
    %417 = tpu.matmul %13, %416, %cst_110 {dimension_numbers = #tpu.dot_dimension_numbers<[1], [0], [0], [1], [0, 0, 1, 1], [], []>} : vector<8x128xf32>, vector<128x128xf32>, vector<8x128xf32> -> vector<8x128xf32>
    %418 = vector.extract_strided_slice %17 {offsets = [0, 30], sizes = [8, 1], strides = [1, 1]} : vector<8x32xf32> to vector<8x1xf32>
    %419 = vector.broadcast %418 : vector<8x1xf32> to vector<8x128xf32>
    %420 = arith.mulf %419, %417 : vector<8x128xf32>
    %421 = arith.addf %408, %420 : vector<8x128xf32>
    %c31 = arith.constant 31 : index
    %422 = memref.load %arg1[%c31] : memref<32xf32, #tpu.memory_space<smem>>
    %c31_111 = arith.constant 31 : index
    %423 = memref.load %arg2[%c31_111] : memref<32xf32, #tpu.memory_space<smem>>
    %424 = vector.broadcast %422 : f32 to vector<128x128xf32>
    %425 = arith.mulf %16, %424 : vector<128x128xf32>
    %426 = vector.broadcast %423 : f32 to vector<128x128xf32>
    %427 = arith.addf %425, %426 : vector<128x128xf32>
    %cst_112 = arith.constant 0.000000e+00 : f32
    %428 = vector.broadcast %cst_112 : f32 to vector<128x128xf32>
    %429 = arith.maximumf %427, %428 : vector<128x128xf32>
    %cst_113 = arith.constant dense<0.000000e+00> : vector<8x128xf32>
    %430 = tpu.matmul %13, %429, %cst_113 {dimension_numbers = #tpu.dot_dimension_numbers<[1], [0], [0], [1], [0, 0, 1, 1], [], []>} : vector<8x128xf32>, vector<128x128xf32>, vector<8x128xf32> -> vector<8x128xf32>
    %431 = vector.extract_strided_slice %17 {offsets = [0, 31], sizes = [8, 1], strides = [1, 1]} : vector<8x32xf32> to vector<8x1xf32>
    %432 = vector.broadcast %431 : vector<8x1xf32> to vector<8x128xf32>
    %433 = arith.mulf %432, %430 : vector<8x128xf32>
    %434 = arith.addf %421, %433 : vector<8x128xf32>
    %c0_114 = arith.constant 0 : index
    %c0_115 = arith.constant 0 : index
    %435 = vector.load %arg11[%c0_114, %c0_115] : memref<8x1xf32, #tpu.memory_space<vmem>>, vector<8x1xf32>
    %cst_116 = arith.constant dense<0.000000e+00> : vector<8xf32>
    %436 = vector.multi_reduction <add>, %13, %cst_116 [1] : vector<8x128xf32> to vector<8xf32>
    %437 = vector.shape_cast %436 : vector<8xf32> to vector<8x1xf32>
    %438 = arith.mulf %435, %437 : vector<8x1xf32>
    %439 = vector.broadcast %438 : vector<8x1xf32> to vector<8x128xf32>
    %440 = arith.addf %434, %439 : vector<8x128xf32>
    %c0_117 = arith.constant 0 : index
    %c0_118 = arith.constant 0 : index
    %441 = vector.load %arg12[%c0_117, %c0_118] : memref<8x128xf32, #tpu.memory_space<vmem>>, vector<8x128xf32>
    tpu.vector_store %arg12[%c0_117, %c0_118], %440 {strides = array<i32>} : memref<8x128xf32, #tpu.memory_space<vmem>>, vector<8x128xf32>,
    return
  }
  func.func @transform_0(%arg0: i32) -> i32 {
    %c0_i32 = arith.constant 0 : i32
    %c0_i32_0 = arith.constant 0 : i32
    return %c0_i32 : i32
  }
  func.func @transform_1(%arg0: i32) -> i32 {
    %c0_i32 = arith.constant 0 : i32
    %c0_i32_0 = arith.constant 0 : i32
    return %c0_i32 : i32
  }
  func.func @transform_2(%arg0: i32) -> (i32, i32) {
    %c0_i32 = arith.constant 0 : i32
    %c0_i32_0 = arith.constant 0 : i32
    %c0_i32_1 = arith.constant 0 : i32
    return %c0_i32, %c0_i32_0 : i32, i32
  }
  func.func @transform_3(%arg0: i32) -> (i32, i32) {
    %c0_i32 = arith.constant 0 : i32
    %c0_i32_0 = arith.constant 0 : i32
    %c0_i32_1 = arith.constant 0 : i32
    return %c0_i32, %c0_i32_0 : i32, i32
  }
  func.func @transform_4(%arg0: i32) -> (i32, i32) {
    %c0_i32 = arith.constant 0 : i32
    %c0_i32_0 = arith.constant 0 : i32
    %c0_i32_1 = arith.constant 0 : i32
    return %c0_i32, %c0_i32_0 : i32, i32
  }
  func.func @transform_5(%arg0: i32) -> (i32, i32) {
    %c0_i32 = arith.constant 0 : i32
    %c0_i32_0 = arith.constant 0 : i32
    %c0_i32_1 = arith.constant 0 : i32
    return %c0_i32, %c0_i32_0 : i32, i32
  }
  func.func @transform_6(%arg0: i32) -> (i32, i32) {
    %c0_i32 = arith.constant 0 : i32
    %c0_i32_0 = arith.constant 0 : i32
    %c0_i32_1 = arith.constant 0 : i32
    return %c0_i32, %c0_i32_0 : i32, i32
  }
  func.func @transform_7(%arg0: i32) -> (i32, i32) {
    %c0_i32 = arith.constant 0 : i32
    %c0_i32_0 = arith.constant 0 : i32
    return %c0_i32, %arg0 : i32, i32
  }
  func.func @transform_8(%arg0: i32) -> (i32, i32) {
    %c0_i32 = arith.constant 0 : i32
    %c0_i32_0 = arith.constant 0 : i32
    return %c0_i32, %arg0 : i32, i32
  }
  func.func @transform_9(%arg0: i32) -> (i32, i32) {
    %c0_i32 = arith.constant 0 : i32
    %c0_i32_0 = arith.constant 0 : i32
    %c0_i32_1 = arith.constant 0 : i32
    return %c0_i32, %c0_i32_0 : i32, i32
  }
  func.func @transform_10(%arg0: i32) -> (i32, i32) {
    %c0_i32 = arith.constant 0 : i32
    %c0_i32_0 = arith.constant 0 : i32
    %c0_i32_1 = arith.constant 0 : i32
    return %c0_i32, %c0_i32_0 : i32, i32
  }
  func.func @transform_11(%arg0: i32) -> (i32, i32) {
    %c0_i32 = arith.constant 0 : i32
    %c0_i32_0 = arith.constant 0 : i32
    return %c0_i32, %arg0 : i32, i32
  }
}

</mosaic_0001>

<bundles_post_ra>
// kernel: tpu_custom_call.1
= control target key start
LH: loop header
LB: loop body
LE: loop exit
PB: predicated region body
PF: predicated region fallthrough
CT: control target
= control target key end

     0   :  { %16 = vsyncpa [#allocation6], 0  ;;  %s6206_s0 = inlined_call_operand.vmem [shape: f32[32], index: 0, kind: input, shape index: {}]   ;;  %s6207_s1 = inlined_call_operand.hbm [shape: f32[32], index: 1, kind: input, shape index: {}]   ;;  %s6208_s2 = inlined_call_operand.vmem [shape: f32[128,128], index: 2, kind: input, shape index: {}]   ;;  %s6209_s3 = inlined_call_operand.vmem [shape: f32[128,1], index: 3, kind: input, shape index: {}]   ;;  %s6210_s4 = inlined_call_operand.vmem [shape: f32[128,1], index: 4, kind: input, shape index: {}]   ;;  %s6211_s5 = inlined_call_operand.vmem [shape: f32[8,128], index: 5, kind: input, shape index: {}]   ;;  %s6212_s6 = inlined_call_operand.vmem [shape: f32[8,1], index: 6, kind: input, shape index: {}]   ;;  %s6213_s7 = inlined_call_operand.vmem [shape: f32[128,128], index: 7, kind: input, shape index: {}]   ;;  %s6214_s8 = inlined_call_operand.hbm [shape: f32[128,128], index: 8, kind: input, shape index: {}]   ;;  %s6215_s9 = inlined_call_operand.vmem [shape: f32[8,32], index: 9, kind: input, shape index: {}]   ;;  %s6216_s10 = inlined_call_operand.vmem [shape: f32[8,1], index: 10, kind: input, shape index: {}]   ;;  %s6217_s11 = inlined_call_operand.hbm [shape: f32[8,128], index: 11, kind: output, shape index: {}]  }
   0x1   :  { %17 = vsyncpa [#allocation5], 0 }
   0x2   :  { %18 = vsyncpa [#allocation3], 0 }
   0x3   :  { %19 = vsyncpa [#allocation4], 0  ;;  %s25_s19 = sshll.u32 %s6206_s0, 4  ;;  %s34_s22 = sshll.u32 %s6207_s1, 4  ;;  %s26_s19 = int_to_ptr.vmem [resolvable:$true] %s25_s19  ;;  %s35_s22 = int_to_ptr.hbm [resolvable:$true] %s34_s22 }
   0x4   :  { %s3415_s23 = smov [#allocation2]   ;;  %s3416_s24 = smov [#allocation7]  }
   0x5   :  { %28 = dma.vmem_to_smem %s26_s19, 16, %s3415_s23, [#allocation6]  }
   0x6   :  { %37 = dma.hbm_to_smem %s35_s22, 16, %s3416_s24, [#allocation5]  }
   0x7   :  { %s54_s27 = sshll.u32 %s6214_s8, 4  ;;  %s3417_s28 = smov [#allocation8]   ;;  %s55_s27 = int_to_ptr.hbm [resolvable:$true] %s54_s27 }
   0x8   :  { %s56_s29 = sshll.u32 %s3417_s28, 4  ;;  %s3418_s30 = smov 128   ;;  %s57_s29 = int_to_ptr.vmem [resolvable:$true] %s56_s29 }
   0x9   :  { %s3419_s0 = smov 8  }
   0xa   :  { %62 = dma.hbm_to_vmem [thread:$0]  %s55_s27, 2048, %s57_s29, [#allocation3], %s3418_s30, %s3418_s30, %s3419_s0  }
   0xb   :  { %3407 = dma.done.wait [#allocation6], 16  }
   0xc   :  { %3408 = vsyncadd [#allocation6], 4294967280 }
   0xd   :  { %3409 = dma.done.wait [#allocation5], 16  }
   0xe   :  { %3410 = vsyncadd [#allocation5], 4294967280 }
   0xf   :  { %3411 = dma.done.wait [#allocation3], 2048  }
  0x10   :  { %3412 = vsyncadd [#allocation3], 4294965248 }
  0x11   :  { %79 = sfence }
  0x12   :  { %v222_v0 = vld [vmem:[%s6210_s4 + $0x70] sm:$0xff]  ;;  %v223_v1 = vld [vmem:[%s6210_s4 + $0x78] sm:$0xff]  ;;  %v3420_v3 = vmov 0   ;;  %v92_v4 = vld [vmem:[%s6209_s3 + $0x60] sm:$0xff]  ;;  %s3660_s29 = sld [smem:[#allocation2]] }
  0x13   :  { %v95_v2 = vld [vmem:[%s6209_s3 + $0x78] sm:$0xff]  ;;  %3265 = vset.pattern.permute.xlu2 %v3420_v3  ;;  %3264 = vset.pattern.permute.xlu1 %v3420_v3  ;;  %v94_v5 = vld [vmem:[%s6209_s3 + $0x70] sm:$0xff]  ;;  %v93_v6 = vld [vmem:[%s6209_s3 + $0x68] sm:$0xff]  ;;  %s3665_s1 = sld [smem:[#allocation7]] }
  0x14   :  { %3263 = vset.pattern.permute.xlu0 %v3420_v3  ;;  %296 = vperm.xlu2 %3265, %v222_v0   ;;  %v220_v7 = vld [vmem:[%s6210_s4 + $0x60] sm:$0xff]  ;;  %v221_v8 = vld [vmem:[%s6210_s4 + $0x68] sm:$0xff]  ;;  %v91_v9 = vld [vmem:[%s6209_s3 + $0x58] sm:$0xff]  ;;  %s3674_s13 = sld [smem:[#allocation2 + $0x2]] }
  0x15   :  { %301 = vperm.xlu1 %3264, %v223_v1   ;;  %189 = vperm.xlu0 %3263, %v95_v2   ;;  %v89_v10 = vld [vmem:[%s6209_s3 + $0x48] sm:$0xff]  ;;  %v219_v11 = vld [vmem:[%s6210_s4 + $0x58] sm:$0xff]  ;;  %v90_v12 = vld [vmem:[%s6209_s3 + $0x50] sm:$0xff]  ;;  %s3676_s8 = sld [smem:[#allocation7 + $0x2]] }
  0x16   :  { %v217_v13 = vld [vmem:[%s6210_s4 + $0x48] sm:$0xff]  ;;  %v218_v14 = vld [vmem:[%s6210_s4 + $0x50] sm:$0xff]  ;;  %v88_v15 = vld [vmem:[%s6209_s3 + $0x40] sm:$0xff]  ;;  %s3680_s14 = sld [smem:[#allocation2 + $0x3]] }
  0x17   :  { %v86_v16 = vld [vmem:[%s6209_s3 + $0x30] sm:$0xff]  ;;  %v216_v17 = vld [vmem:[%s6210_s4 + $0x40] sm:$0xff]  ;;  %v87_v18 = vld [vmem:[%s6209_s3 + $0x38] sm:$0xff]  ;;  %s3685_s17 = sld [smem:[#allocation7 + $0x3]] }
  0x18   :  { %v214_v19 = vld [vmem:[%s6210_s4 + $0x30] sm:$0xff]  ;;  %v215_v20 = vld [vmem:[%s6210_s4 + $0x38] sm:$0xff]  ;;  %v85_v21 = vld [vmem:[%s6209_s3 + $0x28] sm:$0xff]  ;;  %s4359_s25 = sld [smem:[#allocation2 + $0x4]] }
  0x19   :  { %v83_v22 = vld [vmem:[%s6209_s3 + $0x18] sm:$0xff]  ;;  %v213_v23 = vld [vmem:[%s6210_s4 + $0x28] sm:$0xff]  ;;  %v84_v24 = vld [vmem:[%s6209_s3 + $0x20] sm:$0xff]  ;;  %s4375_s26 = sld [smem:[#allocation7 + $0x4]] }
  0x1a   :  { %v211_v25 = vld [vmem:[%s6210_s4 + $0x18] sm:$0xff]  ;;  %v212_v26 = vld [vmem:[%s6210_s4 + $0x20] sm:$0xff]  ;;  %v82_v27 = vld [vmem:[%s6209_s3 + $0x10] sm:$0xff]  ;;  %s4392_s30 = sld [smem:[#allocation2 + $0x6]] }
  0x1b   :  { %v80_v28 = vld [vmem:[%s6209_s3] sm:$0xff]  ;;  %v210_v29 = vld [vmem:[%s6210_s4 + $0x10] sm:$0xff]  ;;  %v81_v30 = vld [vmem:[%s6209_s3 + $0x8] sm:$0xff]  ;;  %s3667_s3 = sld [smem:[#allocation2 + $0x1]] }
  0x1c   :  { %174 = vperm.xlu2 %3265, %v92_v4   ;;  %v337_v31 = vld [vmem:[%s6212_s6] sm:$0xff]  ;;  %v209_v33 = vld [vmem:[%s6210_s4 + $0x8] sm:$0xff]  ;;  %v111_v38 = vld [vmem:[%s6208_s2 + $0x78] sm:$0xff]  ;;  %s3669_s6 = sld [smem:[#allocation7 + $0x1]] }
  0x1d   :  { %184 = vperm.xlu0 %3263, %v94_v5   ;;  %179 = vperm.xlu1 %3264, %v93_v6   ;;  %v208_v32 = vld [vmem:[%s6210_s4] sm:$0xff]  ;;  %v110_v45 = vld [vmem:[%s6208_s2 + $0x70] sm:$0xff]  ;;  %v109_v52 = vld [vmem:[%s6208_s2 + $0x68] sm:$0xff]  ;;  %s4400_s0 = sld [smem:[#allocation7 + $0x6]] }
  0x1e   :  { %v3627_v34 = vld [vmem:[%s6215_s9] sm:$0xff]  ;;  %v107_v62 = vld [vmem:[%s6208_s2 + $0x58] sm:$0xff]  ;;  %v105_v6 = vld [vmem:[%s6208_s2 + $0x48] sm:$0xff]  ;;  %s4704_s15 = sld [smem:[#allocation2 + $0xa]] }
  0x1f   :  { %v108_v50 = vld [vmem:[%s6208_s2 + $0x60] sm:$0xff]  ;;  %s4710_s16 = sld [smem:[#allocation7 + $0xa]] }
  0x20   :  { %s4720_s18 = sld [smem:[#allocation7 + $0xb]] }
  0x21   :  { %s4927_s21 = sld [smem:[#allocation2 + $0xc]] }
  0x22   :  { %s4932_s22 = sld [smem:[#allocation2 + $0xd]] }
  0x23   :  { %s4939_s23 = sld [smem:[#allocation7 + $0xc]] }
  0x24   :  { %286 = vperm.xlu2 %3265, %v220_v7   ;;  %s4946_s24 = sld [smem:[#allocation7 + $0xd]] }
  0x25   :  { %291 = vperm.xlu0 %3263, %v221_v8   ;;  %169 = vperm.xlu1 %3264, %v91_v9   ;;  %v106_v8 = vld [vmem:[%s6208_s2 + $0x50] sm:$0xff]  ;;  %s4974_s27 = sld [smem:[#allocation7 + $0xf]] }
  0x26   :  { %s5133_s28 = sld [smem:[#allocation2 + $0x10]] }
  0x27   :  { %s5631_s19 = sld [smem:[#allocation2 + $0x18]] }
  0x28   :  { %s5961_s12 = sld [smem:[#allocation7 + $0x1f]] }
  0x2c   :  { %159 = vperm.xlu2 %3265, %v89_v10  }
  0x2d   :  { %281 = vperm.xlu1 %3264, %v219_v11   ;;  %164 = vperm.xlu0 %3263, %v90_v12  }
  0x34   :  { %271 = vperm.xlu2 %3265, %v217_v13  }
  0x35   :  { %276 = vperm.xlu0 %3263, %v218_v14   ;;  %154 = vperm.xlu1 %3264, %v88_v15  }
  0x3c   :  { %144 = vperm.xlu2 %3265, %v86_v16  }
  0x3d   :  { %266 = vperm.xlu1 %3264, %v216_v17   ;;  %149 = vperm.xlu0 %3263, %v87_v18   ;;  %v104_v17 = vld [vmem:[%s6208_s2 + $0x40] sm:$0xff] }
  0x44   :  { %256 = vperm.xlu2 %3265, %v214_v19  }
  0x45   :  { %261 = vperm.xlu0 %3263, %v215_v20   ;;  %139 = vperm.xlu1 %3264, %v85_v21  }
  0x4c   :  { %129 = vperm.xlu2 %3265, %v83_v22  }
  0x4d   :  { %251 = vperm.xlu1 %3264, %v213_v23   ;;  %134 = vperm.xlu0 %3263, %v84_v24   ;;  %v102_v24 = vld [vmem:[%s6208_s2 + $0x30] sm:$0xff] }
  0x54   :  { %241 = vperm.xlu2 %3265, %v211_v25   ;;  %v103_v25 = vld [vmem:[%s6208_s2 + $0x38] sm:$0xff] }
  0x55   :  { %246 = vperm.xlu0 %3263, %v212_v26   ;;  %124 = vperm.xlu1 %3264, %v82_v27  }
  0x5c   :  { %114 = vperm.xlu2 %3265, %v80_v28  }
  0x5d   :  { %236 = vperm.xlu1 %3264, %v210_v29   ;;  %119 = vperm.xlu0 %3263, %v81_v30  }
  0x64   :  { %340 = vperm.xlu2 %3265, %v337_v31  }
  0x65   :  { %226 = vperm.xlu1 %3264, %v208_v32   ;;  %231 = vperm.xlu0 %3263, %v209_v33   ;;  %v99_v32 = vld [vmem:[%s6208_s2 + $0x18] sm:$0xff] }
  0x6d   :  { %710 = vperm.xlu0 %3263, %v3627_v34  }
  0x6e   :  { %v297_v35 = vpop.permute.xlu2 %296 }
  0x76   :  { %v175_v36 = vpop.permute.xlu2 %174 }
  0x77   :  { %v204_v53 = vmul.f32 %v175_v36, %v108_v50 }
  0x7e   :  { %v287_v37 = vpop.permute.xlu2 %286 }
  0x7f   :  { %v316_v59 = vadd.f32 %v287_v37, %v204_v53  ;;  %v101_v37 = vld [vmem:[%s6208_s2 + $0x28] sm:$0xff] }
  0x81   :  { %v332_v63 = vmax.f32 %v316_v59, 0.0  ;;  %v3710_v59 = vstv %s3667_s3  ;;  %s5209_s3 = sld [smem:[#allocation2 + $0x13]] }
  0x86   :  { %v160_v39 = vpop.permute.xlu2 %159 }
  0x87   :  { %v302_v40 = vpop.permute.xlu1 %301  ;;  %v190_v41 = vpop.permute.xlu0 %189  ;;  %v201_v9 = vmul.f32 %v160_v39, %v105_v6  ;;  %v3739_v6 = vstv %s3685_s17  ;;  %s4715_s17 = sld [smem:[#allocation2 + $0xb]] }
  0x88   :  { %v207_v42 = vmul.f32 %v190_v41, %v111_v38  ;;  %v96_v41 = vld [vmem:[%s6208_s2] sm:$0xff] }
  0x8a   :  { %v319_v43 = vadd.f32 %v302_v40, %v207_v42 }
  0x8c   :  { %v335_v44 = vmax.f32 %v319_v43, 0.0 }
  0x8e   :  { %343 = vmatpush.msra.mxu0 %v335_v44  ;;  %v272_v46 = vpop.permute.xlu2 %271 }
  0x8f   :  { %v185_v47 = vpop.permute.xlu0 %184  ;;  %v180_v48 = vpop.permute.xlu1 %179  ;;  %v313_v13 = vadd.f32 %v272_v46, %v201_v9 }
  0x90   :  { %v206_v49 = vmul.f32 %v185_v47, %v110_v45  ;;  %v205_v55 = vmul.f32 %v180_v48, %v109_v52  ;;  %v3687_v45 = vld [vmem:[#allocation8 + $0x78] sm:$0xff]  ;;  %v100_v47 = vld [vmem:[%s6208_s2 + $0x20] sm:$0xff]  ;;  %v3421_v48 = vmov 3  }
  0x91   :  { %v329_v18 = vmax.f32 %v313_v13, 0.0  ;;  %3268 = vset.pattern.permute.xlu0 %v3421_v48  ;;  %3299 = vrcp.f32 %v3687_v45  ;;  %v629_v53 = vand.u32 2147483647, %v3687_v45  ;;  %vm625_vm0 = vweird.f32 %v3687_v45  ;;  %v97_v48 = vld [vmem:[%s6208_s2 + $0x8] sm:$0xff] }
  0x92   :  { %v318_v51 = vadd.f32 %v297_v35, %v206_v49  ;;  %v3693_v49 = vld [vmem:[#allocation8 + $0x70] sm:$0xff]  ;;  %944 = vperm.xlu0 %3268, %v3627_v34  }
  0x93   :  { %3301 = vrcp.f32 %v3693_v49  ;;  %vm3731_vm1 = vcmp.eq.f32.partialorder %v629_v53, 8.507059e+37  ;;  %vm610_vm2 = vweird.f32 %v3693_v49 }
  0x94   :  { %v334_v54 = vmax.f32 %v318_v51, 0.0 }
  0x96   :  { %344 = vmatpush.msra.mxu0 %v334_v54  ;;  %v145_v56 = vpop.permute.xlu2 %144  ;;  %v3701_v54 = vstv %s3660_s29  ;;  %s4386_s29 = sld [smem:[#allocation7 + $0x5]] }
  0x97   :  { %v292_v57 = vpop.permute.xlu0 %291  ;;  %v170_v58 = vpop.permute.xlu1 %169  ;;  %v198_v27 = vmul.f32 %v145_v56, %v102_v24  ;;  %v3706_v56 = vld [vmem:[#allocation8 + $0x68] sm:$0xff] }
  0x98   :  { %v317_v60 = vadd.f32 %v292_v57, %v205_v55  ;;  %v203_v0 = vmul.f32 %v170_v58, %v107_v62  ;;  %v3704_v55 = vstv %s3665_s1  ;;  %v631_v58 = vand.u32 2147483648, %v3687_v45  ;;  %v3719_v62 = vld [vmem:[#allocation8 + $0x60] sm:$0xff]  ;;  %s4425_s1 = sld [smem:[#allocation2 + $0x7]] }
  0x99   :  { %3303 = vrcp.f32 %v3706_v56  ;;  %vm595_vm3 = vweird.f32 %v3706_v56  ;;  %vm580_vm6 = vweird.f32 %v3719_v62  ;;  %v584_v24 = vand.u32 2147483647, %v3719_v62 }
  0x9a   :  { %v333_v61 = vmax.f32 %v317_v60, 0.0  ;;  %v3715_v60 = vstv %s3669_s6  ;;  %3305 = vrcp.f32 %v3719_v62  ;;  %s4442_s6 = sld [smem:[#allocation7 + $0x7]] }
  0x9b   :  { %vm3865_vm15 = vcmp.eq.f32.partialorder %v584_v24, 8.507059e+37 }
  0x9c   :  { %345 = vmatpush.msra.mxu0 %v333_v61  ;;  %v616_v61 = vand.u32 2147483648, %v3693_v49 }
  0x9e   :  { %346 = vmatpush.msra.mxu0 %v332_v63  ;;  %v257_v5 = vpop.permute.xlu2 %256  ;;  %v3722_v63 = vstv %s3674_s13  ;;  %s4684_s13 = sld [smem:[#allocation2 + $0x9]] }
  0x9f   :  { %v282_v1 = vpop.permute.xlu1 %281  ;;  %v165_v2 = vpop.permute.xlu0 %164  ;;  %v310_v31 = vadd.f32 %v257_v5, %v198_v27  ;;  %v3736_v5 = vstv %s3680_s14  ;;  %s4698_s14 = sld [smem:[#allocation7 + $0x9]] }
  0xa0   :  { %v315_v4 = vadd.f32 %v282_v1, %v203_v0  ;;  %v202_v10 = vmul.f32 %v165_v2, %v106_v8  ;;  %v3725_v0 = vstv %s3676_s8  ;;  %v614_v1 = vand.u32 2147483647, %v3693_v49  ;;  %v3729_v2 = vpop.eup %3299  ;;  %s4691_s8 = sld [smem:[#allocation7 + $0x8]] }
  0xa1   :  { %v326_v38 = vmax.f32 %v310_v31, 0.0  ;;  %v621_v9 = vmul.f32 %v3729_v2, %v3687_v45  ;;  %vm626_vm4 = vweird.f32 %v3729_v2 }
  0xa2   :  { %v331_v7 = vmax.f32 %v315_v4, 0.0  ;;  %vm3754_vm5 = vcmp.eq.f32.partialorder %v614_v1, 8.507059e+37  ;;  %vm3783_vm8 = vmor %vm625_vm0, %vm626_vm4 }
  0xa4   :  { %347 = vmatpush.msra.mxu0 %v331_v7 }
  0xa6   :  { %v130_v16 = vpop.permute.xlu2 %129 }
  0xa7   :  { %v277_v11 = vpop.permute.xlu0 %276  ;;  %v155_v12 = vpop.permute.xlu1 %154  ;;  %v195_v36 = vmul.f32 %v130_v16, %v99_v32 }
  0xa8   :  { %v314_v14 = vadd.f32 %v277_v11, %v202_v10  ;;  %v200_v19 = vmul.f32 %v155_v12, %v104_v17  ;;  %v632_v10 = vor.u32 1.1754944e-38, %v631_v58  ;;  %v599_v11 = vand.u32 2147483647, %v3706_v56  ;;  %v3751_v16 = vpop.eup %3301 }
  0xa9   :  { %v601_v12 = vand.u32 2147483648, %v3706_v56  ;;  %v622_v17 = vsub.f32 1.0, %v621_v9  ;;  %vm611_vm9 = vweird.f32 %v3751_v16 }
  0xaa   :  { %v330_v15 = vmax.f32 %v314_v14, 0.0  ;;  %v3746_v14 = vor.u32 1.1754944e-38, %v616_v61  ;;  %vm3775_vm7 = vcmp.eq.f32.partialorder %v599_v11, 8.507059e+37  ;;  %vm3816_vm11 = vmor %vm610_vm2, %vm611_vm9 }
  0xab   :  { %v623_v27 = vmul.f32 %v3729_v2, %v622_v17 }
  0xac   :  { %348 = vmatpush.msra.mxu0 %v330_v15  ;;  %v3749_v15 = vld [vmem:[#allocation8 + $0x58] sm:$0xff] }
  0xad   :  { %3307 = vrcp.f32 %v3749_v15  ;;  %vm565_vm0 = vweird.f32 %v3749_v15 }
  0xae   :  { %349 = vmatpush.msra.mxu0 %v329_v18  ;;  %v242_v26 = vpop.permute.xlu2 %241  ;;  %v3422_v18 = vmov 8  }
  0xaf   :  { %v267_v20 = vpop.permute.xlu1 %266  ;;  %v150_v21 = vpop.permute.xlu0 %149  ;;  %v3678_v39 = vadd.f32 %v242_v26, %v195_v36  ;;  %3273 = vset.pattern.permute.xlu0 %v3422_v18 }
  0xb0   :  { %v312_v22 = vadd.f32 %v267_v20, %v200_v19  ;;  %v199_v28 = vmul.f32 %v150_v21, %v103_v25  ;;  %v3760_v20 = vpop.eup %3303  ;;  %1334 = vperm.xlu0 %3273, %v3627_v34   ;;  %v586_v25 = vand.u32 2147483648, %v3719_v62  ;;  %v376_v19 = vld [vmem:[%s6213_s7 + $0x68] sm:$0xff] }
  0xb1   :  { %v323_v50 = vmax.f32 %v3678_v39, 0.0  ;;  %v3770_v26 = vpop.eup %3305  ;;  %vm596_vm10 = vweird.f32 %v3760_v20 }
  0xb2   :  { %v328_v23 = vmax.f32 %v312_v22, 0.0  ;;  %v98_v22 = vld [vmem:[%s6208_s2 + $0x10] sm:$0xff]  ;;  %v3802_v45 = vor.u32 1.1754944e-38, %v586_v25  ;;  %vm581_vm12 = vweird.f32 %v3770_v26  ;;  %vm3835_vm13 = vmor %vm595_vm3, %vm596_vm10  ;;  %s4369_s2 = sld [smem:[#allocation2 + $0x5]] }
  0xb3   :  { %vm3861_vm14 = vmor %vm580_vm6, %vm581_vm12 }
  0xb4   :  { %350 = vmatpush.msra.mxu0 %v328_v23  ;;  %v606_v23 = vmul.f32 %v3751_v16, %v3693_v49 }
  0xb6   :  { %v115_v42 = vpop.permute.xlu2 %114  ;;  %v607_v32 = vsub.f32 1.0, %v606_v23 }
  0xb7   :  { %v262_v29 = vpop.permute.xlu0 %261  ;;  %v140_v30 = vpop.permute.xlu1 %139  ;;  %v3696_v51 = vmul.f32 %v115_v42, %v96_v41  ;;  %v3793_v41 = vld [vmem:[#allocation8 + $0x50] sm:$0xff]  ;;  %v378_v42 = vld [vmem:[%s6213_s7 + $0x78] sm:$0xff] }
  0xb8   :  { %v311_v33 = vadd.f32 %v262_v29, %v199_v28  ;;  %v197_v40 = vmul.f32 %v140_v30, %v101_v37  ;;  %v591_v28 = vmul.f32 %v3760_v20, %v3706_v56  ;;  %v602_v30 = vor.u32 1.1754944e-38, %v601_v12 }
  0xb9   :  { %v624_v37 = vadd.f32 %v3729_v2, %v623_v27  ;;  %3309 = vrcp.f32 %v3793_v41  ;;  %v554_v12 = vand.u32 2147483647, %v3793_v41  ;;  %vm550_vm3 = vweird.f32 %v3793_v41 }
  0xba   :  { %v327_v35 = vmax.f32 %v311_v33, 0.0  ;;  %v576_v33 = vmul.f32 %v3770_v26, %v3719_v62 }
  0xbb   :  { %vm3982_vm6 = vcmp.eq.f32.partialorder %v554_v12, 8.507059e+37 }
  0xbc   :  { %351 = vmatpush.msra.mxu0 %v327_v35  ;;  %v571_v35 = vand.u32 2147483648, %v3749_v15 }
  0xbe   :  { %352 = vmatpush.msra.mxu0 %v326_v38  ;;  %v592_v38 = vsub.f32 1.0, %v591_v28 }
  0xbf   :  { %v252_v43 = vpop.permute.xlu1 %251  ;;  %v135_v44 = vpop.permute.xlu0 %134 }
  0xc0   :  { %v309_v46 = vadd.f32 %v252_v43, %v197_v40  ;;  %v196_v57 = vmul.f32 %v135_v44, %v100_v47  ;;  %v569_v40 = vand.u32 2147483647, %v3749_v15  ;;  %v608_v43 = vmul.f32 %v3751_v16, %v607_v32 }
  0xc1   :  { %v577_v44 = vsub.f32 1.0, %v576_v33  ;;  %v593_v53 = vmul.f32 %v3760_v20, %v592_v38 }
  0xc2   :  { %v325_v52 = vmax.f32 %v309_v46, 0.0  ;;  %v3804_v46 = vpop.eup %3307  ;;  %v609_v1 = vadd.f32 %v3751_v16, %v608_v43  ;;  %vm3902_vm2 = vcmp.eq.f32.partialorder %v569_v40, 8.507059e+37 }
  0xc3   :  { %v594_v49 = vadd.f32 %v3760_v20, %v593_v53  ;;  %v561_v4 = vmul.f32 %v3804_v46, %v3749_v15  ;;  %v3881_v33 = vpop.eup %3309 }
  0xc4   :  { %353 = vmatpush.msra.mxu0 %v325_v52  ;;  %v613_v11 = vsel %vm3816_vm11, %v3751_v16, %v609_v1  ;;  %vm551_vm4 = vweird.f32 %v3881_v33 }
  0xc5   :  { %v618_v23 = vsel %vm3754_vm5, %v3746_v14, %v613_v11  ;;  %v598_v25 = vsel %vm3835_vm13, %v3760_v20, %v594_v49  ;;  %v562_v62 = vsub.f32 1.0, %v561_v4  ;;  %v336_v4 = vld [vmem:[%s6211_s5] sm:$0xff]  ;;  %s5201_s5 = sld [smem:[#allocation7 + $0x12]] }
  0xc6   :  { %v603_v20 = vsel %vm3775_vm7, %v602_v30, %v598_v25  ;;  %vm3999_vm7 = vmor %vm550_vm3, %vm551_vm4 }
  0xc7   :  { %v247_v7 = vpop.permute.xlu0 %246  ;;  %v125_v8 = vpop.permute.xlu1 %124  ;;  %v3910_v52 = vmul.f32 %v603_v20, %v376_v19  ;;  %v3950_v19 = vld [vmem:[#allocation8 + $0x48] sm:$0xff]  ;;  %v546_v20 = vmul.f32 %v3881_v33, %v3793_v41 }
  0xc8   :  { %v308_v13 = vadd.f32 %v247_v7, %v196_v57  ;;  %v194_v36 = vmul.f32 %v125_v8, %v98_v22  ;;  %v3822_v57 = vor.u32 1.1754944e-38, %v571_v35  ;;  %v578_v8 = vmul.f32 %v3770_v26, %v577_v44 }
  0xc9   :  { %v563_v44 = vmul.f32 %v3804_v46, %v562_v62  ;;  %v652_v7 = vmul.f32 %v3701_v54, %v3910_v52  ;;  %v809_v11 = vmul.f32 %v3722_v63, %v3910_v52  ;;  %3311 = vrcp.f32 %v3950_v19 }
  0xca   :  { %v324_v21 = vmax.f32 %v308_v13, 0.0  ;;  %v579_v27 = vadd.f32 %v3770_v26, %v578_v8  ;;  %v731_v8 = vmul.f32 %v3710_v59, %v3910_v52 }
  0xcc   :  { %354 = vmatpush.msra.mxu0 %v324_v21  ;;  %v377_v21 = vld [vmem:[%s6213_s7 + $0x70] sm:$0xff]  ;;  %v583_v35 = vsel %vm3861_vm14, %v3770_v26, %v579_v27 }
  0xcd   :  { %v3883_v14 = vmul.f32 %v618_v23, %v377_v21  ;;  %v748_v21 = vadd.f32 %v3715_v60, %v731_v8  ;;  %v826_v23 = vadd.f32 %v3725_v0, %v809_v11  ;;  %v588_v27 = vsel %vm3865_vm15, %v3802_v45, %v583_v35 }
  0xce   :  { %355 = vmatpush.msra.mxu0 %v323_v50  ;;  %v628_v50 = vsel %vm3783_vm8, %v3729_v2, %v624_v37  ;;  %v556_v35 = vand.u32 2147483648, %v3793_v41  ;;  %v541_v11 = vand.u32 2147483648, %v3950_v19  ;;  %vm535_vm8 = vweird.f32 %v3950_v19 }
  0xcf   :  { %v237_v47 = vpop.permute.xlu1 %236  ;;  %v120_v39 = vpop.permute.xlu0 %119  ;;  %v633_v61 = vsel %vm3731_vm1, %v632_v10, %v628_v50  ;;  %vm566_vm1 = vweird.f32 %v3804_v46  ;;  %v653_v29 = vmul.f32 %v3701_v54, %v3883_v14  ;;  %v732_v30 = vmul.f32 %v3710_v59, %v3883_v14 }
  0xd0   :  { %v306_v58 = vadd.f32 %v237_v47, %v194_v36  ;;  %v3828_v2 = vmul.f32 %v633_v61, %v378_v42  ;;  %v193_v10 = vmul.f32 %v120_v39, %v97_v48  ;;  %v810_v50 = vmul.f32 %v3722_v63, %v3883_v14  ;;  %vm3946_vm5 = vmor %vm565_vm0, %vm566_vm1 }
  0xd1   :  { %v670_v61 = vadd.f32 %v3704_v55, %v653_v29  ;;  %v749_v40 = vadd.f32 %v3715_v60, %v732_v30  ;;  %v842_v45 = vmax.f32 %v826_v23, 0.0 }
  0xd2   :  { %v322_v9 = vmax.f32 %v306_v58, 0.0  ;;  %v654_v56 = vmul.f32 %v3701_v54, %v3828_v2  ;;  %v733_v13 = vmul.f32 %v3710_v59, %v3828_v2  ;;  %v811_v17 = vmul.f32 %v3722_v63, %v3828_v2 }
  0xd3   :  { %v889_v18 = vmul.f32 %v3736_v5, %v3828_v2  ;;  %v827_v1 = vadd.f32 %v3725_v0, %v810_v50 }
  0xd4   :  { %356 = vmatpush.msra.mxu0 %v322_v9  ;;  %v671_v28 = vadd.f32 %v3704_v55, %v654_v56  ;;  %v750_v24 = vadd.f32 %v3715_v60, %v733_v13  ;;  %v828_v31 = vadd.f32 %v3725_v0, %v811_v17  ;;  %v686_v9 = vmax.f32 %v670_v61, 0.0  ;;  %v375_v13 = vld [vmem:[%s6213_s7 + $0x60] sm:$0xff] }
  0xd5   :  { %v906_v32 = vadd.f32 %v3739_v6, %v889_v18  ;;  %v887_v56 = vmul.f32 %v3736_v5, %v3910_v52  ;;  %v843_v17 = vmax.f32 %v827_v1, 0.0  ;;  %v669_v18 = vadd.f32 %v3704_v55, %v652_v7 }
  0xd6   :  { %v687_v38 = vmax.f32 %v671_v28, 0.0  ;;  %v766_v42 = vmax.f32 %v750_v24, 0.0  ;;  %v844_v43 = vmax.f32 %v828_v31, 0.0  ;;  %v764_v28 = vmax.f32 %v748_v21, 0.0 }
  0xd7   :  { %v227_v36 = vpop.permute.xlu1 %226  ;;  %v232_v37 = vpop.permute.xlu0 %231  ;;  %v922_v39 = vmax.f32 %v906_v32, 0.0  ;;  %v904_v25 = vadd.f32 %v3739_v6, %v887_v56  ;;  %v685_v62 = vmax.f32 %v669_v18, 0.0  ;;  %v3939_v24 = vmul.f32 %v588_v27, %v375_v13  ;;  %v373_v18 = vld [vmem:[%s6213_s7 + $0x50] sm:$0xff] }
  0xd8   :  { %v304_v47 = vadd.f32 %v227_v36, %v3696_v51  ;;  %v305_v48 = vadd.f32 %v232_v37, %v193_v10  ;;  %688 = vmatpush.msra.mxu1 %v687_v38  ;;  %767 = vmatpush.msra.mxu2 %v766_v42  ;;  %v888_v51 = vmul.f32 %v3736_v5, %v3883_v14  ;;  %v765_v10 = vmax.f32 %v749_v40, 0.0  ;;  %v374_v38 = vld [vmem:[%s6213_s7 + $0x58] sm:$0xff]  ;;  %v3987_v40 = vld [vmem:[#allocation8 + $0x40] sm:$0xff]  ;;  %v3312_v56 = vpop.eup %3311 }
  0xd9   :  { %845 = vmatpush.msra.mxu3 %v844_v43  ;;  %v564_v31 = vadd.f32 %v3804_v46, %v563_v44  ;;  %v920_v22 = vmax.f32 %v904_v25, 0.0  ;;  %v651_v15 = vmul.f32 %v3701_v54, %v3939_v24  ;;  %v730_v36 = vmul.f32 %v3710_v59, %v3939_v24  ;;  %v4020_v25 = vld [vmem:[#allocation8 + $0x38] sm:$0xff] }
  0xda   :  { %v320_v53 = vmax.f32 %v304_v47, 0.0  ;;  %v321_v58 = vmax.f32 %v305_v48, 0.0  ;;  %v905_v49 = vadd.f32 %v3739_v6, %v888_v51  ;;  %689 = vmatpush.msra.mxu1 %v686_v9  ;;  %768 = vmatpush.msra.mxu2 %v765_v10  ;;  %v808_v37 = vmul.f32 %v3722_v63, %v3939_v24 }
  0xdb   :  { %846 = vmatpush.msra.mxu3 %v843_v17  ;;  %v886_v42 = vmul.f32 %v3736_v5, %v3939_v24  ;;  %v568_v43 = vsel %vm3946_vm5, %v3804_v46, %v564_v31  ;;  %v547_v44 = vsub.f32 1.0, %v546_v20  ;;  %v668_v47 = vadd.f32 %v3704_v55, %v651_v15 }
  0xdc   :  { %357 = vmatpush.msra.mxu0 %v321_v58  ;;  %v921_v16 = vmax.f32 %v905_v49, 0.0  ;;  %690 = vmatpush.msra.mxu1 %v685_v62  ;;  %v747_v48 = vadd.f32 %v3715_v60, %v730_v36  ;;  %v825_v29 = vadd.f32 %v3725_v0, %v808_v37  ;;  %v573_v30 = vsel %vm3902_vm2, %v3822_v57, %v568_v43 }
  0xdd   :  { %769 = vmatpush.msra.mxu2 %v764_v28  ;;  %847 = vmatpush.msra.mxu3 %v842_v45  ;;  %v903_v50 = vadd.f32 %v3739_v6, %v886_v42  ;;  %v3977_v51 = vmul.f32 %v573_v30, %v374_v38  ;;  %v548_v46 = vmul.f32 %v3881_v33, %v547_v44  ;;  %v684_v58 = vmax.f32 %v668_v47, 0.0 }
  0xde   :  { %358 = vmatpush.msra.mxu0 %v320_v53  ;;  %v763_v26 = vmax.f32 %v747_v48, 0.0  ;;  %v841_v57 = vmax.f32 %v825_v29, 0.0  ;;  %v557_v61 = vor.u32 1.1754944e-38, %v556_v35  ;;  %v539_v10 = vand.u32 2147483647, %v3950_v19 }
  0xdf   :  { %359 = vmatmul.f32.vlgmr.msra.gmra.mxu0 %v336_v4  ;;  %v919_v1 = vmax.f32 %v903_v50, 0.0  ;;  %v650_v49 = vmul.f32 %v3701_v54, %v3977_v51  ;;  %v729_v7 = vmul.f32 %v3710_v59, %v3977_v51  ;;  %v807_v12 = vmul.f32 %v3722_v63, %v3977_v51  ;;  %691 = vmatpush.msra.mxu1 %v684_v58 }
  0xe0   :  { %923 = vmatpush.msrb.mxu0 %v922_v39  ;;  %v3423_v39 = vmov 13   ;;  %770 = vmatpush.msra.mxu2 %v763_v26  ;;  %v885_v4 = vmul.f32 %v3736_v5, %v3977_v51  ;;  %v549_v9 = vadd.f32 %v3881_v33, %v548_v46  ;;  %3313 = vrcp.f32 %v3987_v40 }
  0xe1   :  { %3278 = vset.pattern.permute.xlu0 %v3423_v39  ;;  %848 = vmatpush.msra.mxu3 %v841_v57  ;;  %v667_v41 = vadd.f32 %v3704_v55, %v650_v49  ;;  %v746_v13 = vadd.f32 %v3715_v60, %v729_v7  ;;  %v824_v17 = vadd.f32 %v3725_v0, %v807_v12  ;;  %vm536_vm9 = vweird.f32 %v3312_v56 }
  0xe2   :  { %924 = vmatpush.msrb.mxu0 %v921_v16  ;;  %1724 = vperm.xlu0 %3278, %v3627_v34   ;;  %v902_v21 = vadd.f32 %v3739_v6, %v885_v4  ;;  %v553_v16 = vsel %vm3999_vm7, %v3881_v33, %v549_v9  ;;  %v531_v23 = vmul.f32 %v3312_v56, %v3950_v19  ;;  %vm4027_vm10 = vcmp.eq.f32.partialorder %v539_v10, 8.507059e+37  ;;  %vm4049_vm12 = vmor %vm535_vm8, %vm536_vm9 }
  0xe3   :  { %v683_v27 = vmax.f32 %v667_v41, 0.0  ;;  %v762_v62 = vmax.f32 %v746_v13, 0.0  ;;  %v840_v28 = vmax.f32 %v824_v17, 0.0  ;;  %v558_v31 = vsel %vm3982_vm6, %v557_v61, %v553_v16  ;;  %v372_v61 = vld [vmem:[%s6213_s7 + $0x48] sm:$0xff] }
  0xe4   :  { %925 = vmatpush.msrb.mxu0 %v920_v22  ;;  %v918_v32 = vmax.f32 %v902_v21, 0.0  ;;  %v4024_v45 = vmul.f32 %v558_v31, %v373_v18  ;;  %v532_v22 = vsub.f32 1.0, %v531_v23  ;;  %v542_v20 = vor.u32 1.1754944e-38, %v541_v11 }
  0xe5   :  { %692 = vmatpush.msra.mxu1 %v683_v27  ;;  %771 = vmatpush.msra.mxu2 %v762_v62  ;;  %3315 = vrcp.f32 %v4020_v25  ;;  %vm520_vm11 = vweird.f32 %v3987_v40  ;;  %v524_v43 = vand.u32 2147483647, %v3987_v40  ;;  %v526_v44 = vand.u32 2147483648, %v3987_v40 }
  0xe6   :  { %926 = vmatpush.msrb.mxu0 %v919_v1  ;;  %849 = vmatpush.msra.mxu3 %v840_v28  ;;  %v649_v35 = vmul.f32 %v3701_v54, %v4024_v45  ;;  %v728_v15 = vmul.f32 %v3710_v59, %v4024_v45  ;;  %v806_v36 = vmul.f32 %v3722_v63, %v4024_v45  ;;  %v3314_v37 = vpop.eup %3313  ;;  %v509_v53 = vand.u32 2147483647, %v4020_v25  ;;  %v4059_v1 = vld [vmem:[#allocation8 + $0x30] sm:$0xff]  ;;  %v4094_v28 = vld [vmem:[#allocation8 + $0x28] sm:$0xff] }
  0xe7   :  { %v884_v38 = vmul.f32 %v3736_v5, %v4024_v45  ;;  %v533_v42 = vmul.f32 %v3312_v56, %v532_v22  ;;  %v516_v39 = vmul.f32 %v3314_v37, %v3987_v40  ;;  %vm521_vm13 = vweird.f32 %v3314_v37 }
  0xe8   :  { %927 = vmatpush.msrb.mxu0 %v918_v32  ;;  %v666_v47 = vadd.f32 %v3704_v55, %v649_v35  ;;  %v745_v48 = vadd.f32 %v3715_v60, %v728_v15  ;;  %v823_v29 = vadd.f32 %v3725_v0, %v806_v36  ;;  %vm505_vm14 = vweird.f32 %v4020_v25  ;;  %vm4077_vm0 = vmor %vm520_vm11, %vm521_vm13 }
  0xe9   :  { %v901_v50 = vadd.f32 %v3739_v6, %v884_v38  ;;  %v534_v46 = vadd.f32 %v3312_v56, %v533_v42  ;;  %v517_v19 = vsub.f32 1.0, %v516_v39  ;;  %v511_v8 = vand.u32 2147483648, %v4020_v25  ;;  %v371_v38 = vld [vmem:[%s6213_s7 + $0x40] sm:$0xff] }
  0xea   :  { %v682_v58 = vmax.f32 %v666_v47, 0.0  ;;  %v761_v26 = vmax.f32 %v745_v48, 0.0  ;;  %v839_v57 = vmax.f32 %v823_v29, 0.0  ;;  %vm4067_vm15 = vcmp.eq.f32.partialorder %v524_v43, 8.507059e+37 }
  0xeb   :  { %v3316_v49 = vpop.eup %3315  ;;  %v917_v7 = vmax.f32 %v901_v50, 0.0  ;;  %v538_v12 = vsel %vm4049_vm12, %v3312_v56, %v534_v46  ;;  %v518_v9 = vmul.f32 %v3314_v37, %v517_v19  ;;  %v527_v13 = vor.u32 1.1754944e-38, %v526_v44 }
  0xec   :  { %693 = vmatpush.msra.mxu1 %v682_v58  ;;  %772 = vmatpush.msra.mxu2 %v761_v26  ;;  %v543_v4 = vsel %vm4027_vm10, %v542_v20, %v538_v12  ;;  %v501_v11 = vmul.f32 %v3316_v49, %v4020_v25  ;;  %vm4081_vm1 = vcmp.eq.f32.partialorder %v509_v53, 8.507059e+37  ;;  %3317 = vrcp.f32 %v4059_v1  ;;  %v370_v25 = vld [vmem:[%s6213_s7 + $0x38] sm:$0xff] }
  0xed   :  { %850 = vmatpush.msra.mxu3 %v839_v57  ;;  %928 = vmatpush.msrb.mxu0 %v917_v7  ;;  %v4072_v41 = vmul.f32 %v543_v4, %v372_v61  ;;  %v519_v18 = vadd.f32 %v3314_v37, %v518_v9  ;;  %vm506_vm2 = vweird.f32 %v3316_v49  ;;  %v512_v16 = vor.u32 1.1754944e-38, %v511_v8 }
  0xee   :  { %v502_v21 = vsub.f32 1.0, %v501_v11  ;;  %v494_v22 = vand.u32 2147483647, %v4059_v1  ;;  %v496_v33 = vand.u32 2147483648, %v4059_v1  ;;  %vm4110_vm3 = vmor %vm505_vm14, %vm506_vm2  ;;  %3319 = vrcp.f32 %v4094_v28 }
  0xef   :  { %v648_v23 = vmul.f32 %v3701_v54, %v4072_v41  ;;  %v727_v40 = vmul.f32 %v3710_v59, %v4072_v41  ;;  %v805_v27 = vmul.f32 %v3722_v63, %v4072_v41  ;;  %v883_v62 = vmul.f32 %v3736_v5, %v4072_v41 }
  0xf0   :  { %v523_v31 = vsel %vm4077_vm0, %v3314_v37, %v519_v18  ;;  %v503_v32 = vmul.f32 %v3316_v49, %v502_v21  ;;  %v3424_v39 = vmov 18   ;;  %vm490_vm4 = vweird.f32 %v4059_v1  ;;  %v4181_v37 = vld [vmem:[#allocation8 + $0x18] sm:$0xff] }
  0xf1   :  { %v665_v20 = vadd.f32 %v3704_v55, %v648_v23  ;;  %v744_v35 = vadd.f32 %v3715_v60, %v727_v40  ;;  %v822_v15 = vadd.f32 %v3725_v0, %v805_v27  ;;  %v900_v36 = vadd.f32 %v3739_v6, %v883_v62  ;;  %3283 = vset.pattern.permute.xlu0 %v3424_v39  ;;  %v4163_v62 = vld [vmem:[#allocation8 + $0x20] sm:$0xff]  ;;  %v4191_v39 = vld [vmem:[#allocation8 + $0x10] sm:$0xff] }
  0xf2   :  { %v528_v42 = vsel %vm4067_vm15, %v527_v13, %v523_v31  ;;  %v504_v43 = vadd.f32 %v3316_v49, %v503_v32  ;;  %v4117_v44 = vpop.eup %3317  ;;  %2114 = vperm.xlu0 %3283, %v3627_v34   ;;  %vm4132_vm5 = vcmp.eq.f32.partialorder %v494_v22, 8.507059e+37  ;;  %v497_v57 = vor.u32 1.1754944e-38, %v496_v33 }
  0xf3   :  { %v681_v47 = vmax.f32 %v665_v20, 0.0  ;;  %v760_v48 = vmax.f32 %v744_v35, 0.0  ;;  %v838_v29 = vmax.f32 %v822_v15, 0.0  ;;  %v916_v30 = vmax.f32 %v900_v36, 0.0 }
  0xf4   :  { %v4119_v50 = vmul.f32 %v528_v42, %v371_v38  ;;  %v508_v46 = vsel %vm4110_vm3, %v3316_v49, %v504_v43  ;;  %v486_v53 = vmul.f32 %v4117_v44, %v4059_v1  ;;  %vm491_vm6 = vweird.f32 %v4117_v44  ;;  %v4148_v4 = vpop.eup %3319 }
  0xf5   :  { %694 = vmatpush.msra.mxu1 %v681_v47  ;;  %773 = vmatpush.msra.mxu2 %v760_v48  ;;  %v513_v58 = vsel %vm4081_vm1, %v512_v16, %v508_v46  ;;  %v479_v8 = vand.u32 2147483647, %v4094_v28  ;;  %vm4172_vm7 = vmor %vm490_vm4, %vm491_vm6  ;;  %v471_v36 = vmul.f32 %v4148_v4, %v4094_v28  ;;  %v481_v38 = vand.u32 2147483648, %v4094_v28  ;;  %v369_v47 = vld [vmem:[%s6213_s7 + $0x30] sm:$0xff] }
  0xf6   :  { %851 = vmatpush.msra.mxu3 %v838_v29  ;;  %929 = vmatpush.msrb.mxu0 %v916_v30  ;;  %v647_v61 = vmul.f32 %v3701_v54, %v4119_v50  ;;  %v726_v34 = vmul.f32 %v3710_v59, %v4119_v50  ;;  %v804_v19 = vmul.f32 %v3722_v63, %v4119_v50  ;;  %v487_v49 = vsub.f32 1.0, %v486_v53 }
  0xf7   :  { %v882_v7 = vmul.f32 %v3736_v5, %v4119_v50  ;;  %v4144_v12 = vmul.f32 %v513_v58, %v370_v25  ;;  %3321 = vrcp.f32 %v4163_v62  ;;  %v472_v30 = vsub.f32 1.0, %v471_v36 }
  0xf8   :  { %v664_v9 = vadd.f32 %v3704_v55, %v647_v61  ;;  %v743_v10 = vadd.f32 %v3715_v60, %v726_v34  ;;  %v821_v11 = vadd.f32 %v3725_v0, %v804_v19  ;;  %v488_v56 = vmul.f32 %v4117_v44, %v487_v49 }
  0xf9   :  { %v899_v13 = vadd.f32 %v3739_v6, %v882_v7  ;;  %v646_v17 = vmul.f32 %v3701_v54, %v4144_v12  ;;  %v725_v18 = vmul.f32 %v3710_v59, %v4144_v12  ;;  %v803_v21 = vmul.f32 %v3722_v63, %v4144_v12 }
  0xfa   :  { %v680_v16 = vmax.f32 %v664_v9, 0.0  ;;  %v759_v23 = vmax.f32 %v743_v10, 0.0  ;;  %v837_v40 = vmax.f32 %v821_v11, 0.0  ;;  %v881_v27 = vmul.f32 %v3736_v5, %v4144_v12  ;;  %3298 = vset.pattern.permute.xlu0 %v3420_v3  ;;  %v367_v9 = vld [vmem:[%s6213_s7 + $0x20] sm:$0xff] }
  0xfb   :  { %v915_v31 = vmax.f32 %v899_v13, 0.0  ;;  %v663_v32 = vadd.f32 %v3704_v55, %v646_v17  ;;  %v742_v22 = vadd.f32 %v3715_v60, %v725_v18  ;;  %v820_v33 = vadd.f32 %v3725_v0, %v803_v21 }
  0xfc   :  { %695 = vmatpush.msra.mxu1 %v680_v16  ;;  %774 = vmatpush.msra.mxu2 %v759_v23  ;;  %v898_v35 = vadd.f32 %v3739_v6, %v881_v27  ;;  %v489_v15 = vadd.f32 %v4117_v44, %v488_v56  ;;  %vm475_vm8 = vweird.f32 %v4094_v28  ;;  %vm476_vm9 = vweird.f32 %v4148_v4  ;;  %v368_v23 = vld [vmem:[%s6213_s7 + $0x28] sm:$0xff] }
  0xfd   :  { %852 = vmatpush.msra.mxu3 %v837_v40  ;;  %930 = vmatpush.msrb.mxu0 %v915_v31  ;;  %v679_v1 = vmax.f32 %v663_v32, 0.0  ;;  %v758_v42 = vmax.f32 %v742_v22, 0.0  ;;  %v836_v43 = vmax.f32 %v820_v33, 0.0  ;;  %v466_v46 = vand.u32 2147483648, %v4163_v62  ;;  %vm4222_vm11 = vmor %vm475_vm8, %vm476_vm9  ;;  %v4226_v10 = vpop.eup %3321 }
  0xfe   :  { %v914_v48 = vmax.f32 %v898_v35, 0.0  ;;  %v493_v29 = vsel %vm4172_vm7, %v4117_v44, %v489_v15  ;;  %3323 = vrcp.f32 %v4181_v37  ;;  %v473_v53 = vmul.f32 %v4148_v4, %v472_v30  ;;  %v4256_v15 = vld [vmem:[#allocation8 + $0x8] sm:$0xff] }
  0xff   :  { %696 = vmatpush.msra.mxu1 %v679_v1  ;;  %775 = vmatpush.msra.mxu2 %v758_v42  ;;  %v498_v25 = vsel %vm4132_vm5, %v497_v57, %v493_v29  ;;  %vm4202_vm10 = vcmp.eq.f32.partialorder %v479_v8, 8.507059e+37  ;;  %v464_v61 = vand.u32 2147483647, %v4163_v62  ;;  %v482_v26 = vor.u32 1.1754944e-38, %v481_v38 }
 0x100   :  { %853 = vmatpush.msra.mxu3 %v836_v43  ;;  %931 = vmatpush.msrb.mxu0 %v914_v48  ;;  %v4199_v44 = vmul.f32 %v498_v25, %v369_v47  ;;  %v449_v57 = vand.u32 2147483647, %v4181_v37  ;;  %v451_v34 = vand.u32 2147483648, %v4181_v37  ;;  %3325 = vrcp.f32 %v4191_v39 }
 0x101   :  { %v474_v11 = vadd.f32 %v4148_v4, %v473_v53  ;;  %vm460_vm12 = vweird.f32 %v4163_v62  ;;  %v4230_v56 = vor.u32 1.1754944e-38, %v466_v46  ;;  %vm445_vm13 = vweird.f32 %v4181_v37 }
 0x102   :  { %v645_v19 = vmul.f32 %v3701_v54, %v4199_v44  ;;  %v724_v49 = vmul.f32 %v3710_v59, %v4199_v44  ;;  %v802_v7 = vmul.f32 %v3722_v63, %v4199_v44  ;;  %v880_v8 = vmul.f32 %v3736_v5, %v4199_v44 }
 0x103   :  { %vm4237_vm14 = vcmp.eq.f32.partialorder %v464_v61, 8.507059e+37  ;;  %v478_v40 = vsel %vm4222_vm11, %v4148_v4, %v474_v11  ;;  %v456_v27 = vmul.f32 %v4226_v10, %v4163_v62  ;;  %vm4251_vm15 = vcmp.eq.f32.partialorder %v449_v57, 8.507059e+37 }
 0x104   :  { %v662_v13 = vadd.f32 %v3704_v55, %v645_v19  ;;  %v741_v17 = vadd.f32 %v3715_v60, %v724_v49  ;;  %v819_v28 = vadd.f32 %v3725_v0, %v802_v7  ;;  %v897_v18 = vadd.f32 %v3739_v6, %v880_v8  ;;  %v4241_v16 = vpop.eup %3323 }
 0x105   :  { %v452_v32 = vor.u32 1.1754944e-38, %v451_v34  ;;  %vm430_vm0 = vweird.f32 %v4191_v39  ;;  %v483_v4 = vsel %vm4202_vm10, %v482_v26, %v478_v40  ;;  %v457_v38 = vsub.f32 1.0, %v456_v27  ;;  %v366_v27 = vld [vmem:[%s6213_s7 + $0x18] sm:$0xff] }
 0x106   :  { %v678_v22 = vmax.f32 %v662_v13, 0.0  ;;  %v757_v33 = vmax.f32 %v741_v17, 0.0  ;;  %v835_v20 = vmax.f32 %v819_v28, 0.0  ;;  %v913_v35 = vmax.f32 %v897_v18, 0.0  ;;  %v4258_v36 = vpop.eup %3325 }
 0x107   :  { %vm461_vm1 = vweird.f32 %v4226_v10  ;;  %v441_v1 = vmul.f32 %v4241_v16, %v4181_v37  ;;  %v4265_v42 = vmul.f32 %v483_v4, %v368_v23  ;;  %vm446_vm2 = vweird.f32 %v4241_v16 }
 0x108   :  { %697 = vmatpush.msra.mxu1 %v678_v22  ;;  %776 = vmatpush.msra.mxu2 %v757_v33  ;;  %v426_v43 = vmul.f32 %v4258_v36, %v4191_v39  ;;  %v434_v47 = vand.u32 2147483647, %v4191_v39  ;;  %v458_v48 = vmul.f32 %v4226_v10, %v457_v38  ;;  %vm431_vm3 = vweird.f32 %v4258_v36  ;;  %vm4286_vm4 = vmor %vm460_vm12, %vm461_vm1 }
 0x109   :  { %854 = vmatpush.msra.mxu3 %v835_v20  ;;  %932 = vmatpush.msrb.mxu0 %v913_v35  ;;  %v442_v29 = vsub.f32 1.0, %v441_v1  ;;  %3327 = vrcp.f32 %v4256_v15  ;;  %v644_v30 = vmul.f32 %v3701_v54, %v4265_v42  ;;  %v723_v25 = vmul.f32 %v3710_v59, %v4265_v42  ;;  %vm4301_vm5 = vmor %vm445_vm13, %vm446_vm2 }
 0x10a   :  { %v801_v46 = vmul.f32 %v3722_v63, %v4265_v42  ;;  %v879_v53 = vmul.f32 %v3736_v5, %v4265_v42  ;;  %v459_v61 = vadd.f32 %v4226_v10, %v458_v48  ;;  %v427_v57 = vsub.f32 1.0, %v426_v43  ;;  %vm4324_vm7 = vmor %vm430_vm0, %vm431_vm3 }
 0x10b   :  { %v443_v26 = vmul.f32 %v4241_v16, %v442_v29  ;;  %v436_v34 = vand.u32 2147483648, %v4191_v39  ;;  %v661_v19 = vadd.f32 %v3704_v55, %v644_v30  ;;  %v740_v49 = vadd.f32 %v3715_v60, %v723_v25 }
 0x10c   :  { %v818_v7 = vadd.f32 %v3725_v0, %v801_v46  ;;  %v896_v8 = vadd.f32 %v3739_v6, %v879_v53  ;;  %v463_v11 = vsel %vm4286_vm4, %v4226_v10, %v459_v61  ;;  %v428_v17 = vmul.f32 %v4258_v36, %v427_v57 }
 0x10d   :  { %v444_v13 = vadd.f32 %v4241_v16, %v443_v26  ;;  %vm4313_vm6 = vcmp.eq.f32.partialorder %v434_v47, 8.507059e+37  ;;  %v677_v37 = vmax.f32 %v661_v19, 0.0  ;;  %v756_v18 = vmax.f32 %v740_v49, 0.0  ;;  %v4381_v49 = vld [vmem:[#allocation8] sm:$0xff] }
 0x10e   :  { %v834_v23 = vmax.f32 %v818_v7, 0.0  ;;  %v912_v40 = vmax.f32 %v896_v8, 0.0  ;;  %v468_v33 = vsel %vm4237_vm14, %v4230_v56, %v463_v11  ;;  %v429_v35 = vadd.f32 %v4258_v36, %v428_v17  ;;  %v365_v11 = vld [vmem:[%s6213_s7 + $0x10] sm:$0xff] }
 0x10f   :  { %v4328_v22 = vpop.eup %3327  ;;  %v448_v20 = vsel %vm4301_vm5, %v4241_v16, %v444_v13  ;;  %v437_v4 = vor.u32 1.1754944e-38, %v436_v34  ;;  %698 = vmatpush.msra.mxu1 %v677_v37  ;;  %777 = vmatpush.msra.mxu2 %v756_v18  ;;  %v4337_v39 = vmul.f32 %v468_v33, %v367_v9  ;;  %vm415_vm8 = vweird.f32 %v4256_v15 }
 0x110   :  { %v453_v38 = vsel %vm4251_vm15, %v452_v32, %v448_v20  ;;  %v419_v1 = vand.u32 2147483647, %v4256_v15  ;;  %855 = vmatpush.msra.mxu3 %v834_v23  ;;  %933 = vmatpush.msrb.mxu0 %v912_v40  ;;  %v433_v21 = vsel %vm4324_vm7, %v4258_v36, %v429_v35  ;;  %v411_v16 = vmul.f32 %v4328_v22, %v4256_v15 }
 0x111   :  { %v4343_v56 = vmul.f32 %v453_v38, %v366_v27  ;;  %v421_v43 = vand.u32 2147483648, %v4256_v15  ;;  %v643_v31 = vmul.f32 %v3701_v54, %v4337_v39  ;;  %v722_v32 = vmul.f32 %v3710_v59, %v4337_v39 }
 0x112   :  { %v800_v47 = vmul.f32 %v3722_v63, %v4337_v39  ;;  %v878_v48 = vmul.f32 %v3736_v5, %v4337_v39  ;;  %v438_v23 = vsel %vm4313_vm6, %v437_v4, %v433_v21  ;;  %v412_v40 = vsub.f32 1.0, %v411_v16 }
 0x113   :  { %v642_v36 = vmul.f32 %v3701_v54, %v4343_v56  ;;  %v721_v29 = vmul.f32 %v3710_v59, %v4343_v56  ;;  %v799_v30 = vmul.f32 %v3722_v63, %v4343_v56  ;;  %v877_v25 = vmul.f32 %v3736_v5, %v4343_v56 }
 0x114   :  { %v660_v46 = vadd.f32 %v3704_v55, %v643_v31  ;;  %v739_v53 = vadd.f32 %v3715_v60, %v722_v32  ;;  %v817_v58 = vadd.f32 %v3725_v0, %v800_v47  ;;  %v895_v61 = vadd.f32 %v3739_v6, %v878_v48 }
 0x115   :  { %v659_v26 = vadd.f32 %v3704_v55, %v642_v36  ;;  %v738_v57 = vadd.f32 %v3715_v60, %v721_v29  ;;  %v816_v34 = vadd.f32 %v3725_v0, %v799_v30  ;;  %v894_v19 = vadd.f32 %v3739_v6, %v877_v25  ;;  %v364_v29 = vld [vmem:[%s6213_s7 + $0x8] sm:$0xff] }
 0x116   :  { %v676_v7 = vmax.f32 %v660_v46, 0.0  ;;  %v755_v8 = vmax.f32 %v739_v53, 0.0  ;;  %v833_v62 = vmax.f32 %v817_v58, 0.0  ;;  %v911_v9 = vmax.f32 %v895_v61, 0.0 }
 0x117   :  { %v675_v13 = vmax.f32 %v659_v26, 0.0  ;;  %v754_v17 = vmax.f32 %v738_v57, 0.0  ;;  %v832_v37 = vmax.f32 %v816_v34, 0.0  ;;  %v910_v18 = vmax.f32 %v894_v19, 0.0 }
 0x118   :  { %699 = vmatpush.msra.mxu1 %v676_v7  ;;  %778 = vmatpush.msra.mxu2 %v755_v8  ;;  %vm416_vm9 = vweird.f32 %v4328_v22  ;;  %3329 = vrcp.f32 %v4381_v49  ;;  %v4394_v27 = vmul.f32 %v438_v23, %v365_v11  ;;  %vm4396_vm10 = vcmp.eq.f32.partialorder %v419_v1, 8.507059e+37 }
 0x119   :  { %856 = vmatpush.msra.mxu3 %v833_v62  ;;  %934 = vmatpush.msrb.mxu0 %v911_v9  ;;  %v422_v33 = vor.u32 1.1754944e-38, %v421_v43  ;;  %v413_v28 = vmul.f32 %v4328_v22, %v412_v40  ;;  %v404_v20 = vand.u32 2147483647, %v4381_v49  ;;  %v406_v35 = vand.u32 2147483648, %v4381_v49  ;;  %vm4418_vm11 = vmor %vm415_vm8, %vm416_vm9 }
 0x11a   :  { %700 = vmatpush.msra.mxu1 %v675_v13  ;;  %779 = vmatpush.msra.mxu2 %v754_v17  ;;  %v4406_v4 = vstv %s4359_s25  ;;  %v641_v38 = vmul.f32 %v3701_v54, %v4394_v27  ;;  %v720_v1 = vmul.f32 %v3710_v59, %v4394_v27  ;;  %v798_v21 = vmul.f32 %v3722_v63, %v4394_v27  ;;  %s4953_s25 = sld [smem:[#allocation2 + $0xe]] }
 0x11b   :  { %857 = vmatpush.msra.mxu3 %v832_v37  ;;  %935 = vmatpush.msrb.mxu0 %v910_v18  ;;  %v4423_v43 = vstv %s4369_s2  ;;  %v876_v31 = vmul.f32 %v3736_v5, %v4394_v27  ;;  %v414_v32 = vadd.f32 %v4328_v22, %v413_v28  ;;  %vm400_vm12 = vweird.f32 %v4381_v49  ;;  %s4959_s2 = sld [smem:[#allocation7 + $0xe]] }
 0x11c   :  { %v4432_v47 = vstv %s4375_s26  ;;  %v658_v48 = vadd.f32 %v3704_v55, %v641_v38  ;;  %v737_v15 = vadd.f32 %v3715_v60, %v720_v1  ;;  %v815_v36 = vadd.f32 %v3725_v0, %v798_v21  ;;  %s4964_s26 = sld [smem:[#allocation2 + $0xf]] }
 0x11d   :  { %v967_v30 = vmul.f32 %v4406_v4, %v3828_v2  ;;  %v893_v46 = vadd.f32 %v3739_v6, %v876_v31  ;;  %v418_v53 = vsel %vm4418_vm11, %v4328_v22, %v414_v32  ;;  %vm4448_vm13 = vcmp.eq.f32.partialorder %v404_v20, 8.507059e+37 }
 0x11e   :  { %v3330_v25 = vpop.eup %3329  ;;  %v407_v61 = vor.u32 1.1754944e-38, %v406_v35  ;;  %v1045_v26 = vmul.f32 %v4423_v43, %v3828_v2  ;;  %v674_v57 = vmax.f32 %v658_v48, 0.0  ;;  %v753_v34 = vmax.f32 %v737_v15, 0.0 }
 0x11f   :  { %v831_v19 = vmax.f32 %v815_v36, 0.0  ;;  %v423_v7 = vsel %vm4396_vm10, %v422_v33, %v418_v53  ;;  %v909_v8 = vmax.f32 %v893_v46, 0.0  ;;  %v396_v22 = vmul.f32 %v3330_v25, %v4381_v49  ;;  %v363_v49 = vld [vmem:[%s6213_s7] sm:$0xff]  ;;  %s4557_s7 = sld [smem:[#allocation2 + $0x8]] }
 0x120   :  { %v4456_v62 = vmul.f32 %v423_v7, %v364_v29  ;;  %v4460_v9 = vstv %s4386_s29  ;;  %701 = vmatpush.msra.mxu1 %v674_v57  ;;  %780 = vmatpush.msra.mxu2 %v753_v34  ;;  %vm401_vm14 = vweird.f32 %v3330_v25  ;;  %v4463_v11 = vadd.f32 %v4432_v47, %v967_v30  ;;  %s5149_s29 = sld [smem:[#allocation7 + $0x10]] }
 0x121   :  { %v4466_v13 = vstv %s4392_s30  ;;  %v4469_v17 = vstv %s4400_s0  ;;  %858 = vmatpush.msra.mxu3 %v831_v19  ;;  %936 = vmatpush.msrb.mxu0 %v909_v8  ;;  %v397_v40 = vsub.f32 1.0, %v396_v22  ;;  %v4480_v33 = vadd.f32 %v4460_v9, %v1045_v26  ;;  %vm4494_vm15 = vmor %vm400_vm12, %vm401_vm14  ;;  %s5182_s30 = sld [smem:[#allocation2 + $0x11]] }
 0x122   :  { %v640_v37 = vmul.f32 %v3701_v54, %v4456_v62  ;;  %v719_v18 = vmul.f32 %v3710_v59, %v4456_v62  ;;  %v797_v23 = vmul.f32 %v3722_v63, %v4456_v62  ;;  %v875_v10 = vmul.f32 %v3736_v5, %v4456_v62  ;;  %s5192_s0 = sld [smem:[#allocation7 + $0x11]] }
 0x123   :  { %v1123_v28 = vmul.f32 %v4466_v13, %v3828_v2  ;;  %v4485_v20 = vstv %s4425_s1  ;;  %v398_v21 = vmul.f32 %v3330_v25, %v397_v40  ;;  %v4504_v15 = vstv %s4442_s6  ;;  %s5195_s1 = sld [smem:[#allocation2 + $0x12]] }
 0x124   :  { %v657_v35 = vadd.f32 %v3704_v55, %v640_v37  ;;  %v736_v38 = vadd.f32 %v3715_v60, %v719_v18  ;;  %v814_v1 = vadd.f32 %v3725_v0, %v797_v23  ;;  %v892_v16 = vadd.f32 %v3739_v6, %v875_v10  ;;  %s5219_s6 = sld [smem:[#allocation7 + $0x13]] }
 0x125   :  { %v4499_v32 = vadd.f32 %v4469_v17, %v1123_v28  ;;  %v1201_v48 = vmul.f32 %v4485_v20, %v3828_v2  ;;  %v399_v46 = vadd.f32 %v3330_v25, %v398_v21  ;;  %v966_v57 = vmul.f32 %v4406_v4, %v3883_v14 }
 0x126   :  { %v673_v36 = vmax.f32 %v657_v35, 0.0  ;;  %v752_v29 = vmax.f32 %v736_v38, 0.0  ;;  %v830_v30 = vmax.f32 %v814_v1, 0.0  ;;  %v908_v53 = vmax.f32 %v892_v16, 0.0 }
 0x127   :  { %v4510_v26 = vadd.f32 %v4504_v15, %v1201_v48  ;;  %v403_v34 = vsel %vm4494_vm15, %v3330_v25, %v399_v46  ;;  %v1000_v19 = vmax.f32 %v4463_v11, 0.0  ;;  %v1044_v7 = vmul.f32 %v4423_v43, %v3883_v14 }
 0x128   :  { %702 = vmatpush.msra.mxu1 %v673_v36  ;;  %781 = vmatpush.msra.mxu2 %v752_v29  ;;  %v1122_v8 = vmul.f32 %v4466_v13, %v3883_v14  ;;  %v408_v22 = vsel %vm4448_vm13, %v407_v61, %v403_v34  ;;  %v1078_v37 = vmax.f32 %v4480_v33, 0.0  ;;  %v983_v18 = vadd.f32 %v4432_v47, %v966_v57 }
 0x129   :  { %859 = vmatpush.msra.mxu3 %v830_v30  ;;  %937 = vmatpush.msrb.mxu0 %v908_v53  ;;  %v1200_v25 = vmul.f32 %v4485_v20, %v3883_v14  ;;  %v4527_v23 = vmul.f32 %v408_v22, %v363_v49  ;;  %v1156_v11 = vmax.f32 %v4499_v32, 0.0  ;;  %v1061_v40 = vadd.f32 %v4460_v9, %v1044_v7 }
 0x12a   :  { %v965_v10 = vmul.f32 %v4406_v4, %v3910_v52  ;;  %v1234_v28 = vmax.f32 %v4510_v26, 0.0  ;;  %v1139_v58 = vadd.f32 %v4469_v17, %v1122_v8  ;;  %v1043_v61 = vmul.f32 %v4423_v43, %v3910_v52 }
 0x12b   :  { %v1121_v33 = vmul.f32 %v4466_v13, %v3910_v52  ;;  %v639_v35 = vmul.f32 %v3701_v54, %v4527_v23  ;;  %v718_v38 = vmul.f32 %v3710_v59, %v4527_v23  ;;  %v796_v1 = vmul.f32 %v3722_v63, %v4527_v23 }
 0x12c   :  { %v874_v21 = vmul.f32 %v3736_v5, %v4527_v23  ;;  %v999_v16 = vmax.f32 %v983_v18, 0.0  ;;  %v1077_v31 = vmax.f32 %v1061_v40, 0.0  ;;  %v1217_v32 = vadd.f32 %v4504_v15, %v1200_v25 }
 0x12d   :  { %v982_v48 = vadd.f32 %v4432_v47, %v965_v10  ;;  %v656_v36 = vadd.f32 %v3704_v55, %v639_v35  ;;  %v735_v29 = vadd.f32 %v3715_v60, %v718_v38  ;;  %v813_v54 = vadd.f32 %v3725_v0, %v796_v1 }
 0x12e   :  { %v891_v59 = vadd.f32 %v3739_v6, %v874_v21  ;;  %v1155_v30 = vmax.f32 %v1139_v58, 0.0  ;;  %v1060_v63 = vadd.f32 %v4460_v9, %v1043_v61  ;;  %v1138_v46 = vadd.f32 %v4469_v17, %v1121_v33 }
 0x12f   :  { %v1199_v5 = vmul.f32 %v4485_v20, %v3910_v52  ;;  %v672_v53 = vmax.f32 %v656_v36, 0.0  ;;  %v751_v49 = vmax.f32 %v735_v29, 0.0  ;;  %v829_v26 = vmax.f32 %v813_v54, 0.0 }
 0x130   :  { %v907_v57 = vmax.f32 %v891_v59, 0.0  ;;  %v1233_v55 = vmax.f32 %v1217_v32, 0.0  ;;  %v998_v60 = vmax.f32 %v982_v48, 0.0  ;;  %v964_v6 = vmul.f32 %v4406_v4, %v3939_v24 }
 0x131   :  { %v1216_v0 = vadd.f32 %v4504_v15, %v1199_v5  ;;  %703 = vmatpush.msra.mxu1 %v672_v53  ;;  %782 = vmatpush.msra.mxu2 %v751_v49  ;;  %v1076_v34 = vmax.f32 %v1060_v63, 0.0  ;;  %v1042_v7 = vmul.f32 %v4423_v43, %v3939_v24  ;;  %v1120_v8 = vmul.f32 %v4466_v13, %v3939_v24 }
 0x132   :  { %v1198_v22 = vmul.f32 %v4485_v20, %v3939_v24  ;;  %860 = vmatpush.msra.mxu3 %v829_v26  ;;  %938 = vmatpush.msrb.mxu0 %v907_v57  ;;  %v1154_v18 = vmax.f32 %v1138_v46, 0.0  ;;  %v981_v25 = vadd.f32 %v4432_v47, %v964_v6  ;;  %v963_v40 = vmul.f32 %v4406_v4, %v3977_v51 }
 0x133   :  { %v1041_v10 = vmul.f32 %v4423_v43, %v3977_v51  ;;  %1001 = vmatpush.msrb.mxu1 %v1000_v19  ;;  %1079 = vmatpush.msrb.mxu2 %v1078_v37  ;;  %v1232_v58 = vmax.f32 %v1216_v0, 0.0  ;;  %v1059_v61 = vadd.f32 %v4460_v9, %v1042_v7  ;;  %v1137_v33 = vadd.f32 %v4469_v17, %v1120_v8 }
 0x134   :  { %v1215_v35 = vadd.f32 %v4504_v15, %v1198_v22  ;;  %1157 = vmatpush.msrb.mxu3 %v1156_v11  ;;  %1235 = vmatpush.msra.mxu0 %v1234_v28  ;;  %v997_v38 = vmax.f32 %v981_v25, 0.0  ;;  %v980_v1 = vadd.f32 %v4432_v47, %v963_v40  ;;  %v1119_v32 = vmul.f32 %v4466_v13, %v3977_v51 }
 0x135   :  { %v1058_v21 = vadd.f32 %v4460_v9, %v1041_v10  ;;  %1002 = vmatpush.msrb.mxu1 %v999_v16  ;;  %1080 = vmatpush.msrb.mxu2 %v1077_v31  ;;  %v1075_v19 = vmax.f32 %v1059_v61, 0.0  ;;  %v1153_v37 = vmax.f32 %v1137_v33, 0.0  ;;  %v1197_v36 = vmul.f32 %v4485_v20, %v3977_v51 }
 0x136   :  { %v1231_v48 = vmax.f32 %v1215_v35, 0.0  ;;  %1158 = vmatpush.msrb.mxu3 %v1155_v30  ;;  %1236 = vmatpush.msra.mxu0 %v1233_v55  ;;  %v996_v11 = vmax.f32 %v980_v1, 0.0  ;;  %v1136_v29 = vadd.f32 %v4469_v17, %v1119_v32  ;;  %v962_v54 = vmul.f32 %v4406_v4, %v4024_v45 }
 0x137   :  { %v1074_v28 = vmax.f32 %v1058_v21, 0.0  ;;  %1003 = vmatpush.msrb.mxu1 %v998_v60  ;;  %1081 = vmatpush.msrb.mxu2 %v1076_v34  ;;  %v1214_v16 = vadd.f32 %v4504_v15, %v1197_v36  ;;  %v1040_v31 = vmul.f32 %v4423_v43, %v4024_v45  ;;  %v1118_v59 = vmul.f32 %v4466_v13, %v4024_v45 }
 0x138   :  { %v4591_v63 = vstv %s4557_s7  ;;  %1159 = vmatpush.msrb.mxu3 %v1154_v18  ;;  %1237 = vmatpush.msra.mxu0 %v1232_v58  ;;  %v1152_v30 = vmax.f32 %v1136_v29, 0.0  ;;  %v979_v46 = vadd.f32 %v4432_v47, %v962_v54  ;;  %v1196_v5 = vmul.f32 %v4485_v20, %v4024_v45  ;;  %s5369_s7 = sld [smem:[#allocation2 + $0x14]] }
 0x139   :  { %v961_v53 = vmul.f32 %v4406_v4, %v4072_v41  ;;  %1004 = vmatpush.msrb.mxu1 %v997_v38  ;;  %1082 = vmatpush.msrb.mxu2 %v1075_v19  ;;  %v1230_v49 = vmax.f32 %v1214_v16, 0.0  ;;  %v1057_v26 = vadd.f32 %v4460_v9, %v1040_v31  ;;  %v1135_v57 = vadd.f32 %v4469_v17, %v1118_v59 }
 0x13a   :  { %v1039_v55 = vmul.f32 %v4423_v43, %v4072_v41  ;;  %1160 = vmatpush.msrb.mxu3 %v1153_v37  ;;  %1238 = vmatpush.msra.mxu0 %v1231_v48  ;;  %v995_v60 = vmax.f32 %v979_v46, 0.0  ;;  %v1213_v0 = vadd.f32 %v4504_v15, %v1196_v5  ;;  %v1117_v34 = vmul.f32 %v4466_v13, %v4072_v41 }
 0x13b   :  { %v978_v6 = vadd.f32 %v4432_v47, %v961_v53  ;;  %1005 = vmatpush.msrb.mxu1 %v996_v11  ;;  %1083 = vmatpush.msrb.mxu2 %v1074_v28  ;;  %v1073_v7 = vmax.f32 %v1057_v26, 0.0  ;;  %v1151_v8 = vmax.f32 %v1135_v57, 0.0  ;;  %v1195_v18 = vmul.f32 %v4485_v20, %v4072_v41 }
 0x13c   :  { %v1056_v22 = vadd.f32 %v4460_v9, %v1039_v55  ;;  %1161 = vmatpush.msrb.mxu3 %v1152_v30  ;;  %1239 = vmatpush.msra.mxu0 %v1230_v49  ;;  %v1229_v25 = vmax.f32 %v1213_v0, 0.0  ;;  %v1134_v10 = vadd.f32 %v4469_v17, %v1117_v34  ;;  %v960_v58 = vmul.f32 %v4406_v4, %v4119_v50 }
 0x13d   :  { %v994_v40 = vmax.f32 %v978_v6, 0.0  ;;  %1006 = vmatpush.msrb.mxu1 %v995_v60  ;;  %1084 = vmatpush.msrb.mxu2 %v1073_v7  ;;  %v1212_v33 = vadd.f32 %v4504_v15, %v1195_v18  ;;  %v1038_v35 = vmul.f32 %v4423_v43, %v4119_v50  ;;  %v1116_v38 = vmul.f32 %v4466_v13, %v4119_v50 }
 0x13e   :  { %v1072_v61 = vmax.f32 %v1056_v22, 0.0  ;;  %1162 = vmatpush.msrb.mxu3 %v1151_v8  ;;  %1240 = vmatpush.msra.mxu0 %v1229_v25  ;;  %v1150_v1 = vmax.f32 %v1134_v10, 0.0  ;;  %v977_v21 = vadd.f32 %v4432_v47, %v960_v58  ;;  %v1194_v32 = vmul.f32 %v4485_v20, %v4119_v50 }
 0x13f   :  { %v959_v19 = vmul.f32 %v4406_v4, %v4144_v12  ;;  %1007 = vmatpush.msrb.mxu1 %v994_v40  ;;  %v1228_v37 = vmax.f32 %v1212_v33, 0.0  ;;  %v1055_v48 = vadd.f32 %v4460_v9, %v1038_v35  ;;  %v1133_v36 = vadd.f32 %v4469_v17, %v1116_v38 }
 0x140   :  { %1085 = vmatpush.msrb.mxu2 %v1072_v61  ;;  %v1037_v11 = vmul.f32 %v4423_v43, %v4144_v12  ;;  %1163 = vmatpush.msrb.mxu3 %v1150_v1  ;;  %v993_v28 = vmax.f32 %v977_v21, 0.0  ;;  %v1211_v29 = vadd.f32 %v4504_v15, %v1194_v32  ;;  %v1115_v16 = vmul.f32 %v4466_v13, %v4144_v12 }
 0x141   :  { %v976_v54 = vadd.f32 %v4432_v47, %v959_v19  ;;  %1241 = vmatpush.msra.mxu0 %v1228_v37  ;;  %v1071_v31 = vmax.f32 %v1055_v48, 0.0  ;;  %v1149_v59 = vmax.f32 %v1133_v36, 0.0  ;;  %v1193_v46 = vmul.f32 %v4485_v20, %v4144_v12 }
 0x142   :  { %v1054_v30 = vadd.f32 %v4460_v9, %v1037_v11  ;;  %1008 = vmatpush.msrb.mxu1 %v993_v28  ;;  %v1227_v5 = vmax.f32 %v1211_v29, 0.0  ;;  %v1132_v49 = vadd.f32 %v4469_v17, %v1115_v16  ;;  %v958_v26 = vmul.f32 %v4406_v4, %v4199_v44 }
 0x143   :  { %v992_v53 = vmax.f32 %v976_v54, 0.0  ;;  %1086 = vmatpush.msrb.mxu2 %v1071_v31  ;;  %1164 = vmatpush.msrb.mxu3 %v1149_v59  ;;  %v1210_v55 = vadd.f32 %v4504_v15, %v1193_v46  ;;  %v1036_v60 = vmul.f32 %v4423_v43, %v4199_v44  ;;  %v1114_v0 = vmul.f32 %v4466_v13, %v4199_v44 }
 0x144   :  { %v1070_v57 = vmax.f32 %v1054_v30, 0.0  ;;  %1242 = vmatpush.msra.mxu0 %v1227_v5  ;;  %v1148_v6 = vmax.f32 %v1132_v49, 0.0  ;;  %v975_v34 = vadd.f32 %v4432_v47, %v958_v26  ;;  %v1192_v7 = vmul.f32 %v4485_v20, %v4199_v44 }
 0x145   :  { %1009 = vmatpush.msrb.mxu1 %v992_v53  ;;  %v957_v8 = vmul.f32 %v4406_v4, %v4265_v42  ;;  %v1226_v22 = vmax.f32 %v1210_v55, 0.0  ;;  %v1053_v18 = vadd.f32 %v4460_v9, %v1036_v60  ;;  %v1131_v25 = vadd.f32 %v4469_v17, %v1114_v0 }
 0x146   :  { %1087 = vmatpush.msrb.mxu2 %v1070_v57  ;;  %v1035_v40 = vmul.f32 %v4423_v43, %v4265_v42  ;;  %1165 = vmatpush.msrb.mxu3 %v1148_v6  ;;  %v991_v10 = vmax.f32 %v975_v34, 0.0  ;;  %v1209_v58 = vadd.f32 %v4504_v15, %v1192_v7  ;;  %v1113_v33 = vmul.f32 %v4466_v13, %v4265_v42 }
 0x147   :  { %v974_v61 = vadd.f32 %v4432_v47, %v957_v8  ;;  %1243 = vmatpush.msra.mxu0 %v1226_v22  ;;  %v1069_v35 = vmax.f32 %v1053_v18, 0.0  ;;  %v1147_v38 = vmax.f32 %v1131_v25, 0.0  ;;  %v1191_v21 = vmul.f32 %v4485_v20, %v4265_v42 }
 0x148   :  { %v1052_v1 = vadd.f32 %v4460_v9, %v1035_v40  ;;  %1010 = vmatpush.msrb.mxu1 %v991_v10  ;;  %v1225_v32 = vmax.f32 %v1209_v58, 0.0  ;;  %v1130_v37 = vadd.f32 %v4469_v17, %v1113_v33  ;;  %v956_v48 = vmul.f32 %v4406_v4, %v4337_v39 }
 0x149   :  { %v990_v19 = vmax.f32 %v974_v61, 0.0  ;;  %1088 = vmatpush.msrb.mxu2 %v1069_v35  ;;  %1166 = vmatpush.msrb.mxu3 %v1147_v38  ;;  %v1208_v11 = vadd.f32 %v4504_v15, %v1191_v21  ;;  %v1034_v28 = vmul.f32 %v4423_v43, %v4337_v39  ;;  %v1112_v29 = vmul.f32 %v4466_v13, %v4337_v39 }
 0x14a   :  { %v1068_v36 = vmax.f32 %v1052_v1, 0.0  ;;  %1244 = vmatpush.msra.mxu0 %v1225_v32  ;;  %v1146_v54 = vmax.f32 %v1130_v37, 0.0  ;;  %v973_v16 = vadd.f32 %v4432_v47, %v956_v48  ;;  %v1190_v31 = vmul.f32 %v4485_v20, %v4337_v39 }
 0x14b   :  { %1011 = vmatpush.msrb.mxu1 %v990_v19  ;;  %v955_v59 = vmul.f32 %v4406_v4, %v4343_v56  ;;  %v1224_v30 = vmax.f32 %v1208_v11, 0.0  ;;  %v1051_v46 = vadd.f32 %v4460_v9, %v1034_v28  ;;  %v1129_v5 = vadd.f32 %v4469_v17, %v1112_v29 }
 0x14c   :  { %1089 = vmatpush.msrb.mxu2 %v1068_v36  ;;  %v1033_v53 = vmul.f32 %v4423_v43, %v4343_v56  ;;  %1167 = vmatpush.msrb.mxu3 %v1146_v54  ;;  %v989_v49 = vmax.f32 %v973_v16, 0.0  ;;  %v1207_v26 = vadd.f32 %v4504_v15, %v1190_v31  ;;  %v1111_v55 = vmul.f32 %v4466_v13, %v4343_v56  ;;  %v341_v31 = vpop.permute.xlu2 %340 }
 0x14d   :  { %v972_v57 = vadd.f32 %v4432_v47, %v955_v59  ;;  %1245 = vmatpush.msra.mxu0 %v1224_v30  ;;  %v1067_v60 = vmax.f32 %v1051_v46, 0.0  ;;  %v1145_v0 = vmax.f32 %v1129_v5, 0.0  ;;  %v1189_v34 = vmul.f32 %v4485_v20, %v4343_v56 }
 0x14e   :  { %v1050_v6 = vadd.f32 %v4460_v9, %v1033_v53  ;;  %1012 = vmatpush.msrb.mxu1 %v989_v49  ;;  %v1223_v7 = vmax.f32 %v1207_v26, 0.0  ;;  %v1128_v22 = vadd.f32 %v4469_v17, %v1111_v55  ;;  %v954_v18 = vmul.f32 %v4406_v4, %v4394_v27 }
 0x14f   :  { %v988_v8 = vmax.f32 %v972_v57, 0.0  ;;  %1090 = vmatpush.msrb.mxu2 %v1067_v60  ;;  %1168 = vmatpush.msrb.mxu3 %v1145_v0  ;;  %v1206_v40 = vadd.f32 %v4504_v15, %v1189_v34  ;;  %v1032_v10 = vmul.f32 %v4423_v43, %v4394_v27  ;;  %v1110_v58 = vmul.f32 %v4466_v13, %v4394_v27 }
 0x150   :  { %v1066_v25 = vmax.f32 %v1050_v6, 0.0  ;;  %1246 = vmatpush.msra.mxu0 %v1223_v7  ;;  %v1144_v61 = vmax.f32 %v1128_v22, 0.0  ;;  %v971_v33 = vadd.f32 %v4432_v47, %v954_v18  ;;  %v1188_v35 = vmul.f32 %v4485_v20, %v4394_v27 }
 0x151   :  { %1013 = vmatpush.msrb.mxu1 %v988_v8  ;;  %v953_v38 = vmul.f32 %v4406_v4, %v4456_v62  ;;  %v1222_v1 = vmax.f32 %v1206_v40, 0.0  ;;  %v1049_v21 = vadd.f32 %v4460_v9, %v1032_v10  ;;  %v1127_v32 = vadd.f32 %v4469_v17, %v1110_v58 }
 0x152   :  { %1091 = vmatpush.msrb.mxu2 %v1066_v25  ;;  %v1031_v19 = vmul.f32 %v4423_v43, %v4456_v62  ;;  %1169 = vmatpush.msrb.mxu3 %v1144_v61  ;;  %v987_v37 = vmax.f32 %v971_v33, 0.0  ;;  %v1205_v48 = vadd.f32 %v4504_v15, %v1188_v35  ;;  %v1109_v11 = vmul.f32 %v4466_v13, %v4456_v62 }
 0x153   :  { %v970_v36 = vadd.f32 %v4432_v47, %v953_v38  ;;  %1247 = vmatpush.msra.mxu0 %v1222_v1  ;;  %v1065_v28 = vmax.f32 %v1049_v21, 0.0  ;;  %v1143_v29 = vmax.f32 %v1127_v32, 0.0  ;;  %v1187_v16 = vmul.f32 %v4485_v20, %v4456_v62 }
 0x154   :  { %v1048_v54 = vadd.f32 %v4460_v9, %v1031_v19  ;;  %1014 = vmatpush.msrb.mxu1 %v987_v37  ;;  %v1221_v59 = vmax.f32 %v1205_v48, 0.0  ;;  %v1126_v5 = vadd.f32 %v4469_v17, %v1109_v11  ;;  %v952_v53 = vmul.f32 %v4406_v4, %v4527_v23 }
 0x155   :  { %v986_v46 = vmax.f32 %v970_v36, 0.0  ;;  %1092 = vmatpush.msrb.mxu2 %v1065_v28  ;;  %1170 = vmatpush.msrb.mxu3 %v1143_v29  ;;  %v1204_v57 = vadd.f32 %v4504_v15, %v1187_v16  ;;  %v1030_v55 = vmul.f32 %v4423_v43, %v4527_v23  ;;  %v1108_v4 = vmul.f32 %v4466_v13, %v4527_v23  ;;  %v4782_v29 = vld [vmem:[%s6215_s9] sm:$0xff] }
 0x156   :  { %v1064_v26 = vmax.f32 %v1048_v54, 0.0  ;;  %1248 = vmatpush.msra.mxu0 %v1221_v59  ;;  %v1142_v60 = vmax.f32 %v1126_v5, 0.0  ;;  %v969_v0 = vadd.f32 %v4432_v47, %v952_v53  ;;  %v1186_v6 = vmul.f32 %v4485_v20, %v4527_v23 }
 0x157   :  { %1015 = vmatpush.msrb.mxu1 %v986_v46  ;;  %v1220_v34 = vmax.f32 %v1204_v57, 0.0  ;;  %v1047_v7 = vadd.f32 %v4460_v9, %v1030_v55  ;;  %v1279_v43 = vmul.f32 %v4591_v63, %v3828_v2  ;;  %v1125_v47 = vadd.f32 %v4469_v17, %v1108_v4 }
 0x158   :  { %1093 = vmatpush.msrb.mxu2 %v1064_v26  ;;  %1171 = vmatpush.msrb.mxu3 %v1142_v60  ;;  %v985_v8 = vmax.f32 %v969_v0, 0.0  ;;  %v1203_v13 = vadd.f32 %v4504_v15, %v1186_v6  ;;  %v3425_v22 = vmov 2   ;;  %v4739_v20 = vstv %s4691_s8  ;;  %s5435_s8 = sld [smem:[#allocation2 + $0x15]] }
 0x159   :  { %3267 = vset.pattern.permute.xlu2 %v3425_v22  ;;  %1249 = vmatpush.msra.mxu0 %v1220_v34  ;;  %v1063_v18 = vmax.f32 %v1047_v7, 0.0  ;;  %v1296_v9 = vadd.f32 %v4739_v20, %v1279_v43  ;;  %v4744_v25 = vstv %s4684_s13  ;;  %v4747_v40 = vstv %s4698_s14  ;;  %s5382_s13 = sld [smem:[#allocation7 + $0x14]] }
 0x15a   :  { %1016 = vmatpush.msrb.mxu1 %v985_v8  ;;  %v1141_v17 = vmax.f32 %v1125_v47, 0.0  ;;  %v1219_v15 = vmax.f32 %v1203_v13, 0.0  ;;  %v1357_v10 = vmul.f32 %v4744_v25, %v3828_v2  ;;  %v4753_v58 = vstv %s4704_s15  ;;  %866 = vperm.xlu2 %3267, %v4782_v29   ;;  %s5442_s14 = sld [smem:[#allocation7 + $0x15]] }
 0x15b   :  { %1094 = vmatpush.msrb.mxu2 %v1063_v18  ;;  %v1312_v61 = vmax.f32 %v1296_v9, 0.0  ;;  %v1435_v33 = vmul.f32 %v4753_v58, %v3828_v2  ;;  %v4759_v35 = vstv %s4710_s16  ;;  %v4762_v38 = vstv %s4715_s17  ;;  %s5447_s15 = sld [smem:[#allocation2 + $0x16]] }
 0x15c   :  { %v360_v30 = vpop.f32.mrf.mxu0  ;;  %1172 = vmatpush.msrb.mxu3 %v1141_v17  ;;  %1250 = vmatpush.msra.mxu0 %v1219_v15  ;;  %v1374_v1 = vadd.f32 %v4747_v40, %v1357_v10  ;;  %v1513_v21 = vmul.f32 %v4762_v38, %v3828_v2  ;;  %v4768_v32 = vstv %s4720_s18  ;;  %v1278_v19 = vmul.f32 %v4591_v63, %v3883_v14  ;;  %s5454_s16 = sld [smem:[#allocation7 + $0x16]] }
 0x15d   :  { %v4722_v49 = vadd.f32 %v360_v30, %v341_v31  ;;  %v1452_v37 = vadd.f32 %v4759_v35, %v1435_v33  ;;  %v1356_v48 = vmul.f32 %v4744_v25, %v3883_v14  ;;  %v1434_v36 = vmul.f32 %v4753_v58, %v3883_v14  ;;  %s5461_s17 = sld [smem:[#allocation2 + $0x17]] }
 0x15e   :  { %v1390_v11 = vmax.f32 %v1374_v1, 0.0  ;;  %v1530_v28 = vadd.f32 %v4768_v32, %v1513_v21  ;;  %v1295_v54 = vadd.f32 %v4739_v20, %v1278_v19  ;;  %v1512_v16 = vmul.f32 %v4762_v38, %v3883_v14  ;;  %s5467_s18 = sld [smem:[#allocation7 + $0x17]] }
 0x15f   :  { %3134 = vadd.xlane.f32.xlu0 %v4722_v49  ;;  %704 = vmatmul.f32.vlgmr.msra.gmra.mxu1 %v4722_v49  ;;  %v3426_v31 = vmov 1   ;;  %v1468_v59 = vmax.f32 %v1452_v37, 0.0  ;;  %v1373_v30 = vadd.f32 %v4747_v40, %v1356_v48  ;;  %v1451_v46 = vadd.f32 %v4759_v35, %v1434_v36 }
 0x160   :  { %783 = vmatmul.f32.vlgmr.msra.gmra.mxu2 %v4722_v49  ;;  %861 = vmatmul.f32.vlgmr.msra.gmra.mxu3 %v4722_v49  ;;  %v1277_v5 = vmul.f32 %v4591_v63, %v3910_v52  ;;  %v1546_v53 = vmax.f32 %v1530_v28, 0.0  ;;  %v1311_v26 = vmax.f32 %v1295_v54, 0.0  ;;  %v1529_v57 = vadd.f32 %v4768_v32, %v1512_v16 }
 0x161   :  { %939 = vmatmul.f32.vlgmr.msrb.gmra.mxu0 %v4722_v49  ;;  %1313 = vmatpush.msra.mxu1 %v1312_v61  ;;  %v1355_v55 = vmul.f32 %v4744_v25, %v3910_v52  ;;  %v1389_v60 = vmax.f32 %v1373_v30, 0.0  ;;  %v1467_v0 = vmax.f32 %v1451_v46, 0.0  ;;  %v1433_v6 = vmul.f32 %v4753_v58, %v3910_v52 }
 0x162   :  { %3266 = vset.pattern.permute.xlu1 %v3426_v31  ;;  %1391 = vmatpush.msra.mxu2 %v1390_v11  ;;  %v1294_v4 = vadd.f32 %v4739_v20, %v1277_v5  ;;  %v1545_v34 = vmax.f32 %v1529_v57, 0.0  ;;  %v1511_v43 = vmul.f32 %v4762_v38, %v3910_v52  ;;  %v1276_v8 = vmul.f32 %v4591_v63, %v3939_v24 }
 0x163   :  { %788 = vperm.xlu1 %3266, %v4782_v29   ;;  %1469 = vmatpush.msra.mxu3 %v1468_v59  ;;  %v1372_v7 = vadd.f32 %v4747_v40, %v1355_v55  ;;  %v1450_v13 = vadd.f32 %v4759_v35, %v1433_v6  ;;  %v1354_v22 = vmul.f32 %v4744_v25, %v3939_v24 }
 0x164   :  { %1547 = vmatpush.msrb.mxu0 %v1546_v53  ;;  %1314 = vmatpush.msra.mxu1 %v1311_v26  ;;  %v1310_v47 = vmax.f32 %v1294_v4, 0.0  ;;  %v1432_v18 = vmul.f32 %v4753_v58, %v3939_v24  ;;  %v1528_v17 = vadd.f32 %v4768_v32, %v1511_v43  ;;  %v1293_v15 = vadd.f32 %v4739_v20, %v1276_v8 }
 0x165   :  { %1392 = vmatpush.msra.mxu2 %v1389_v60  ;;  %1470 = vmatpush.msra.mxu3 %v1467_v0  ;;  %v1388_v9 = vmax.f32 %v1372_v7, 0.0  ;;  %v1510_v10 = vmul.f32 %v4762_v38, %v3939_v24  ;;  %v1466_v61 = vmax.f32 %v1450_v13, 0.0  ;;  %v1371_v33 = vadd.f32 %v4747_v40, %v1354_v22 }
 0x166   :  { %1548 = vmatpush.msrb.mxu0 %v1545_v34  ;;  %1315 = vmatpush.msra.mxu1 %v1310_v47  ;;  %v1449_v1 = vadd.f32 %v4759_v35, %v1432_v18  ;;  %v1275_v21 = vmul.f32 %v4591_v63, %v3977_v51  ;;  %v1544_v19 = vmax.f32 %v1528_v17, 0.0  ;;  %v1309_v37 = vmax.f32 %v1293_v15, 0.0 }
 0x167   :  { %1017 = vmatmul.f32.vlgmr.msrb.gmra.mxu1 %v4722_v49  ;;  %1393 = vmatpush.msra.mxu2 %v1388_v9  ;;  %v1527_v48 = vadd.f32 %v4768_v32, %v1510_v10  ;;  %v1353_v36 = vmul.f32 %v4744_v25, %v3977_v51  ;;  %v1387_v11 = vmax.f32 %v1371_v33, 0.0  ;;  %v1431_v16 = vmul.f32 %v4753_v58, %v3977_v51 }
 0x168   :  { %1095 = vmatmul.f32.vlgmr.msrb.gmra.mxu2 %v4722_v49  ;;  %1173 = vmatmul.f32.vlgmr.msrb.gmra.mxu3 %v4722_v49  ;;  %v1465_v28 = vmax.f32 %v1449_v1, 0.0  ;;  %v1292_v54 = vadd.f32 %v4739_v20, %v1275_v21  ;;  %v1509_v30 = vmul.f32 %v4762_v38, %v3977_v51  ;;  %v1274_v53 = vmul.f32 %v4591_v63, %v4024_v45 }
 0x169   :  { %1251 = vmatmul.f32.vlgmr.msra.gmra.mxu0 %v4722_v49  ;;  %1471 = vmatpush.msra.mxu3 %v1466_v61  ;;  %v1543_v31 = vmax.f32 %v1527_v48, 0.0  ;;  %v1370_v59 = vadd.f32 %v4747_v40, %v1353_v36  ;;  %v1448_v5 = vadd.f32 %v4759_v35, %v1431_v16  ;;  %v1352_v26 = vmul.f32 %v4744_v25, %v4024_v45 }
 0x16a   :  { %1549 = vmatpush.msrb.mxu0 %v1544_v19  ;;  %1316 = vmatpush.msra.mxu1 %v1309_v37  ;;  %v1308_v46 = vmax.f32 %v1292_v54, 0.0  ;;  %v1526_v55 = vadd.f32 %v4768_v32, %v1509_v30  ;;  %v3427_v60 = vmov 5   ;;  %v1430_v0 = vmul.f32 %v4753_v58, %v4024_v45 }
 0x16b   :  { %1394 = vmatpush.msra.mxu2 %v1387_v11  ;;  %1472 = vmatpush.msra.mxu3 %v1465_v28  ;;  %v1386_v57 = vmax.f32 %v1370_v59, 0.0  ;;  %v1508_v4 = vmul.f32 %v4762_v38, %v4024_v45  ;;  %v1464_v6 = vmax.f32 %v1448_v5, 0.0  ;;  %v1291_v34 = vadd.f32 %v4739_v20, %v1274_v53 }
 0x16c   :  { %1550 = vmatpush.msrb.mxu0 %v1543_v31  ;;  %3270 = vset.pattern.permute.xlu2 %v3427_v60  ;;  %v1369_v7 = vadd.f32 %v4747_v40, %v1352_v26  ;;  %v1273_v43 = vmul.f32 %v4591_v63, %v4072_v41  ;;  %v1542_v8 = vmax.f32 %v1526_v55, 0.0  ;;  %v1447_v47 = vadd.f32 %v4759_v35, %v1430_v0 }
 0x16d   :  { %1317 = vmatpush.msra.mxu1 %v1308_v46  ;;  %1100 = vperm.xlu2 %3270, %v4782_v29   ;;  %v1525_v13 = vadd.f32 %v4768_v32, %v1508_v4  ;;  %v1351_v22 = vmul.f32 %v4744_v25, %v4072_v41  ;;  %v1307_v18 = vmax.f32 %v1291_v34, 0.0  ;;  %v1429_v15 = vmul.f32 %v4753_v58, %v4072_v41 }
 0x16e   :  { %1395 = vmatpush.msra.mxu2 %v1386_v57  ;;  %1473 = vmatpush.msra.mxu3 %v1464_v6  ;;  %v1385_v9 = vmax.f32 %v1369_v7, 0.0  ;;  %v1290_v17 = vadd.f32 %v4739_v20, %v1273_v43  ;;  %v1463_v10 = vmax.f32 %v1447_v47, 0.0  ;;  %v1507_v1 = vmul.f32 %v4762_v38, %v4072_v41 }
 0x16f   :  { %1551 = vmatpush.msrb.mxu0 %v1542_v8  ;;  %v1541_v61 = vmax.f32 %v1525_v13, 0.0  ;;  %v1368_v33 = vadd.f32 %v4747_v40, %v1351_v22  ;;  %1318 = vmatpush.msra.mxu1 %v1307_v18  ;;  %v1446_v19 = vadd.f32 %v4759_v35, %v1429_v15  ;;  %v1272_v37 = vmul.f32 %v4591_v63, %v4119_v50 }
 0x170   :  { %1396 = vmatpush.msra.mxu2 %v1385_v9  ;;  %v1306_v21 = vmax.f32 %v1290_v17, 0.0  ;;  %1474 = vmatpush.msra.mxu3 %v1463_v10  ;;  %v1524_v36 = vadd.f32 %v4768_v32, %v1507_v1  ;;  %v1350_v11 = vmul.f32 %v4744_v25, %v4119_v50  ;;  %v1428_v28 = vmul.f32 %v4753_v58, %v4119_v50 }
 0x171   :  { %1552 = vmatpush.msrb.mxu0 %v1541_v61  ;;  %v1384_v48 = vmax.f32 %v1368_v33, 0.0  ;;  %v1462_v54 = vmax.f32 %v1446_v19, 0.0  ;;  %v3428_v16 = vmov 4   ;;  %v1289_v31 = vadd.f32 %v4739_v20, %v1272_v37 }
 0x172   :  { %1319 = vmatpush.msra.mxu1 %v1306_v21  ;;  %3269 = vset.pattern.permute.xlu1 %v3428_v16  ;;  %v1506_v59 = vmul.f32 %v4762_v38, %v4119_v50  ;;  %v1271_v30 = vmul.f32 %v4591_v63, %v4144_v12  ;;  %v1540_v46 = vmax.f32 %v1524_v36, 0.0  ;;  %v1367_v5 = vadd.f32 %v4747_v40, %v1350_v11 }
 0x173   :  { %1397 = vmatpush.msra.mxu2 %v1384_v48  ;;  %v1445_v53 = vadd.f32 %v4759_v35, %v1428_v28  ;;  %1022 = vperm.xlu1 %3269, %v4782_v29   ;;  %v1349_v26 = vmul.f32 %v4744_v25, %v4144_v12  ;;  %v1305_v57 = vmax.f32 %v1289_v31, 0.0  ;;  %v1427_v0 = vmul.f32 %v4753_v58, %v4144_v12 }
 0x174   :  { %1475 = vmatpush.msra.mxu3 %v1462_v54  ;;  %v1523_v55 = vadd.f32 %v4768_v32, %v1506_v59  ;;  %v1288_v60 = vadd.f32 %v4739_v20, %v1271_v30  ;;  %1553 = vmatpush.msrb.mxu0 %v1540_v46  ;;  %v1383_v4 = vmax.f32 %v1367_v5, 0.0  ;;  %v1505_v7 = vmul.f32 %v4762_v38, %v4144_v12 }
 0x175   :  { %v1461_v6 = vmax.f32 %v1445_v53, 0.0  ;;  %v1366_v34 = vadd.f32 %v4747_v40, %v1349_v26  ;;  %1320 = vmatpush.msra.mxu1 %v1305_v57  ;;  %v1444_v47 = vadd.f32 %v4759_v35, %v1427_v0  ;;  %v1270_v18 = vmul.f32 %v4591_v63, %v4199_v44 }
 0x176   :  { %v1539_v43 = vmax.f32 %v1523_v55, 0.0  ;;  %v1304_v8 = vmax.f32 %v1288_v60, 0.0  ;;  %1398 = vmatpush.msra.mxu2 %v1383_v4  ;;  %v1522_v22 = vadd.f32 %v4768_v32, %v1505_v7  ;;  %v1348_v9 = vmul.f32 %v4744_v25, %v4199_v44 }
 0x177   :  { %1476 = vmatpush.msra.mxu3 %v1461_v6  ;;  %v1382_v13 = vmax.f32 %v1366_v34, 0.0  ;;  %v1460_v17 = vmax.f32 %v1444_v47, 0.0  ;;  %v1426_v15 = vmul.f32 %v4753_v58, %v4199_v44  ;;  %v1504_v10 = vmul.f32 %v4762_v38, %v4199_v44 }
 0x178   :  { %1554 = vmatpush.msrb.mxu0 %v1539_v43  ;;  %1321 = vmatpush.msra.mxu1 %v1304_v8  ;;  %v1269_v61 = vmul.f32 %v4591_v63, %v4265_v42  ;;  %v1538_v33 = vmax.f32 %v1522_v22, 0.0  ;;  %v3429_v1 = vmov 7   ;;  %v1287_v21 = vadd.f32 %v4739_v20, %v1270_v18 }
 0x179   :  { %1399 = vmatpush.msra.mxu2 %v1382_v13  ;;  %3272 = vset.pattern.permute.xlu2 %v3429_v1  ;;  %v1365_v19 = vadd.f32 %v4747_v40, %v1348_v9  ;;  %v1347_v37 = vmul.f32 %v4744_v25, %v4265_v42  ;;  %v1443_v48 = vadd.f32 %v4759_v35, %v1426_v15  ;;  %v3430_v59 = vmov 6  }
 0x17a   :  { %1477 = vmatpush.msra.mxu3 %v1460_v17  ;;  %v1521_v36 = vadd.f32 %v4768_v32, %v1504_v10  ;;  %1256 = vperm.xlu2 %3272, %v4782_v29   ;;  %v1286_v11 = vadd.f32 %v4739_v20, %v1269_v61  ;;  %v1303_v28 = vmax.f32 %v1287_v21, 0.0  ;;  %v1425_v31 = vmul.f32 %v4753_v58, %v4265_v42 }
 0x17b   :  { %1555 = vmatpush.msrb.mxu0 %v1538_v33  ;;  %v1381_v54 = vmax.f32 %v1365_v19, 0.0  ;;  %v1364_v16 = vadd.f32 %v4747_v40, %v1347_v37  ;;  %3271 = vset.pattern.permute.xlu1 %v3430_v59  ;;  %v1459_v30 = vmax.f32 %v1443_v48, 0.0  ;;  %v1503_v53 = vmul.f32 %v4762_v38, %v4265_v42 }
 0x17c   :  { %v1537_v46 = vmax.f32 %v1521_v36, 0.0  ;;  %v1302_v5 = vmax.f32 %v1286_v11, 0.0  ;;  %1178 = vperm.xlu1 %3271, %v4782_v29   ;;  %1322 = vmatpush.msra.mxu1 %v1303_v28  ;;  %v1442_v57 = vadd.f32 %v4759_v35, %v1425_v31  ;;  %v1268_v55 = vmul.f32 %v4591_v63, %v4337_v39 }
 0x17d   :  { %1400 = vmatpush.msra.mxu2 %v1381_v54  ;;  %v1380_v26 = vmax.f32 %v1364_v16, 0.0  ;;  %v1346_v60 = vmul.f32 %v4744_v25, %v4337_v39  ;;  %1478 = vmatpush.msra.mxu3 %v1459_v30  ;;  %v1520_v0 = vadd.f32 %v4768_v32, %v1503_v53  ;;  %v1424_v4 = vmul.f32 %v4753_v58, %v4337_v39 }
 0x17e   :  { %1556 = vmatpush.msrb.mxu0 %v1537_v46  ;;  %v1502_v6 = vmul.f32 %v4762_v38, %v4337_v39  ;;  %1323 = vmatpush.msra.mxu1 %v1302_v5  ;;  %v1458_v34 = vmax.f32 %v1442_v57, 0.0  ;;  %v1285_v7 = vadd.f32 %v4739_v20, %v1268_v55  ;;  %v1267_v8 = vmul.f32 %v4591_v63, %v4343_v56 }
 0x17f   :  { %1401 = vmatpush.msra.mxu2 %v1380_v26  ;;  %v1363_v43 = vadd.f32 %v4747_v40, %v1346_v60  ;;  %v1536_v47 = vmax.f32 %v1520_v0, 0.0  ;;  %v1441_v13 = vadd.f32 %v4759_v35, %v1424_v4  ;;  %v1345_v18 = vmul.f32 %v4744_v25, %v4343_v56 }
 0x180   :  { %v1519_v22 = vadd.f32 %v4768_v32, %v1502_v6  ;;  %1479 = vmatpush.msra.mxu3 %v1458_v34  ;;  %v1301_v9 = vmax.f32 %v1285_v7, 0.0  ;;  %v1284_v15 = vadd.f32 %v4739_v20, %v1267_v8  ;;  %v1423_v10 = vmul.f32 %v4753_v58, %v4343_v56 }
 0x181   :  { %v1379_v17 = vmax.f32 %v1363_v43, 0.0  ;;  %1557 = vmatpush.msrb.mxu0 %v1536_v47  ;;  %v1457_v61 = vmax.f32 %v1441_v13, 0.0  ;;  %v1362_v1 = vadd.f32 %v4747_v40, %v1345_v18  ;;  %v1501_v21 = vmul.f32 %v4762_v38, %v4343_v56 }
 0x182   :  { %v1535_v33 = vmax.f32 %v1519_v22, 0.0  ;;  %v3431_v19 = vmov 10   ;;  %1324 = vmatpush.msra.mxu1 %v1301_v9  ;;  %v1300_v37 = vmax.f32 %v1284_v15, 0.0  ;;  %v1440_v48 = vadd.f32 %v4759_v35, %v1423_v10 }
 0x183   :  { %3275 = vset.pattern.permute.xlu2 %v3431_v19  ;;  %1402 = vmatpush.msra.mxu2 %v1379_v17  ;;  %v1266_v36 = vmul.f32 %v4591_v63, %v4394_v27  ;;  %v1344_v11 = vmul.f32 %v4744_v25, %v4394_v27  ;;  %v1378_v28 = vmax.f32 %v1362_v1, 0.0  ;;  %v1518_v54 = vadd.f32 %v4768_v32, %v1501_v21 }
 0x184   :  { %1480 = vmatpush.msra.mxu3 %v1457_v61  ;;  %1558 = vmatpush.msrb.mxu0 %v1535_v33  ;;  %v1422_v16 = vmul.f32 %v4753_v58, %v4394_v27  ;;  %v1500_v31 = vmul.f32 %v4762_v38, %v4394_v27  ;;  %v1456_v59 = vmax.f32 %v1440_v48, 0.0  ;;  %v1265_v5 = vmul.f32 %v4591_v63, %v4456_v62 }
 0x185   :  { %1325 = vmatpush.msra.mxu1 %v1300_v37  ;;  %v1283_v30 = vadd.f32 %v4739_v20, %v1266_v36  ;;  %v1361_v46 = vadd.f32 %v4747_v40, %v1344_v11  ;;  %1490 = vperm.xlu2 %3275, %v4782_v29   ;;  %v1534_v53 = vmax.f32 %v1518_v54, 0.0  ;;  %v1343_v55 = vmul.f32 %v4744_v25, %v4456_v62 }
 0x186   :  { %1403 = vmatpush.msra.mxu2 %v1378_v28  ;;  %v1439_v26 = vadd.f32 %v4759_v35, %v1422_v16  ;;  %v1517_v57 = vadd.f32 %v4768_v32, %v1500_v31  ;;  %1481 = vmatpush.msra.mxu3 %v1456_v59  ;;  %v1282_v4 = vadd.f32 %v4739_v20, %v1265_v5  ;;  %v4984_v33 = vstv %s4927_s21 }
 0x187   :  { %v1299_v60 = vmax.f32 %v1283_v30, 0.0  ;;  %v1377_v0 = vmax.f32 %v1361_v46, 0.0  ;;  %v1421_v6 = vmul.f32 %v4753_v58, %v4456_v62  ;;  %1559 = vmatpush.msrb.mxu0 %v1534_v53  ;;  %v1360_v43 = vadd.f32 %v4747_v40, %v1343_v55 }
 0x188   :  { %v1455_v34 = vmax.f32 %v1439_v26, 0.0  ;;  %v1533_v7 = vmax.f32 %v1517_v57, 0.0  ;;  %v1499_v8 = vmul.f32 %v4762_v38, %v4456_v62  ;;  %v1298_v47 = vmax.f32 %v1282_v4, 0.0 }
 0x189   :  { %1326 = vmatpush.msra.mxu1 %v1299_v60  ;;  %1404 = vmatpush.msra.mxu2 %v1377_v0  ;;  %v1438_v13 = vadd.f32 %v4759_v35, %v1421_v6  ;;  %v1264_v22 = vmul.f32 %v4591_v63, %v4527_v23  ;;  %v1342_v18 = vmul.f32 %v4744_v25, %v4527_v23  ;;  %v1376_v9 = vmax.f32 %v1360_v43, 0.0 }
 0x18a   :  { %1482 = vmatpush.msra.mxu3 %v1455_v34  ;;  %1560 = vmatpush.msrb.mxu0 %v1533_v7  ;;  %v1516_v17 = vadd.f32 %v4768_v32, %v1499_v8  ;;  %v1420_v15 = vmul.f32 %v4753_v58, %v4527_v23  ;;  %v1498_v10 = vmul.f32 %v4762_v38, %v4527_v23  ;;  %v4991_v37 = vstv %s4939_s23  ;;  %s5691_s23 = sld [smem:[#allocation7 + $0x19]] }
 0x18b   :  { %1327 = vmatpush.msra.mxu1 %v1298_v47  ;;  %v1454_v63 = vmax.f32 %v1438_v13, 0.0  ;;  %v1281_v61 = vadd.f32 %v4739_v20, %v1264_v22  ;;  %v1359_v25 = vadd.f32 %v4747_v40, %v1342_v18  ;;  %1405 = vmatpush.msra.mxu2 %v1376_v9  ;;  %v1591_v38 = vmul.f32 %v4984_v33, %v3828_v2 }
 0x18c   :  { %v1532_v1 = vmax.f32 %v1516_v17, 0.0  ;;  %v1437_v21 = vadd.f32 %v4759_v35, %v1420_v15  ;;  %v1515_v58 = vadd.f32 %v4768_v32, %v1498_v10  ;;  %v4994_v40 = vstv %s4932_s22  ;;  %s5684_s22 = sld [smem:[#allocation7 + $0x18]] }
 0x18d   :  { %1483 = vmatpush.msra.mxu3 %v1454_v63  ;;  %v1297_v19 = vmax.f32 %v1281_v61, 0.0  ;;  %v1375_v20 = vmax.f32 %v1359_v25, 0.0  ;;  %v1608_v35 = vadd.f32 %v4991_v37, %v1591_v38  ;;  %v1669_v32 = vmul.f32 %v4994_v40, %v3828_v2 }
 0x18e   :  { %1561 = vmatpush.msrb.mxu0 %v1532_v1  ;;  %v1453_v48 = vmax.f32 %v1437_v21, 0.0  ;;  %v1531_v36 = vmax.f32 %v1515_v58, 0.0  ;;  %v5000_v11 = vstv %s4946_s24  ;;  %v5003_v28 = vstv %s4953_s25  ;;  %s5697_s24 = sld [smem:[#allocation2 + $0x1a]] }
 0x18f   :  { %1328 = vmatpush.msra.mxu1 %v1297_v19  ;;  %1406 = vmatpush.msra.mxu2 %v1375_v20  ;;  %v5006_v54 = vstv %s4959_s2  ;;  %v5009_v16 = vstv %s4964_s26  ;;  %v1624_v31 = vmax.f32 %v1608_v35, 0.0  ;;  %v1686_v59 = vadd.f32 %v5000_v11, %v1669_v32  ;;  %s5703_s25 = sld [smem:[#allocation7 + $0x1a]] }
 0x190   :  { %1484 = vmatpush.msra.mxu3 %v1453_v48  ;;  %1562 = vmatpush.msrb.mxu0 %v1531_v36  ;;  %v1747_v30 = vmul.f32 %v5003_v28, %v3828_v2  ;;  %v1825_v46 = vmul.f32 %v5009_v16, %v3828_v2  ;;  %v5019_v5 = vstv %s4974_s27  ;;  %v1590_v53 = vmul.f32 %v4984_v33, %v3883_v14  ;;  %s5708_s2 = sld [smem:[#allocation2 + $0x1b]] }
 0x191   :  { %1329 = vmatmul.f32.vlgmr.msra.gmra.mxu1 %v4722_v49  ;;  %1407 = vmatmul.f32.vlgmr.msra.gmra.mxu2 %v4722_v49  ;;  %v1668_v26 = vmul.f32 %v4994_v40, %v3883_v14  ;;  %v1702_v57 = vmax.f32 %v1686_v59, 0.0  ;;  %v1746_v0 = vmul.f32 %v5003_v28, %v3883_v14  ;;  %v3432_v4 = vmov 9   ;;  %s5713_s26 = sld [smem:[#allocation7 + $0x1b]] }
 0x192   :  { %1485 = vmatmul.f32.vlgmr.msra.gmra.mxu3 %v4722_v49  ;;  %1563 = vmatmul.f32.vlgmr.msrb.gmra.mxu0 %v4722_v49  ;;  %v1764_v55 = vadd.f32 %v5006_v54, %v1747_v30  ;;  %v1842_v60 = vadd.f32 %v5019_v5, %v1825_v46  ;;  %v1607_v6 = vadd.f32 %v4991_v37, %v1590_v53  ;;  %v3433_v15 = vmov 12  }
 0x193   :  { %1625 = vmatpush.msrb.mxu1 %v1624_v31  ;;  %3274 = vset.pattern.permute.xlu1 %v3432_v4  ;;  %v1685_v34 = vadd.f32 %v5000_v11, %v1668_v26  ;;  %v1824_v7 = vmul.f32 %v5009_v16, %v3883_v14  ;;  %v1763_v47 = vadd.f32 %v5006_v54, %v1746_v0 }
 0x194   :  { %1703 = vmatpush.msrb.mxu2 %v1702_v57  ;;  %v1780_v43 = vmax.f32 %v1764_v55, 0.0  ;;  %v1858_v8 = vmax.f32 %v1842_v60, 0.0  ;;  %1412 = vperm.xlu1 %3274, %v4782_v29   ;;  %v1589_v13 = vmul.f32 %v4984_v33, %v3910_v52  ;;  %v1623_v22 = vmax.f32 %v1607_v6, 0.0 }
 0x195   :  { %v1701_v18 = vmax.f32 %v1685_v34, 0.0  ;;  %v1841_v9 = vadd.f32 %v5019_v5, %v1824_v7  ;;  %v1667_v17 = vmul.f32 %v4994_v40, %v3910_v52  ;;  %3277 = vset.pattern.permute.xlu2 %v3433_v15  ;;  %v1779_v10 = vmax.f32 %v1763_v47, 0.0 }
 0x196   :  { %1781 = vmatpush.msrb.mxu3 %v1780_v43  ;;  %1859 = vmatpush.msra.mxu0 %v1858_v8  ;;  %v1606_v63 = vadd.f32 %v4991_v37, %v1589_v13  ;;  %v1745_v61 = vmul.f32 %v5003_v28, %v3910_v52  ;;  %v1823_v25 = vmul.f32 %v5009_v16, %v3910_v52 }
 0x197   :  { %1626 = vmatpush.msrb.mxu1 %v1623_v22  ;;  %1704 = vmatpush.msrb.mxu2 %v1701_v18  ;;  %v1857_v1 = vmax.f32 %v1841_v9, 0.0  ;;  %v1684_v21 = vadd.f32 %v5000_v11, %v1667_v17  ;;  %v1588_v58 = vmul.f32 %v4984_v33, %v3939_v24  ;;  %v1666_v38 = vmul.f32 %v4994_v40, %v3939_v24 }
 0x198   :  { %1782 = vmatpush.msrb.mxu3 %v1779_v10  ;;  %v1622_v19 = vmax.f32 %v1606_v63, 0.0  ;;  %v1762_v20 = vadd.f32 %v5006_v54, %v1745_v61  ;;  %v1840_v48 = vadd.f32 %v5019_v5, %v1823_v25  ;;  %1646 = vperm.xlu2 %3277, %v4782_v29   ;;  %v1744_v36 = vmul.f32 %v5003_v28, %v3939_v24 }
 0x199   :  { %1860 = vmatpush.msra.mxu0 %v1857_v1  ;;  %v1700_v35 = vmax.f32 %v1684_v21, 0.0  ;;  %v1605_v32 = vadd.f32 %v4991_v37, %v1588_v58  ;;  %v1683_v31 = vadd.f32 %v5000_v11, %v1666_v38  ;;  %v1822_v59 = vmul.f32 %v5009_v16, %v3939_v24 }
 0x19a   :  { %1627 = vmatpush.msrb.mxu1 %v1622_v19  ;;  %v1778_v30 = vmax.f32 %v1762_v20, 0.0  ;;  %v1856_v46 = vmax.f32 %v1840_v48, 0.0  ;;  %v1761_v53 = vadd.f32 %v5006_v54, %v1744_v36  ;;  %v1587_v26 = vmul.f32 %v4984_v33, %v3977_v51 }
 0x19b   :  { %1705 = vmatpush.msrb.mxu2 %v1700_v35  ;;  %v1621_v57 = vmax.f32 %v1605_v32, 0.0  ;;  %v1699_v55 = vmax.f32 %v1683_v31, 0.0  ;;  %v1839_v60 = vadd.f32 %v5019_v5, %v1822_v59  ;;  %v1665_v0 = vmul.f32 %v4994_v40, %v3977_v51 }
 0x19c   :  { %1783 = vmatpush.msrb.mxu3 %v1778_v30  ;;  %1861 = vmatpush.msra.mxu0 %v1856_v46  ;;  %v1777_v4 = vmax.f32 %v1761_v53, 0.0  ;;  %v1604_v6 = vadd.f32 %v4991_v37, %v1587_v26  ;;  %v1743_v34 = vmul.f32 %v5003_v28, %v3977_v51  ;;  %v1821_v7 = vmul.f32 %v5009_v16, %v3977_v51 }
 0x19d   :  { %1628 = vmatpush.msrb.mxu1 %v1621_v57  ;;  %1706 = vmatpush.msrb.mxu2 %v1699_v55  ;;  %v1855_v43 = vmax.f32 %v1839_v60, 0.0  ;;  %v1682_v8 = vadd.f32 %v5000_v11, %v1665_v0  ;;  %v1586_v47 = vmul.f32 %v4984_v33, %v4024_v45  ;;  %v3434_v9 = vmov 11  }
 0x19e   :  { %1784 = vmatpush.msrb.mxu3 %v1777_v4  ;;  %v1620_v13 = vmax.f32 %v1604_v6, 0.0  ;;  %v1760_v22 = vadd.f32 %v5006_v54, %v1743_v34  ;;  %v1838_v18 = vadd.f32 %v5019_v5, %v1821_v7  ;;  %3276 = vset.pattern.permute.xlu1 %v3434_v9  ;;  %v1664_v17 = vmul.f32 %v4994_v40, %v4024_v45 }
 0x19f   :  { %1862 = vmatpush.msra.mxu0 %v1855_v43  ;;  %v1698_v15 = vmax.f32 %v1682_v8, 0.0  ;;  %v1603_v10 = vadd.f32 %v4991_v37, %v1586_v47  ;;  %v1742_v63 = vmul.f32 %v5003_v28, %v4024_v45  ;;  %v1820_v61 = vmul.f32 %v5009_v16, %v4024_v45  ;;  %1568 = vperm.xlu1 %3276, %v4782_v29  }
 0x1a0   :  { %1629 = vmatpush.msrb.mxu1 %v1620_v13  ;;  %v1776_v25 = vmax.f32 %v1760_v22, 0.0  ;;  %v1854_v1 = vmax.f32 %v1838_v18, 0.0  ;;  %v1681_v21 = vadd.f32 %v5000_v11, %v1664_v17  ;;  %v1585_v58 = vmul.f32 %v4984_v33, %v4072_v41 }
 0x1a1   :  { %1707 = vmatpush.msrb.mxu2 %v1698_v15  ;;  %v1619_v38 = vmax.f32 %v1603_v10, 0.0  ;;  %v1759_v19 = vadd.f32 %v5006_v54, %v1742_v63  ;;  %v1837_v20 = vadd.f32 %v5019_v5, %v1820_v61  ;;  %v1663_v48 = vmul.f32 %v4994_v40, %v4072_v41 }
 0x1a2   :  { %1785 = vmatpush.msrb.mxu3 %v1776_v25  ;;  %1863 = vmatpush.msra.mxu0 %v1854_v1  ;;  %v1697_v36 = vmax.f32 %v1681_v21, 0.0  ;;  %v1602_v35 = vadd.f32 %v4991_v37, %v1585_v58  ;;  %v1741_v32 = vmul.f32 %v5003_v28, %v4072_v41  ;;  %v1819_v31 = vmul.f32 %v5009_v16, %v4072_v41 }
 0x1a3   :  { %1630 = vmatpush.msrb.mxu1 %v1619_v38  ;;  %v1775_v59 = vmax.f32 %v1759_v19, 0.0  ;;  %v1853_v30 = vmax.f32 %v1837_v20, 0.0  ;;  %v1680_v46 = vadd.f32 %v5000_v11, %v1663_v48  ;;  %v3435_v55 = vmov 15  }
 0x1a4   :  { %1708 = vmatpush.msrb.mxu2 %v1697_v36  ;;  %v1618_v53 = vmax.f32 %v1602_v35, 0.0  ;;  %v1758_v26 = vadd.f32 %v5006_v54, %v1741_v32  ;;  %v1836_v57 = vadd.f32 %v5019_v5, %v1819_v31  ;;  %3280 = vset.pattern.permute.xlu2 %v3435_v55  ;;  %v1584_v60 = vmul.f32 %v4984_v33, %v4119_v50 }
 0x1a5   :  { %1786 = vmatpush.msrb.mxu3 %v1775_v59  ;;  %1864 = vmatpush.msra.mxu0 %v1853_v30  ;;  %v1696_v0 = vmax.f32 %v1680_v46, 0.0  ;;  %v1662_v4 = vmul.f32 %v4994_v40, %v4119_v50  ;;  %v1740_v6 = vmul.f32 %v5003_v28, %v4119_v50  ;;  %v1818_v34 = vmul.f32 %v5009_v16, %v4119_v50 }
 0x1a6   :  { %1631 = vmatpush.msrb.mxu1 %v1618_v53  ;;  %v1774_v7 = vmax.f32 %v1758_v26, 0.0  ;;  %v1852_v43 = vmax.f32 %v1836_v57, 0.0  ;;  %v1601_v8 = vadd.f32 %v4991_v37, %v1584_v60  ;;  %1880 = vperm.xlu2 %3280, %v4782_v29   ;;  %v1583_v47 = vmul.f32 %v4984_v33, %v4144_v12 }
 0x1a7   :  { %1709 = vmatpush.msrb.mxu2 %v1696_v0  ;;  %v1679_v13 = vadd.f32 %v5000_v11, %v1662_v4  ;;  %v1757_v22 = vadd.f32 %v5006_v54, %v1740_v6  ;;  %v1835_v18 = vadd.f32 %v5019_v5, %v1818_v34  ;;  %v1661_v9 = vmul.f32 %v4994_v40, %v4144_v12 }
 0x1a8   :  { %1787 = vmatpush.msrb.mxu3 %v1774_v7  ;;  %1865 = vmatpush.msra.mxu0 %v1852_v43  ;;  %v1617_v17 = vmax.f32 %v1601_v8, 0.0  ;;  %v1600_v15 = vadd.f32 %v4991_v37, %v1583_v47  ;;  %v1739_v10 = vmul.f32 %v5003_v28, %v4144_v12  ;;  %v1817_v63 = vmul.f32 %v5009_v16, %v4144_v12 }
 0x1a9   :  { %v1695_v61 = vmax.f32 %v1679_v13, 0.0  ;;  %v1773_v25 = vmax.f32 %v1757_v22, 0.0  ;;  %v1851_v1 = vmax.f32 %v1835_v18, 0.0  ;;  %v1678_v21 = vadd.f32 %v5000_v11, %v1661_v9 }
 0x1aa   :  { %1632 = vmatpush.msrb.mxu1 %v1617_v17  ;;  %v1616_v58 = vmax.f32 %v1600_v15, 0.0  ;;  %v1756_v38 = vadd.f32 %v5006_v54, %v1739_v10  ;;  %v1834_v19 = vadd.f32 %v5019_v5, %v1817_v63  ;;  %v1582_v20 = vmul.f32 %v4984_v33, %v4199_v44 }
 0x1ab   :  { %1710 = vmatpush.msrb.mxu2 %v1695_v61  ;;  %1788 = vmatpush.msrb.mxu3 %v1773_v25  ;;  %v1694_v48 = vmax.f32 %v1678_v21, 0.0  ;;  %v1660_v36 = vmul.f32 %v4994_v40, %v4199_v44  ;;  %v1738_v35 = vmul.f32 %v5003_v28, %v4199_v44  ;;  %v1816_v32 = vmul.f32 %v5009_v16, %v4199_v44 }
 0x1ac   :  { %1866 = vmatpush.msra.mxu0 %v1851_v1  ;;  %1633 = vmatpush.msrb.mxu1 %v1616_v58  ;;  %v1772_v31 = vmax.f32 %v1756_v38, 0.0  ;;  %v1850_v59 = vmax.f32 %v1834_v19, 0.0  ;;  %v1599_v30 = vadd.f32 %v4991_v37, %v1582_v20  ;;  %v1581_v46 = vmul.f32 %v4984_v33, %v4265_v42 }
 0x1ad   :  { %1711 = vmatpush.msrb.mxu2 %v1694_v48  ;;  %v1677_v53 = vadd.f32 %v5000_v11, %v1660_v36  ;;  %v1755_v26 = vadd.f32 %v5006_v54, %v1738_v35  ;;  %v1833_v57 = vadd.f32 %v5019_v5, %v1816_v32  ;;  %v1659_v55 = vmul.f32 %v4994_v40, %v4265_v42 }
 0x1ae   :  { %1789 = vmatpush.msrb.mxu3 %v1772_v31  ;;  %1867 = vmatpush.msra.mxu0 %v1850_v59  ;;  %v1615_v60 = vmax.f32 %v1599_v30, 0.0  ;;  %v1598_v0 = vadd.f32 %v4991_v37, %v1581_v46  ;;  %v1737_v4 = vmul.f32 %v5003_v28, %v4265_v42  ;;  %v1815_v6 = vmul.f32 %v5009_v16, %v4265_v42 }
 0x1af   :  { %v1693_v34 = vmax.f32 %v1677_v53, 0.0  ;;  %v1771_v7 = vmax.f32 %v1755_v26, 0.0  ;;  %v1849_v43 = vmax.f32 %v1833_v57, 0.0  ;;  %v1676_v8 = vadd.f32 %v5000_v11, %v1659_v55 }
 0x1b0   :  { %1634 = vmatpush.msrb.mxu1 %v1615_v60  ;;  %v1614_v47 = vmax.f32 %v1598_v0, 0.0  ;;  %v1754_v13 = vadd.f32 %v5006_v54, %v1737_v4  ;;  %v1832_v22 = vadd.f32 %v5019_v5, %v1815_v6  ;;  %v1580_v18 = vmul.f32 %v4984_v33, %v4337_v39 }
 0x1b1   :  { %1712 = vmatpush.msrb.mxu2 %v1693_v34  ;;  %1790 = vmatpush.msrb.mxu3 %v1771_v7  ;;  %v1692_v9 = vmax.f32 %v1676_v8, 0.0  ;;  %v1658_v17 = vmul.f32 %v4994_v40, %v4337_v39  ;;  %v1736_v15 = vmul.f32 %v5003_v28, %v4337_v39  ;;  %v1814_v10 = vmul.f32 %v5009_v16, %v4337_v39 }
 0x1b2   :  { %1868 = vmatpush.msra.mxu0 %v1849_v43  ;;  %1635 = vmatpush.msrb.mxu1 %v1614_v47  ;;  %v1770_v63 = vmax.f32 %v1754_v13, 0.0  ;;  %v1848_v61 = vmax.f32 %v1832_v22, 0.0  ;;  %v1597_v25 = vadd.f32 %v4991_v37, %v1580_v18  ;;  %v3436_v38 = vmov 17  }
 0x1b3   :  { %1713 = vmatpush.msrb.mxu2 %v1692_v9  ;;  %v1675_v1 = vadd.f32 %v5000_v11, %v1658_v17  ;;  %v1753_v21 = vadd.f32 %v5006_v54, %v1736_v15  ;;  %v1831_v58 = vadd.f32 %v5019_v5, %v1814_v10  ;;  %3282 = vset.pattern.permute.xlu2 %v3436_v38  ;;  %v5166_v19 = vstv %s5133_s28 }
 0x1b4   :  { %1791 = vmatpush.msrb.mxu3 %v1770_v63  ;;  %1869 = vmatpush.msra.mxu0 %v1848_v61  ;;  %v1613_v20 = vmax.f32 %v1597_v25, 0.0  ;;  %v1579_v48 = vmul.f32 %v4984_v33, %v4343_v56  ;;  %v1657_v36 = vmul.f32 %v4994_v40, %v4343_v56  ;;  %v1735_v35 = vmul.f32 %v5003_v28, %v4343_v56 }
 0x1b5   :  { %v1691_v32 = vmax.f32 %v1675_v1, 0.0  ;;  %v1769_v31 = vmax.f32 %v1753_v21, 0.0  ;;  %v1847_v59 = vmax.f32 %v1831_v58, 0.0  ;;  %2036 = vperm.xlu2 %3282, %v4782_v29   ;;  %v1813_v30 = vmul.f32 %v5009_v16, %v4343_v56 }
 0x1b6   :  { %1636 = vmatpush.msrb.mxu1 %v1613_v20  ;;  %v1596_v46 = vadd.f32 %v4991_v37, %v1579_v48  ;;  %v1674_v53 = vadd.f32 %v5000_v11, %v1657_v36  ;;  %v1752_v26 = vadd.f32 %v5006_v54, %v1735_v35  ;;  %v1578_v57 = vmul.f32 %v4984_v33, %v4394_v27 }
 0x1b7   :  { %1714 = vmatpush.msrb.mxu2 %v1691_v32  ;;  %1792 = vmatpush.msrb.mxu3 %v1769_v31  ;;  %v1830_v55 = vadd.f32 %v5019_v5, %v1813_v30  ;;  %v1656_v29 = vmul.f32 %v4994_v40, %v4394_v27  ;;  %v1734_v60 = vmul.f32 %v5003_v28, %v4394_v27  ;;  %v5190_v0 = vstv %s5149_s29  ;;  %s5834_s29 = sld [smem:[#allocation2 + $0x1c]] }
 0x1b8   :  { %1870 = vmatpush.msra.mxu0 %v1847_v59  ;;  %v1612_v4 = vmax.f32 %v1596_v46, 0.0  ;;  %v1690_v6 = vmax.f32 %v1674_v53, 0.0  ;;  %v1768_v34 = vmax.f32 %v1752_v26, 0.0  ;;  %v1595_v7 = vadd.f32 %v4991_v37, %v1578_v57 }
 0x1b9   :  { %v1846_v43 = vmax.f32 %v1830_v55, 0.0  ;;  %v1673_v8 = vadd.f32 %v5000_v11, %v1656_v29  ;;  %v1751_v47 = vadd.f32 %v5006_v54, %v1734_v60  ;;  %v1812_v13 = vmul.f32 %v5009_v16, %v4394_v27 }
 0x1ba   :  { %1637 = vmatpush.msrb.mxu1 %v1612_v4  ;;  %1715 = vmatpush.msrb.mxu2 %v1690_v6  ;;  %v1611_v22 = vmax.f32 %v1595_v7, 0.0  ;;  %v1577_v18 = vmul.f32 %v4984_v33, %v4456_v62  ;;  %v1655_v9 = vmul.f32 %v4994_v40, %v4456_v62  ;;  %v1733_v17 = vmul.f32 %v5003_v28, %v4456_v62 }
 0x1bb   :  { %1793 = vmatpush.msrb.mxu3 %v1768_v34  ;;  %1871 = vmatpush.msra.mxu0 %v1846_v43  ;;  %v1689_v15 = vmax.f32 %v1673_v8, 0.0  ;;  %v1767_v10 = vmax.f32 %v1751_v47, 0.0  ;;  %v1829_v63 = vadd.f32 %v5019_v5, %v1812_v13  ;;  %v1811_v61 = vmul.f32 %v5009_v16, %v4456_v62 }
 0x1bc   :  { %1638 = vmatpush.msrb.mxu1 %v1611_v22  ;;  %v1594_v25 = vadd.f32 %v4991_v37, %v1577_v18  ;;  %v1672_v1 = vadd.f32 %v5000_v11, %v1655_v9  ;;  %v1750_v21 = vadd.f32 %v5006_v54, %v1733_v17  ;;  %v1576_v58 = vmul.f32 %v4984_v33, %v4527_v23 }
 0x1bd   :  { %1716 = vmatpush.msrb.mxu2 %v1689_v15  ;;  %1794 = vmatpush.msrb.mxu3 %v1767_v10  ;;  %v1845_v38 = vmax.f32 %v1829_v63, 0.0  ;;  %v1828_v20 = vadd.f32 %v5019_v5, %v1811_v61  ;;  %v1654_v48 = vmul.f32 %v4994_v40, %v4527_v23  ;;  %v1732_v36 = vmul.f32 %v5003_v28, %v4527_v23 }
 0x1be   :  { %v1610_v35 = vmax.f32 %v1594_v25, 0.0  ;;  %v1688_v32 = vmax.f32 %v1672_v1, 0.0  ;;  %v1766_v31 = vmax.f32 %v1750_v21, 0.0  ;;  %v1593_v33 = vadd.f32 %v4991_v37, %v1576_v58  ;;  %v5281_v58 = vld [vmem:[%s6215_s9] sm:$0xff] }
 0x1bf   :  { %1872 = vmatpush.msra.mxu0 %v1845_v38  ;;  %v1844_v59 = vmax.f32 %v1828_v20, 0.0  ;;  %v1671_v30 = vadd.f32 %v5000_v11, %v1654_v48  ;;  %v1749_v46 = vadd.f32 %v5006_v54, %v1732_v36  ;;  %v1810_v53 = vmul.f32 %v5009_v16, %v4527_v23 }
 0x1c0   :  { %1639 = vmatpush.msrb.mxu1 %v1610_v35  ;;  %1717 = vmatpush.msrb.mxu2 %v1688_v32  ;;  %v1609_v40 = vmax.f32 %v1593_v33, 0.0  ;;  %v1903_v28 = vmul.f32 %v5166_v19, %v3828_v2  ;;  %v5234_v26 = vstv %s5182_s30  ;;  %v5237_v37 = vstv %s5192_s0  ;;  %s5841_s30 = sld [smem:[#allocation2 + $0x1d]] }
 0x1c1   :  { %1795 = vmatpush.msrb.mxu3 %v1766_v31  ;;  %1873 = vmatpush.msra.mxu0 %v1844_v59  ;;  %v1687_v11 = vmax.f32 %v1671_v30, 0.0  ;;  %v1765_v54 = vmax.f32 %v1749_v46, 0.0  ;;  %v1827_v57 = vadd.f32 %v5019_v5, %v1810_v53  ;;  %v1981_v16 = vmul.f32 %v5234_v26, %v3828_v2  ;;  %s5846_s0 = sld [smem:[#allocation7 + $0x1c]] }
 0x1c2   :  { %1640 = vmatpush.msrb.mxu1 %v1609_v40  ;;  %v1920_v55 = vadd.f32 %v5190_v0, %v1903_v28  ;;  %v5244_v29 = vstv %s5195_s1  ;;  %v5247_v60 = vstv %s5201_s5  ;;  %v5250_v4 = vstv %s5209_s3  ;;  %s5936_s1 = sld [smem:[#allocation7 + $0x1d]] }
 0x1c3   :  { %1718 = vmatpush.msrb.mxu2 %v1687_v11  ;;  %1796 = vmatpush.msrb.mxu3 %v1765_v54  ;;  %v1843_v6 = vmax.f32 %v1827_v57, 0.0  ;;  %v1998_v34 = vadd.f32 %v5237_v37, %v1981_v16  ;;  %v2059_v5 = vmul.f32 %v5244_v29, %v3828_v2  ;;  %v2137_v7 = vmul.f32 %v5250_v4, %v3828_v2  ;;  %s5943_s5 = sld [smem:[#allocation2 + $0x1e]] }
 0x1c4   :  { %1641 = vmatmul.f32.vlgmr.msrb.gmra.mxu1 %v4722_v49  ;;  %1719 = vmatmul.f32.vlgmr.msrb.gmra.mxu2 %v4722_v49  ;;  %v1936_v43 = vmax.f32 %v1920_v55, 0.0  ;;  %v5260_v8 = vstv %s5219_s6  ;;  %v1902_v47 = vmul.f32 %v5166_v19, %v3883_v14  ;;  %v1980_v9 = vmul.f32 %v5234_v26, %v3883_v14  ;;  %s5948_s3 = sld [smem:[#allocation7 + $0x1e]] }
 0x1c5   :  { %1874 = vmatpush.msra.mxu0 %v1843_v6  ;;  %1797 = vmatmul.f32.vlgmr.msrb.gmra.mxu3 %v4722_v49  ;;  %v2014_v13 = vmax.f32 %v1998_v34, 0.0  ;;  %v2076_v22 = vadd.f32 %v5247_v60, %v2059_v5  ;;  %v2154_v18 = vadd.f32 %v5260_v8, %v2137_v7  ;;  %v2058_v15 = vmul.f32 %v5244_v29, %v3883_v14  ;;  %s5954_s6 = sld [smem:[#allocation2 + $0x1f]] }
 0x1c6   :  { %1875 = vmatmul.f32.vlgmr.msra.gmra.mxu0 %v4722_v49  ;;  %1937 = vmatpush.msra.mxu1 %v1936_v43  ;;  %v1919_v17 = vadd.f32 %v5190_v0, %v1902_v47  ;;  %v2136_v10 = vmul.f32 %v5250_v4, %v3883_v14  ;;  %v3437_v25 = vmov 20   ;;  %v1997_v1 = vadd.f32 %v5237_v37, %v1980_v9 }
 0x1c7   :  { %2015 = vmatpush.msra.mxu2 %v2014_v13  ;;  %v2092_v63 = vmax.f32 %v2076_v22, 0.0  ;;  %v2170_v61 = vmax.f32 %v2154_v18, 0.0  ;;  %3285 = vset.pattern.permute.xlu2 %v3437_v25  ;;  %v1901_v21 = vmul.f32 %v5166_v19, %v3910_v52  ;;  %v2075_v20 = vadd.f32 %v5247_v60, %v2058_v15 }
 0x1c8   :  { %2270 = vperm.xlu2 %3285, %v5281_v58   ;;  %v1935_v38 = vmax.f32 %v1919_v17, 0.0  ;;  %v2153_v48 = vadd.f32 %v5260_v8, %v2136_v10  ;;  %v1979_v36 = vmul.f32 %v5234_v26, %v3910_v52  ;;  %v2013_v35 = vmax.f32 %v1997_v1, 0.0 }
 0x1c9   :  { %2093 = vmatpush.msra.mxu3 %v2092_v63  ;;  %2171 = vmatpush.msrb.mxu0 %v2170_v61  ;;  %v1918_v32 = vadd.f32 %v5190_v0, %v1901_v21  ;;  %v2057_v31 = vmul.f32 %v5244_v29, %v3910_v52  ;;  %v2135_v33 = vmul.f32 %v5250_v4, %v3910_v52  ;;  %v2091_v59 = vmax.f32 %v2075_v20, 0.0 }
 0x1ca   :  { %1938 = vmatpush.msra.mxu1 %v1935_v38  ;;  %v2169_v30 = vmax.f32 %v2153_v48, 0.0  ;;  %v1996_v46 = vadd.f32 %v5237_v37, %v1979_v36  ;;  %v1900_v53 = vmul.f32 %v5166_v19, %v3939_v24  ;;  %2016 = vmatpush.msra.mxu2 %v2013_v35  ;;  %v1978_v54 = vmul.f32 %v5234_v26, %v3939_v24 }
 0x1cb   :  { %v1934_v40 = vmax.f32 %v1918_v32, 0.0  ;;  %v2074_v28 = vadd.f32 %v5247_v60, %v2057_v31  ;;  %v2152_v11 = vadd.f32 %v5260_v8, %v2135_v33  ;;  %2094 = vmatpush.msra.mxu3 %v2091_v59  ;;  %v2056_v55 = vmul.f32 %v5244_v29, %v3939_v24 }
 0x1cc   :  { %2172 = vmatpush.msrb.mxu0 %v2169_v30  ;;  %v2012_v57 = vmax.f32 %v1996_v46, 0.0  ;;  %v1917_v16 = vadd.f32 %v5190_v0, %v1900_v53  ;;  %v2134_v6 = vmul.f32 %v5250_v4, %v3939_v24  ;;  %v1995_v7 = vadd.f32 %v5237_v37, %v1978_v54 }
 0x1cd   :  { %1939 = vmatpush.msra.mxu1 %v1934_v40  ;;  %v2090_v34 = vmax.f32 %v2074_v28, 0.0  ;;  %v2168_v5 = vmax.f32 %v2152_v11, 0.0  ;;  %v1899_v43 = vmul.f32 %v5166_v19, %v3977_v51  ;;  %v2073_v13 = vadd.f32 %v5247_v60, %v2056_v55 }
 0x1ce   :  { %2017 = vmatpush.msra.mxu2 %v2012_v57  ;;  %v1933_v47 = vmax.f32 %v1917_v16, 0.0  ;;  %v2151_v22 = vadd.f32 %v5260_v8, %v2134_v6  ;;  %v1977_v18 = vmul.f32 %v5234_v26, %v3977_v51  ;;  %v2011_v9 = vmax.f32 %v1995_v7, 0.0 }
 0x1cf   :  { %2095 = vmatpush.msra.mxu3 %v2090_v34  ;;  %2173 = vmatpush.msrb.mxu0 %v2168_v5  ;;  %v1916_v17 = vadd.f32 %v5190_v0, %v1899_v43  ;;  %v2055_v15 = vmul.f32 %v5244_v29, %v3977_v51  ;;  %v2133_v10 = vmul.f32 %v5250_v4, %v3977_v51  ;;  %v2089_v63 = vmax.f32 %v2073_v13, 0.0 }
 0x1d0   :  { %1940 = vmatpush.msra.mxu1 %v1933_v47  ;;  %v2167_v61 = vmax.f32 %v2151_v22, 0.0  ;;  %v1994_v25 = vadd.f32 %v5237_v37, %v1977_v18  ;;  %v3438_v1 = vmov 22   ;;  %v1898_v21 = vmul.f32 %v5166_v19, %v4024_v45  ;;  %2018 = vmatpush.msra.mxu2 %v2011_v9 }
 0x1d1   :  { %3287 = vset.pattern.permute.xlu2 %v3438_v1  ;;  %v1932_v38 = vmax.f32 %v1916_v17, 0.0  ;;  %v2072_v20 = vadd.f32 %v5247_v60, %v2055_v15  ;;  %v2150_v48 = vadd.f32 %v5260_v8, %v2133_v10  ;;  %v1976_v36 = vmul.f32 %v5234_v26, %v4024_v45  ;;  %2096 = vmatpush.msra.mxu3 %v2089_v63 }
 0x1d2   :  { %2426 = vperm.xlu2 %3287, %v5281_v58   ;;  %2174 = vmatpush.msrb.mxu0 %v2167_v61  ;;  %v2010_v35 = vmax.f32 %v1994_v25, 0.0  ;;  %v1915_v32 = vadd.f32 %v5190_v0, %v1898_v21  ;;  %v2054_v31 = vmul.f32 %v5244_v29, %v4024_v45  ;;  %v2132_v33 = vmul.f32 %v5250_v4, %v4024_v45 }
 0x1d3   :  { %1941 = vmatpush.msra.mxu1 %v1932_v38  ;;  %v2088_v59 = vmax.f32 %v2072_v20, 0.0  ;;  %v2166_v30 = vmax.f32 %v2150_v48, 0.0  ;;  %v1993_v46 = vadd.f32 %v5237_v37, %v1976_v36  ;;  %v1897_v53 = vmul.f32 %v5166_v19, %v4072_v41 }
 0x1d4   :  { %2019 = vmatpush.msra.mxu2 %v2010_v35  ;;  %v1931_v40 = vmax.f32 %v1915_v32, 0.0  ;;  %v2071_v28 = vadd.f32 %v5247_v60, %v2054_v31  ;;  %v2149_v11 = vadd.f32 %v5260_v8, %v2132_v33  ;;  %v1975_v54 = vmul.f32 %v5234_v26, %v4072_v41 }
 0x1d5   :  { %2097 = vmatpush.msra.mxu3 %v2088_v59  ;;  %2175 = vmatpush.msrb.mxu0 %v2166_v30  ;;  %v2009_v57 = vmax.f32 %v1993_v46, 0.0  ;;  %v1914_v16 = vadd.f32 %v5190_v0, %v1897_v53  ;;  %v2053_v55 = vmul.f32 %v5244_v29, %v4072_v41  ;;  %v2131_v6 = vmul.f32 %v5250_v4, %v4072_v41 }
 0x1d6   :  { %1942 = vmatpush.msra.mxu1 %v1931_v40  ;;  %v2087_v34 = vmax.f32 %v2071_v28, 0.0  ;;  %v2165_v5 = vmax.f32 %v2149_v11, 0.0  ;;  %v1992_v7 = vadd.f32 %v5237_v37, %v1975_v54  ;;  %v1896_v43 = vmul.f32 %v5166_v19, %v4119_v50 }
 0x1d7   :  { %2020 = vmatpush.msra.mxu2 %v2009_v57  ;;  %v1930_v47 = vmax.f32 %v1914_v16, 0.0  ;;  %v2070_v13 = vadd.f32 %v5247_v60, %v2053_v55  ;;  %v2148_v22 = vadd.f32 %v5260_v8, %v2131_v6  ;;  %v1974_v18 = vmul.f32 %v5234_v26, %v4119_v50 }
 0x1d8   :  { %2098 = vmatpush.msra.mxu3 %v2087_v34  ;;  %2176 = vmatpush.msrb.mxu0 %v2165_v5  ;;  %v2008_v9 = vmax.f32 %v1992_v7, 0.0  ;;  %v1913_v17 = vadd.f32 %v5190_v0, %v1896_v43  ;;  %v2052_v15 = vmul.f32 %v5244_v29, %v4119_v50  ;;  %v2130_v10 = vmul.f32 %v5250_v4, %v4119_v50 }
 0x1d9   :  { %1943 = vmatpush.msra.mxu1 %v1930_v47  ;;  %v2086_v63 = vmax.f32 %v2070_v13, 0.0  ;;  %v2164_v61 = vmax.f32 %v2148_v22, 0.0  ;;  %v1991_v25 = vadd.f32 %v5237_v37, %v1974_v18  ;;  %v3439_v20 = vmov 14  }
 0x1da   :  { %2021 = vmatpush.msra.mxu2 %v2008_v9  ;;  %v1929_v1 = vmax.f32 %v1913_v17, 0.0  ;;  %v2069_v21 = vadd.f32 %v5247_v60, %v2052_v15  ;;  %v2147_v38 = vadd.f32 %v5260_v8, %v2130_v10  ;;  %3279 = vset.pattern.permute.xlu1 %v3439_v20  ;;  %v1895_v48 = vmul.f32 %v5166_v19, %v4144_v12 }
 0x1db   :  { %2099 = vmatpush.msra.mxu3 %v2086_v63  ;;  %2177 = vmatpush.msrb.mxu0 %v2164_v61  ;;  %v2007_v36 = vmax.f32 %v1991_v25, 0.0  ;;  %v1973_v35 = vmul.f32 %v5234_v26, %v4144_v12  ;;  %v2051_v32 = vmul.f32 %v5244_v29, %v4144_v12  ;;  %v2129_v31 = vmul.f32 %v5250_v4, %v4144_v12  ;;  %v5396_v25 = vpop.permute.xlu0 %710 }
 0x1dc   :  { %1944 = vmatpush.msra.mxu1 %v1929_v1  ;;  %v2085_v33 = vmax.f32 %v2069_v21, 0.0  ;;  %v2163_v59 = vmax.f32 %v2147_v38, 0.0  ;;  %v1912_v30 = vadd.f32 %v5190_v0, %v1895_v48  ;;  %1802 = vperm.xlu1 %3279, %v5281_v58   ;;  %v1894_v46 = vmul.f32 %v5166_v19, %v4199_v44 }
 0x1dd   :  { %2022 = vmatpush.msra.mxu2 %v2007_v36  ;;  %v1990_v53 = vadd.f32 %v5237_v37, %v1973_v35  ;;  %v2068_v40 = vadd.f32 %v5247_v60, %v2051_v32  ;;  %v2146_v28 = vadd.f32 %v5260_v8, %v2129_v31  ;;  %v1972_v11 = vmul.f32 %v5234_v26, %v4199_v44 }
 0x1de   :  { %2100 = vmatpush.msra.mxu3 %v2085_v33  ;;  %2178 = vmatpush.msrb.mxu0 %v2163_v59  ;;  %v1928_v54 = vmax.f32 %v1912_v30, 0.0  ;;  %v1911_v57 = vadd.f32 %v5190_v0, %v1894_v46  ;;  %v2050_v16 = vmul.f32 %v5244_v29, %v4199_v44  ;;  %v2128_v55 = vmul.f32 %v5250_v4, %v4199_v44 }
 0x1df   :  { %v2006_v6 = vmax.f32 %v1990_v53, 0.0  ;;  %v2084_v34 = vmax.f32 %v2068_v40, 0.0  ;;  %v2162_v5 = vmax.f32 %v2146_v28, 0.0  ;;  %v1989_v7 = vadd.f32 %v5237_v37, %v1972_v11 }
 0x1e0   :  { %1945 = vmatpush.msra.mxu1 %v1928_v54  ;;  %v1927_v43 = vmax.f32 %v1911_v57, 0.0  ;;  %v2067_v47 = vadd.f32 %v5247_v60, %v2050_v16  ;;  %v2145_v13 = vadd.f32 %v5260_v8, %v2128_v55  ;;  %v1893_v18 = vmul.f32 %v5166_v19, %v4265_v42 }
 0x1e1   :  { %2023 = vmatpush.msra.mxu2 %v2006_v6  ;;  %2101 = vmatpush.msra.mxu3 %v2084_v34  ;;  %v2005_v22 = vmax.f32 %v1989_v7, 0.0  ;;  %v1971_v9 = vmul.f32 %v5234_v26, %v4265_v42  ;;  %v2049_v17 = vmul.f32 %v5244_v29, %v4265_v42  ;;  %v2127_v63 = vmul.f32 %v5250_v4, %v4265_v42 }
 0x1e2   :  { %2179 = vmatpush.msrb.mxu0 %v2162_v5  ;;  %1946 = vmatpush.msra.mxu1 %v1927_v43  ;;  %v2083_v15 = vmax.f32 %v2067_v47, 0.0  ;;  %v2161_v10 = vmax.f32 %v2145_v13, 0.0  ;;  %v1892_v61 = vmul.f32 %v5166_v19, %v4337_v39  ;;  %v3440_v1 = vmov 24  }
 0x1e3   :  { %2024 = vmatpush.msra.mxu2 %v2005_v22  ;;  %3289 = vset.pattern.permute.xlu2 %v3440_v1  ;;  %v1910_v21 = vadd.f32 %v5190_v0, %v1893_v18  ;;  %v1988_v38 = vadd.f32 %v5237_v37, %v1971_v9  ;;  %v2066_v20 = vadd.f32 %v5247_v60, %v2049_v17  ;;  %v5406_v32 = vstv %s5369_s7 }
 0x1e4   :  { %2102 = vmatpush.msra.mxu3 %v2083_v15  ;;  %2180 = vmatpush.msrb.mxu0 %v2161_v10  ;;  %v2144_v48 = vadd.f32 %v5260_v8, %v2127_v63  ;;  %v1909_v36 = vadd.f32 %v5190_v0, %v1892_v61  ;;  %v1970_v35 = vmul.f32 %v5234_v26, %v4337_v39  ;;  %v5420_v16 = vstv %s5382_s13  ;;  %v5437_v15 = vpop.permute.xlu0 %944 }
 0x1e5   :  { %2582 = vperm.xlu2 %3289, %v5281_v58   ;;  %v1926_v31 = vmax.f32 %v1910_v21, 0.0  ;;  %v2004_v33 = vmax.f32 %v1988_v38, 0.0  ;;  %v2082_v59 = vmax.f32 %v2066_v20, 0.0  ;;  %v2048_v30 = vmul.f32 %v5244_v29, %v4337_v39 }
 0x1e6   :  { %v2160_v46 = vmax.f32 %v2144_v48, 0.0  ;;  %v1925_v53 = vmax.f32 %v1909_v36, 0.0  ;;  %v1987_v40 = vadd.f32 %v5237_v37, %v1970_v35  ;;  %v2126_v28 = vmul.f32 %v5250_v4, %v4337_v39 }
 0x1e7   :  { %1947 = vmatpush.msra.mxu1 %v1926_v31  ;;  %2025 = vmatpush.msra.mxu2 %v2004_v33  ;;  %v2065_v11 = vadd.f32 %v5247_v60, %v2048_v30  ;;  %v1891_v54 = vmul.f32 %v5166_v19, %v4343_v56  ;;  %v1969_v57 = vmul.f32 %v5234_v26, %v4343_v56 }
 0x1e8   :  { %2103 = vmatpush.msra.mxu3 %v2082_v59  ;;  %2181 = vmatpush.msrb.mxu0 %v2160_v46  ;;  %v2003_v55 = vmax.f32 %v1987_v40, 0.0  ;;  %v2143_v6 = vadd.f32 %v5260_v8, %v2126_v28  ;;  %v2047_v34 = vmul.f32 %v5244_v29, %v4343_v56  ;;  %v2125_v5 = vmul.f32 %v5250_v4, %v4343_v56 }
 0x1e9   :  { %1948 = vmatpush.msra.mxu1 %v1925_v53  ;;  %v2081_v7 = vmax.f32 %v2065_v11, 0.0  ;;  %v1908_v43 = vadd.f32 %v5190_v0, %v1891_v54  ;;  %v1986_v47 = vadd.f32 %v5237_v37, %v1969_v57  ;;  %v1890_v13 = vmul.f32 %v5166_v19, %v4394_v27 }
 0x1ea   :  { %2026 = vmatpush.msra.mxu2 %v2003_v55  ;;  %v2159_v22 = vmax.f32 %v2143_v6, 0.0  ;;  %v2064_v18 = vadd.f32 %v5247_v60, %v2047_v34  ;;  %v2142_v9 = vadd.f32 %v5260_v8, %v2125_v5  ;;  %v1968_v17 = vmul.f32 %v5234_v26, %v4394_v27 }
 0x1eb   :  { %2104 = vmatpush.msra.mxu3 %v2081_v7  ;;  %v1924_v10 = vmax.f32 %v1908_v43, 0.0  ;;  %v2002_v63 = vmax.f32 %v1986_v47, 0.0  ;;  %v1907_v61 = vadd.f32 %v5190_v0, %v1890_v13  ;;  %v2046_v1 = vmul.f32 %v5244_v29, %v4394_v27 }
 0x1ec   :  { %2182 = vmatpush.msrb.mxu0 %v2159_v22  ;;  %v2080_v21 = vmax.f32 %v2064_v18, 0.0  ;;  %v2158_v38 = vmax.f32 %v2142_v9, 0.0  ;;  %v1985_v20 = vadd.f32 %v5237_v37, %v1968_v17  ;;  %v2124_v48 = vmul.f32 %v5250_v4, %v4394_v27 }
 0x1ed   :  { %1949 = vmatpush.msra.mxu1 %v1924_v10  ;;  %2027 = vmatpush.msra.mxu2 %v2002_v63  ;;  %v1923_v36 = vmax.f32 %v1907_v61, 0.0  ;;  %v2063_v35 = vadd.f32 %v5247_v60, %v2046_v1  ;;  %v1889_v31 = vmul.f32 %v5166_v19, %v4456_v62  ;;  %v1967_v33 = vmul.f32 %v5234_v26, %v4456_v62  ;;  %v5492_v61 = vpop.permute.xlu0 %1334 }
 0x1ee   :  { %2105 = vmatpush.msra.mxu3 %v2080_v21  ;;  %2183 = vmatpush.msrb.mxu0 %v2158_v38  ;;  %v2001_v59 = vmax.f32 %v1985_v20, 0.0  ;;  %v2141_v30 = vadd.f32 %v5260_v8, %v2124_v48  ;;  %v2045_v46 = vmul.f32 %v5244_v29, %v4456_v62  ;;  %v2123_v53 = vmul.f32 %v5250_v4, %v4456_v62 }
 0x1ef   :  { %1950 = vmatpush.msra.mxu1 %v1923_v36  ;;  %v2079_v40 = vmax.f32 %v2063_v35, 0.0  ;;  %v3441_v28 = vmov 26   ;;  %v1906_v11 = vadd.f32 %v5190_v0, %v1889_v31  ;;  %v1984_v54 = vadd.f32 %v5237_v37, %v1967_v33 }
 0x1f0   :  { %3291 = vset.pattern.permute.xlu2 %v3441_v28  ;;  %v1888_v57 = vmul.f32 %v5166_v19, %v4527_v23  ;;  %2028 = vmatpush.msra.mxu2 %v2001_v59  ;;  %v2157_v55 = vmax.f32 %v2141_v30, 0.0  ;;  %v2062_v6 = vadd.f32 %v5247_v60, %v2045_v46  ;;  %v2140_v34 = vadd.f32 %v5260_v8, %v2123_v53 }
 0x1f1   :  { %2738 = vperm.xlu2 %3291, %v5281_v58   ;;  %v1966_v5 = vmul.f32 %v5234_v26, %v4527_v23  ;;  %2106 = vmatpush.msra.mxu3 %v2079_v40  ;;  %v1922_v7 = vmax.f32 %v1906_v11, 0.0  ;;  %v2000_v43 = vmax.f32 %v1984_v54, 0.0  ;;  %v2044_v19 = vmul.f32 %v5244_v29, %v4527_v23 }
 0x1f2   :  { %v1905_v47 = vadd.f32 %v5190_v0, %v1888_v57  ;;  %2184 = vmatpush.msrb.mxu0 %v2157_v55  ;;  %v2078_v13 = vmax.f32 %v2062_v6, 0.0  ;;  %v2156_v22 = vmax.f32 %v2140_v34, 0.0  ;;  %v2122_v9 = vmul.f32 %v5250_v4, %v4527_v23 }
 0x1f3   :  { %v1983_v18 = vadd.f32 %v5237_v37, %v1966_v5  ;;  %1951 = vmatpush.msra.mxu1 %v1922_v7  ;;  %2029 = vmatpush.msra.mxu2 %v2000_v43  ;;  %v2061_v17 = vadd.f32 %v5247_v60, %v2044_v19  ;;  %v2215_v0 = vmul.f32 %v5406_v32, %v3828_v2  ;;  %v5484_v29 = vstv %s5435_s8 }
 0x1f4   :  { %v1921_v26 = vmax.f32 %v1905_v47, 0.0  ;;  %2107 = vmatpush.msra.mxu3 %v2078_v13  ;;  %2185 = vmatpush.msrb.mxu0 %v2156_v22  ;;  %v2139_v37 = vadd.f32 %v5260_v8, %v2122_v9  ;;  %v2293_v4 = vmul.f32 %v5484_v29, %v3828_v2  ;;  %v5490_v63 = vstv %s5442_s14 }
 0x1f5   :  { %v1999_v10 = vmax.f32 %v1983_v18, 0.0  ;;  %v2077_v60 = vmax.f32 %v2061_v17, 0.0  ;;  %v2232_v1 = vadd.f32 %v5420_v16, %v2215_v0  ;;  %v5496_v21 = vstv %s5447_s15  ;;  %s3151_s15 = sshll.u32 %s6217_s11, 4  ;;  %s3152_s15 = int_to_ptr.hbm [resolvable:$true] %s3151_s15 }
 0x1f6   :  { %1952 = vmatpush.msra.mxu1 %v1921_v26  ;;  %v5499_v38 = vstv %s5454_s16  ;;  %v2155_v20 = vmax.f32 %v2139_v37, 0.0  ;;  %v2310_v8 = vadd.f32 %v5490_v63, %v2293_v4  ;;  %v2371_v48 = vmul.f32 %v5496_v21, %v3828_v2 }
 0x1f7   :  { %2030 = vmatpush.msra.mxu2 %v1999_v10  ;;  %1953 = vmatmul.f32.vlgmr.msra.gmra.mxu1 %v4722_v49  ;;  %v5506_v36 = vstv %s5461_s17  ;;  %v2248_v35 = vmax.f32 %v2232_v1, 0.0  ;;  %v5512_v33 = vstv %s5467_s18  ;;  %v2214_v46 = vmul.f32 %v5406_v32, %v3883_v14 }
 0x1f8   :  { %2108 = vmatpush.msra.mxu3 %v2077_v60  ;;  %2031 = vmatmul.f32.vlgmr.msra.gmra.mxu2 %v4722_v49  ;;  %v2449_v31 = vmul.f32 %v5506_v36, %v3828_v2  ;;  %v2326_v59 = vmax.f32 %v2310_v8, 0.0  ;;  %v2388_v30 = vadd.f32 %v5499_v38, %v2371_v48  ;;  %v2292_v53 = vmul.f32 %v5484_v29, %v3883_v14  ;;  %v5548_v48 = vpop.permute.xlu0 %1724 }
 0x1f9   :  { %2186 = vmatpush.msrb.mxu0 %v2155_v20  ;;  %2109 = vmatmul.f32.vlgmr.msra.gmra.mxu3 %v4722_v49  ;;  %v2370_v28 = vmul.f32 %v5496_v21, %v3883_v14  ;;  %v2448_v11 = vmul.f32 %v5506_v36, %v3883_v14  ;;  %v3442_v57 = vmov 16   ;;  %v2231_v55 = vadd.f32 %v5420_v16, %v2214_v46 }
 0x1fa   :  { %2187 = vmatmul.f32.vlgmr.msrb.gmra.mxu0 %v4722_v49  ;;  %2249 = vmatpush.msrb.mxu1 %v2248_v35  ;;  %v2466_v40 = vadd.f32 %v5512_v33, %v2449_v31  ;;  %v2404_v54 = vmax.f32 %v2388_v30, 0.0  ;;  %v2309_v6 = vadd.f32 %v5490_v63, %v2292_v53  ;;  %v2213_v34 = vmul.f32 %v5406_v32, %v3910_v52 }
 0x1fb   :  { %2327 = vmatpush.msrb.mxu2 %v2326_v59  ;;  %3281 = vset.pattern.permute.xlu1 %v3442_v57  ;;  %v2387_v7 = vadd.f32 %v5499_v38, %v2370_v28  ;;  %v2465_v43 = vadd.f32 %v5512_v33, %v2448_v11  ;;  %v2291_v47 = vmul.f32 %v5484_v29, %v3910_v52  ;;  %v3443_v19 = vmov 28  }
 0x1fc   :  { %v2482_v5 = vmax.f32 %v2466_v40, 0.0  ;;  %1958 = vperm.xlu1 %3281, %v5281_v58   ;;  %3293 = vset.pattern.permute.xlu2 %v3443_v19  ;;  %v2247_v13 = vmax.f32 %v2231_v55, 0.0  ;;  %v2325_v22 = vmax.f32 %v2309_v6, 0.0  ;;  %v2230_v18 = vadd.f32 %v5420_v16, %v2213_v34 }
 0x1fd   :  { %2405 = vmatpush.msrb.mxu3 %v2404_v54  ;;  %v2369_v9 = vmul.f32 %v5496_v21, %v3910_v52  ;;  %2894 = vperm.xlu2 %3293, %v5281_v58   ;;  %v2403_v26 = vmax.f32 %v2387_v7, 0.0  ;;  %v2481_v17 = vmax.f32 %v2465_v43, 0.0  ;;  %v2308_v0 = vadd.f32 %v5490_v63, %v2291_v47 }
 0x1fe   :  { %2483 = vmatpush.msra.mxu0 %v2482_v5  ;;  %v2447_v10 = vmul.f32 %v5506_v36, %v3910_v52  ;;  %2250 = vmatpush.msrb.mxu1 %v2247_v13  ;;  %v2246_v37 = vmax.f32 %v2230_v18, 0.0  ;;  %v2212_v60 = vmul.f32 %v5406_v32, %v3939_v24  ;;  %v2290_v1 = vmul.f32 %v5484_v29, %v3939_v24 }
 0x1ff   :  { %2328 = vmatpush.msrb.mxu2 %v2325_v22  ;;  %v2386_v4 = vadd.f32 %v5499_v38, %v2369_v9  ;;  %2406 = vmatpush.msrb.mxu3 %v2403_v26  ;;  %v2324_v20 = vmax.f32 %v2308_v0, 0.0  ;;  %v2368_v35 = vmul.f32 %v5496_v21, %v3939_v24  ;;  %v2446_v31 = vmul.f32 %v5506_v36, %v3939_v24 }
 0x200   :  { %2484 = vmatpush.msra.mxu0 %v2481_v17  ;;  %v2464_v8 = vadd.f32 %v5512_v33, %v2447_v10  ;;  %2251 = vmatpush.msrb.mxu1 %v2246_v37  ;;  %v2229_v30 = vadd.f32 %v5420_v16, %v2212_v60  ;;  %v2307_v46 = vadd.f32 %v5490_v63, %v2290_v1  ;;  %v3444_v10 = vmov 19  }
 0x201   :  { %v2402_v59 = vmax.f32 %v2386_v4, 0.0  ;;  %v2211_v53 = vmul.f32 %v5406_v32, %v3977_v51  ;;  %2329 = vmatpush.msrb.mxu2 %v2324_v20  ;;  %v2385_v28 = vadd.f32 %v5499_v38, %v2368_v35  ;;  %v2463_v11 = vadd.f32 %v5512_v33, %v2446_v31 }
 0x202   :  { %v2480_v40 = vmax.f32 %v2464_v8, 0.0  ;;  %v2289_v54 = vmul.f32 %v5484_v29, %v3977_v51  ;;  %v2245_v57 = vmax.f32 %v2229_v30, 0.0  ;;  %v2323_v55 = vmax.f32 %v2307_v46, 0.0 }
 0x203   :  { %2407 = vmatpush.msrb.mxu3 %v2402_v59  ;;  %v2228_v6 = vadd.f32 %v5420_v16, %v2211_v53  ;;  %v2367_v34 = vmul.f32 %v5496_v21, %v3977_v51  ;;  %v2401_v5 = vmax.f32 %v2385_v28, 0.0  ;;  %v2479_v7 = vmax.f32 %v2463_v11, 0.0 }
 0x204   :  { %2485 = vmatpush.msra.mxu0 %v2480_v40  ;;  %v2306_v43 = vadd.f32 %v5490_v63, %v2289_v54  ;;  %v2445_v47 = vmul.f32 %v5506_v36, %v3977_v51  ;;  %2252 = vmatpush.msrb.mxu1 %v2245_v57  ;;  %v2210_v22 = vmul.f32 %v5406_v32, %v4024_v45  ;;  %v5593_v54 = vpop.permute.xlu0 %2114 }
 0x205   :  { %2330 = vmatpush.msrb.mxu2 %v2323_v55  ;;  %v2244_v19 = vmax.f32 %v2228_v6, 0.0  ;;  %v2384_v13 = vadd.f32 %v5499_v38, %v2367_v34  ;;  %2408 = vmatpush.msrb.mxu3 %v2401_v5  ;;  %v2288_v26 = vmul.f32 %v5484_v29, %v4024_v45  ;;  %v2366_v17 = vmul.f32 %v5496_v21, %v4024_v45 }
 0x206   :  { %2486 = vmatpush.msra.mxu0 %v2479_v7  ;;  %v2322_v18 = vmax.f32 %v2306_v43, 0.0  ;;  %v2462_v9 = vadd.f32 %v5512_v33, %v2445_v47  ;;  %3284 = vset.pattern.permute.xlu1 %v3444_v10  ;;  %v2227_v37 = vadd.f32 %v5420_v16, %v2210_v22  ;;  %v2444_v4 = vmul.f32 %v5506_v36, %v4024_v45 }
 0x207   :  { %2253 = vmatpush.msrb.mxu1 %v2244_v19  ;;  %v2400_v0 = vmax.f32 %v2384_v13, 0.0  ;;  %v2209_v60 = vmul.f32 %v5406_v32, %v4072_v41  ;;  %v2305_v20 = vadd.f32 %v5490_v63, %v2288_v26  ;;  %v2383_v8 = vadd.f32 %v5499_v38, %v2366_v17  ;;  %2192 = vperm.xlu1 %3284, %v5281_v58  }
 0x208   :  { %2331 = vmatpush.msrb.mxu2 %v2322_v18  ;;  %v2478_v1 = vmax.f32 %v2462_v9, 0.0  ;;  %v2287_v35 = vmul.f32 %v5484_v29, %v4072_v41  ;;  %v2243_v31 = vmax.f32 %v2227_v37, 0.0  ;;  %v2461_v59 = vadd.f32 %v5512_v33, %v2444_v4 }
 0x209   :  { %2409 = vmatpush.msrb.mxu3 %v2400_v0  ;;  %v2226_v30 = vadd.f32 %v5420_v16, %v2209_v60  ;;  %v2365_v46 = vmul.f32 %v5496_v21, %v4072_v41  ;;  %v2321_v53 = vmax.f32 %v2305_v20, 0.0  ;;  %v2399_v40 = vmax.f32 %v2383_v8, 0.0 }
 0x20a   :  { %2487 = vmatpush.msra.mxu0 %v2478_v1  ;;  %v2304_v28 = vadd.f32 %v5490_v63, %v2287_v35  ;;  %v2443_v11 = vmul.f32 %v5506_v36, %v4072_v41  ;;  %2254 = vmatpush.msrb.mxu1 %v2243_v31  ;;  %v2477_v57 = vmax.f32 %v2461_v59, 0.0  ;;  %v2208_v34 = vmul.f32 %v5406_v32, %v4119_v50 }
 0x20b   :  { %v2242_v55 = vmax.f32 %v2226_v30, 0.0  ;;  %v2382_v6 = vadd.f32 %v5499_v38, %v2365_v46  ;;  %2332 = vmatpush.msrb.mxu2 %v2321_v53  ;;  %2410 = vmatpush.msrb.mxu3 %v2399_v40  ;;  %v2286_v43 = vmul.f32 %v5484_v29, %v4119_v50  ;;  %v2364_v47 = vmul.f32 %v5496_v21, %v4119_v50 }
 0x20c   :  { %v2320_v5 = vmax.f32 %v2304_v28, 0.0  ;;  %v2460_v7 = vadd.f32 %v5512_v33, %v2443_v11  ;;  %2488 = vmatpush.msra.mxu0 %v2477_v57  ;;  %v2225_v13 = vadd.f32 %v5420_v16, %v2208_v34  ;;  %v2442_v22 = vmul.f32 %v5506_v36, %v4119_v50 }
 0x20d   :  { %2255 = vmatpush.msrb.mxu1 %v2242_v55  ;;  %v2398_v19 = vmax.f32 %v2382_v6, 0.0  ;;  %v2303_v9 = vadd.f32 %v5490_v63, %v2286_v43  ;;  %v2381_v26 = vadd.f32 %v5499_v38, %v2364_v47  ;;  %v3445_v17 = vmov 30   ;;  %v3133_v47 = vld [vmem:[%s6216_s10] sm:$0xff]  ;;  %s5677_s10 = sld [smem:[#allocation2 + $0x19]] }
 0x20e   :  { %2333 = vmatpush.msrb.mxu2 %v2320_v5  ;;  %v2476_v18 = vmax.f32 %v2460_v7, 0.0  ;;  %3295 = vset.pattern.permute.xlu2 %v3445_v17  ;;  %v2207_v0 = vmul.f32 %v5406_v32, %v4144_v12  ;;  %v2241_v10 = vmax.f32 %v2225_v13, 0.0  ;;  %v2459_v37 = vadd.f32 %v5512_v33, %v2442_v22 }
 0x20f   :  { %2411 = vmatpush.msrb.mxu3 %v2398_v19  ;;  %3050 = vperm.xlu2 %3295, %v5281_v58   ;;  %v2285_v4 = vmul.f32 %v5484_v29, %v4144_v12  ;;  %v2363_v60 = vmul.f32 %v5496_v21, %v4144_v12  ;;  %v2319_v1 = vmax.f32 %v2303_v9, 0.0  ;;  %v2397_v20 = vmax.f32 %v2381_v26, 0.0  ;;  %v3135_v19 = vpop.xlane.xlu0 %3134 }
 0x210   :  { %2489 = vmatpush.msra.mxu0 %v2476_v18  ;;  %v2224_v8 = vadd.f32 %v5420_v16, %v2207_v0  ;;  %v2441_v35 = vmul.f32 %v5506_v36, %v4144_v12  ;;  %2256 = vmatpush.msrb.mxu1 %v2241_v10  ;;  %v2475_v31 = vmax.f32 %v2459_v37, 0.0  ;;  %v2206_v30 = vmul.f32 %v5406_v32, %v4199_v44 }
 0x211   :  { %v2302_v59 = vadd.f32 %v5490_v63, %v2285_v4  ;;  %v2380_v58 = vadd.f32 %v5499_v38, %v2363_v60  ;;  %2334 = vmatpush.msrb.mxu2 %v2319_v1  ;;  %2412 = vmatpush.msrb.mxu3 %v2397_v20  ;;  %v2284_v40 = vmul.f32 %v5484_v29, %v4199_v44 }
 0x212   :  { %v2240_v46 = vmax.f32 %v2224_v8, 0.0  ;;  %v2458_v53 = vadd.f32 %v5512_v33, %v2441_v35  ;;  %v2362_v28 = vmul.f32 %v5496_v21, %v4199_v44  ;;  %2490 = vmatpush.msra.mxu0 %v2475_v31  ;;  %v2223_v55 = vadd.f32 %v5420_v16, %v2206_v30 }
 0x213   :  { %v2318_v11 = vmax.f32 %v2302_v59, 0.0  ;;  %v2396_v57 = vmax.f32 %v2380_v58, 0.0  ;;  %v2440_v6 = vmul.f32 %v5506_v36, %v4199_v44  ;;  %v2301_v5 = vadd.f32 %v5490_v63, %v2284_v40 }
 0x214   :  { %2257 = vmatpush.msrb.mxu1 %v2240_v46  ;;  %v2474_v34 = vmax.f32 %v2458_v53, 0.0  ;;  %v2379_v7 = vadd.f32 %v5499_v38, %v2362_v28  ;;  %v2205_v43 = vmul.f32 %v5406_v32, %v4265_v42  ;;  %v2239_v13 = vmax.f32 %v2223_v55, 0.0 }
 0x215   :  { %2335 = vmatpush.msrb.mxu2 %v2318_v11  ;;  %2413 = vmatpush.msrb.mxu3 %v2396_v57  ;;  %v2457_v22 = vadd.f32 %v5512_v33, %v2440_v6  ;;  %v2283_v18 = vmul.f32 %v5484_v29, %v4265_v42  ;;  %v2361_v9 = vmul.f32 %v5496_v21, %v4265_v42  ;;  %v2317_v26 = vmax.f32 %v2301_v5, 0.0 }
 0x216   :  { %2491 = vmatpush.msra.mxu0 %v2474_v34  ;;  %v2395_v17 = vmax.f32 %v2379_v7, 0.0  ;;  %v2222_v0 = vadd.f32 %v5420_v16, %v2205_v43  ;;  %v2439_v10 = vmul.f32 %v5506_v36, %v4265_v42  ;;  %2258 = vmatpush.msrb.mxu1 %v2239_v13  ;;  %v3136_v1 = vmul.f32 %v3135_v19, %v3133_v47 }
 0x217   :  { %v2473_v37 = vmax.f32 %v2457_v22, 0.0  ;;  %v2300_v4 = vadd.f32 %v5490_v63, %v2283_v18  ;;  %v2378_v60 = vadd.f32 %v5499_v38, %v2361_v9  ;;  %3297 = vset.pattern.permute.xlu2 %v3420_v3  ;;  %2336 = vmatpush.msrb.mxu2 %v2317_v26  ;;  %v2204_v35 = vmul.f32 %v5406_v32, %v4337_v39 }
 0x218   :  { %2414 = vmatpush.msrb.mxu3 %v2395_v17  ;;  %v2238_v20 = vmax.f32 %v2222_v0, 0.0  ;;  %v2456_v8 = vadd.f32 %v5512_v33, %v2439_v10  ;;  %v2282_v31 = vmul.f32 %v5484_v29, %v4337_v39  ;;  %v2360_v30 = vmul.f32 %v5496_v21, %v4337_v39  ;;  %3139 = vperm.xlu2 %3297, %v3136_v1  }
 0x219   :  { %2492 = vmatpush.msra.mxu0 %v2473_v37  ;;  %v2316_v59 = vmax.f32 %v2300_v4, 0.0  ;;  %v2394_v58 = vmax.f32 %v2378_v60, 0.0  ;;  %v2438_v3 = vmul.f32 %v5506_v36, %v4337_v39  ;;  %v2221_v53 = vadd.f32 %v5420_v16, %v2204_v35 }
 0x21a   :  { %2259 = vmatpush.msrb.mxu1 %v2238_v20  ;;  %v2472_v46 = vmax.f32 %v2456_v8, 0.0  ;;  %v2299_v40 = vadd.f32 %v5490_v63, %v2282_v31  ;;  %v2203_v28 = vmul.f32 %v5406_v32, %v4343_v56  ;;  %v2377_v11 = vadd.f32 %v5499_v38, %v2360_v30 }
 0x21b   :  { %2337 = vmatpush.msrb.mxu2 %v2316_v59  ;;  %2415 = vmatpush.msrb.mxu3 %v2394_v58  ;;  %v2455_v57 = vadd.f32 %v5512_v33, %v2438_v3  ;;  %v2281_v55 = vmul.f32 %v5484_v29, %v4343_v56  ;;  %v5669_v6 = vstv %s5631_s19  ;;  %v2237_v34 = vmax.f32 %v2221_v53, 0.0 }
 0x21c   :  { %2493 = vmatpush.msra.mxu0 %v2472_v46  ;;  %v2315_v5 = vmax.f32 %v2299_v40, 0.0  ;;  %v2220_v7 = vadd.f32 %v5420_v16, %v2203_v28  ;;  %v2359_v43 = vmul.f32 %v5496_v21, %v4343_v56  ;;  %v2393_v47 = vmax.f32 %v2377_v11, 0.0 }
 0x21d   :  { %v2471_v19 = vmax.f32 %v2455_v57, 0.0  ;;  %v2298_v13 = vadd.f32 %v5490_v63, %v2281_v55  ;;  %v2437_v22 = vmul.f32 %v5506_v36, %v4343_v56  ;;  %2260 = vmatpush.msrb.mxu1 %v2237_v34  ;;  %v2202_v26 = vmul.f32 %v5406_v32, %v4394_v27 }
 0x21e   :  { %2338 = vmatpush.msrb.mxu2 %v2315_v5  ;;  %v2236_v18 = vmax.f32 %v2220_v7, 0.0  ;;  %v2376_v9 = vadd.f32 %v5499_v38, %v2359_v43  ;;  %v2280_v17 = vmul.f32 %v5484_v29, %v4394_v27  ;;  %2416 = vmatpush.msrb.mxu3 %v2393_v47  ;;  %v2358_v37 = vmul.f32 %v5496_v21, %v4394_v27 }
 0x21f   :  { %2494 = vmatpush.msra.mxu0 %v2471_v19  ;;  %v2314_v0 = vmax.f32 %v2298_v13, 0.0  ;;  %v2454_v10 = vadd.f32 %v5512_v33, %v2437_v22  ;;  %v2436_v4 = vmul.f32 %v5506_v36, %v4394_v27  ;;  %v2219_v1 = vadd.f32 %v5420_v16, %v2202_v26 }
 0x220   :  { %2261 = vmatpush.msrb.mxu1 %v2236_v18  ;;  %v2392_v60 = vmax.f32 %v2376_v9, 0.0  ;;  %v2297_v20 = vadd.f32 %v5490_v63, %v2280_v17  ;;  %v2201_v8 = vmul.f32 %v5406_v32, %v4456_v62  ;;  %v2375_v31 = vadd.f32 %v5499_v38, %v2358_v37 }
 0x221   :  { %2339 = vmatpush.msrb.mxu2 %v2314_v0  ;;  %v2470_v35 = vmax.f32 %v2454_v10, 0.0  ;;  %v2453_v59 = vadd.f32 %v5512_v33, %v2436_v4  ;;  %v2279_v58 = vmul.f32 %v5484_v29, %v4456_v62  ;;  %v2235_v30 = vmax.f32 %v2219_v1, 0.0 }
 0x222   :  { %2417 = vmatpush.msrb.mxu3 %v2392_v60  ;;  %v2313_v3 = vmax.f32 %v2297_v20, 0.0  ;;  %v2218_v46 = vadd.f32 %v5420_v16, %v2201_v8  ;;  %v2357_v53 = vmul.f32 %v5496_v21, %v4456_v62  ;;  %v2391_v40 = vmax.f32 %v2375_v31, 0.0 }
 0x223   :  { %2495 = vmatpush.msra.mxu0 %v2470_v35  ;;  %v2469_v28 = vmax.f32 %v2453_v59, 0.0  ;;  %v2296_v11 = vadd.f32 %v5490_v63, %v2279_v58  ;;  %v2435_v57 = vmul.f32 %v5506_v36, %v4456_v62  ;;  %2262 = vmatpush.msrb.mxu1 %v2235_v30  ;;  %v2200_v5 = vmul.f32 %v5406_v32, %v4527_v23 }
 0x224   :  { %2340 = vmatpush.msrb.mxu2 %v2313_v3  ;;  %v2234_v55 = vmax.f32 %v2218_v46, 0.0  ;;  %v2374_v34 = vadd.f32 %v5499_v38, %v2357_v53  ;;  %v2278_v7 = vmul.f32 %v5484_v29, %v4527_v23  ;;  %2418 = vmatpush.msrb.mxu3 %v2391_v40  ;;  %v2356_v19 = vmul.f32 %v5496_v21, %v4527_v23 }
 0x225   :  { %2496 = vmatpush.msra.mxu0 %v2469_v28  ;;  %v2312_v43 = vmax.f32 %v2296_v11, 0.0  ;;  %v2452_v47 = vadd.f32 %v5512_v33, %v2435_v57  ;;  %v2434_v13 = vmul.f32 %v5506_v36, %v4527_v23  ;;  %v2217_v32 = vadd.f32 %v5420_v16, %v2200_v5  ;;  %v5778_v5 = vld [vmem:[%s6215_s9] sm:$0xff] }
 0x226   :  { %2263 = vmatpush.msrb.mxu1 %v2234_v55  ;;  %v2390_v22 = vmax.f32 %v2374_v34, 0.0  ;;  %v2295_v18 = vadd.f32 %v5490_v63, %v2278_v7  ;;  %v2527_v29 = vmul.f32 %v5669_v6, %v3828_v2  ;;  %v2373_v26 = vadd.f32 %v5499_v38, %v2356_v19 }
 0x227   :  { %2341 = vmatpush.msrb.mxu2 %v2312_v43  ;;  %v2468_v9 = vmax.f32 %v2452_v47, 0.0  ;;  %v2451_v21 = vadd.f32 %v5512_v33, %v2434_v13  ;;  %v5732_v17 = vstv %s5684_s22  ;;  %v2233_v36 = vmax.f32 %v2217_v32, 0.0 }
 0x228   :  { %2419 = vmatpush.msrb.mxu3 %v2390_v22  ;;  %v2311_v16 = vmax.f32 %v2295_v18, 0.0  ;;  %v2544_v63 = vadd.f32 %v5732_v17, %v2527_v29  ;;  %v5736_v0 = vstv %s5677_s10  ;;  %v2389_v10 = vmax.f32 %v2373_v26, 0.0 }
 0x229   :  { %2497 = vmatpush.msra.mxu0 %v2468_v9  ;;  %v2467_v37 = vmax.f32 %v2451_v21, 0.0  ;;  %v2605_v38 = vmul.f32 %v5736_v0, %v3828_v2  ;;  %v5741_v4 = vstv %s5691_s23  ;;  %2264 = vmatpush.msrb.mxu1 %v2233_v36  ;;  %v5744_v60 = vstv %s5697_s24 }
 0x22a   :  { %2342 = vmatpush.msrb.mxu2 %v2311_v16  ;;  %v2560_v33 = vmax.f32 %v2544_v63, 0.0  ;;  %v5747_v1 = vstv %s5703_s25  ;;  %v5750_v20 = vstv %s5708_s2  ;;  %2420 = vmatpush.msrb.mxu3 %v2389_v10  ;;  %v2683_v35 = vmul.f32 %v5744_v60, %v3828_v2 }
 0x22b   :  { %2498 = vmatpush.msra.mxu0 %v2467_v37  ;;  %v2622_v8 = vadd.f32 %v5741_v4, %v2605_v38  ;;  %v2761_v31 = vmul.f32 %v5750_v20, %v3828_v2  ;;  %v5758_v59 = vstv %s5713_s26  ;;  %2265 = vmatmul.f32.vlgmr.msrb.gmra.mxu1 %v4722_v49  ;;  %v2526_v58 = vmul.f32 %v5669_v6, %v3883_v14 }
 0x22c   :  { %2343 = vmatmul.f32.vlgmr.msrb.gmra.mxu2 %v4722_v49  ;;  %2421 = vmatmul.f32.vlgmr.msrb.gmra.mxu3 %v4722_v49  ;;  %v2700_v3 = vadd.f32 %v5747_v1, %v2683_v35  ;;  %v2604_v53 = vmul.f32 %v5736_v0, %v3883_v14  ;;  %v3446_v40 = vmov 21   ;;  %v2682_v11 = vmul.f32 %v5744_v60, %v3883_v14 }
 0x22d   :  { %2499 = vmatmul.f32.vlgmr.msra.gmra.mxu0 %v4722_v49  ;;  %v2638_v30 = vmax.f32 %v2622_v8, 0.0  ;;  %v2778_v46 = vadd.f32 %v5758_v59, %v2761_v31  ;;  %2561 = vmatpush.msra.mxu1 %v2560_v33  ;;  %v2543_v28 = vadd.f32 %v5732_v17, %v2526_v58  ;;  %v2760_v57 = vmul.f32 %v5750_v20, %v3883_v14 }
 0x22e   :  { %3286 = vset.pattern.permute.xlu1 %v3446_v40  ;;  %v2716_v55 = vmax.f32 %v2700_v3, 0.0  ;;  %v2621_v7 = vadd.f32 %v5741_v4, %v2604_v53  ;;  %v2525_v43 = vmul.f32 %v5669_v6, %v3910_v52  ;;  %v2699_v19 = vadd.f32 %v5747_v1, %v2682_v11 }
 0x22f   :  { %2639 = vmatpush.msra.mxu2 %v2638_v30  ;;  %v2794_v34 = vmax.f32 %v2778_v46, 0.0  ;;  %2348 = vperm.xlu1 %3286, %v5778_v5   ;;  %v2559_v47 = vmax.f32 %v2543_v28, 0.0  ;;  %v2777_v13 = vadd.f32 %v5758_v59, %v2760_v57  ;;  %v2603_v22 = vmul.f32 %v5736_v0, %v3910_v52 }
 0x230   :  { %2717 = vmatpush.msra.mxu3 %v2716_v55  ;;  %v2637_v32 = vmax.f32 %v2621_v7, 0.0  ;;  %v2542_v18 = vadd.f32 %v5732_v17, %v2525_v43  ;;  %v2681_v29 = vmul.f32 %v5744_v60, %v3910_v52  ;;  %v2759_v9 = vmul.f32 %v5750_v20, %v3910_v52 }
 0x231   :  { %2795 = vmatpush.msrb.mxu0 %v2794_v34  ;;  %2562 = vmatpush.msra.mxu1 %v2559_v47  ;;  %v2715_v26 = vmax.f32 %v2699_v19, 0.0  ;;  %v2793_v21 = vmax.f32 %v2777_v13, 0.0  ;;  %v2620_v36 = vadd.f32 %v5741_v4, %v2603_v22  ;;  %v2524_v16 = vmul.f32 %v5669_v6, %v3939_v24 }
 0x232   :  { %2640 = vmatpush.msra.mxu2 %v2637_v32  ;;  %v2558_v63 = vmax.f32 %v2542_v18, 0.0  ;;  %v2698_v10 = vadd.f32 %v5747_v1, %v2681_v29  ;;  %v2776_v37 = vadd.f32 %v5758_v59, %v2759_v9  ;;  %v2602_v38 = vmul.f32 %v5736_v0, %v3939_v24 }
 0x233   :  { %2718 = vmatpush.msra.mxu3 %v2715_v26  ;;  %2796 = vmatpush.msrb.mxu0 %v2793_v21  ;;  %v2636_v33 = vmax.f32 %v2620_v36, 0.0  ;;  %v2541_v8 = vadd.f32 %v5732_v17, %v2524_v16  ;;  %v2680_v35 = vmul.f32 %v5744_v60, %v3939_v24  ;;  %v2758_v31 = vmul.f32 %v5750_v20, %v3939_v24 }
 0x234   :  { %2563 = vmatpush.msra.mxu1 %v2558_v63  ;;  %v2714_v58 = vmax.f32 %v2698_v10, 0.0  ;;  %v2792_v30 = vmax.f32 %v2776_v37, 0.0  ;;  %v2619_v3 = vadd.f32 %v5741_v4, %v2602_v38  ;;  %v2523_v11 = vmul.f32 %v5669_v6, %v3977_v51 }
 0x235   :  { %2641 = vmatpush.msra.mxu2 %v2636_v33  ;;  %v2557_v46 = vmax.f32 %v2541_v8, 0.0  ;;  %v2697_v53 = vadd.f32 %v5747_v1, %v2680_v35  ;;  %v2775_v40 = vadd.f32 %v5758_v59, %v2758_v31  ;;  %v2601_v57 = vmul.f32 %v5736_v0, %v3977_v51 }
 0x236   :  { %2719 = vmatpush.msra.mxu3 %v2714_v58  ;;  %2797 = vmatpush.msrb.mxu0 %v2792_v30  ;;  %v2635_v28 = vmax.f32 %v2619_v3, 0.0  ;;  %v2679_v7 = vmul.f32 %v5744_v60, %v3977_v51  ;;  %v2757_v43 = vmul.f32 %v5750_v20, %v3977_v51  ;;  %v3447_v47 = vmov 23  }
 0x237   :  { %2564 = vmatpush.msra.mxu1 %v2557_v46  ;;  %v2713_v55 = vmax.f32 %v2697_v53, 0.0  ;;  %v2791_v34 = vmax.f32 %v2775_v40, 0.0  ;;  %3288 = vset.pattern.permute.xlu1 %v3447_v47  ;;  %v2540_v19 = vadd.f32 %v5732_v17, %v2523_v11  ;;  %v2618_v13 = vadd.f32 %v5741_v4, %v2601_v57 }
 0x238   :  { %2642 = vmatpush.msra.mxu2 %v2635_v28  ;;  %v2696_v22 = vadd.f32 %v5747_v1, %v2679_v7  ;;  %v2774_v32 = vadd.f32 %v5758_v59, %v2757_v43  ;;  %v2522_v9 = vmul.f32 %v5669_v6, %v4024_v45  ;;  %2504 = vperm.xlu1 %3288, %v5778_v5  }
 0x239   :  { %2720 = vmatpush.msra.mxu3 %v2713_v55  ;;  %2798 = vmatpush.msrb.mxu0 %v2791_v34  ;;  %v2556_v18 = vmax.f32 %v2540_v19, 0.0  ;;  %v2634_v29 = vmax.f32 %v2618_v13, 0.0  ;;  %v2600_v36 = vmul.f32 %v5736_v0, %v4024_v45  ;;  %v2678_v16 = vmul.f32 %v5744_v60, %v4024_v45 }
 0x23a   :  { %v2712_v26 = vmax.f32 %v2696_v22, 0.0  ;;  %v2790_v21 = vmax.f32 %v2774_v32, 0.0  ;;  %v2539_v63 = vadd.f32 %v5732_v17, %v2522_v9  ;;  %v2756_v10 = vmul.f32 %v5750_v20, %v4024_v45 }
 0x23b   :  { %2565 = vmatpush.msra.mxu1 %v2556_v18  ;;  %2643 = vmatpush.msra.mxu2 %v2634_v29  ;;  %v2617_v37 = vadd.f32 %v5741_v4, %v2600_v36  ;;  %v2695_v38 = vadd.f32 %v5747_v1, %v2678_v16  ;;  %v2521_v33 = vmul.f32 %v5669_v6, %v4072_v41 }
 0x23c   :  { %2721 = vmatpush.msra.mxu3 %v2712_v26  ;;  %2799 = vmatpush.msrb.mxu0 %v2790_v21  ;;  %v2555_v8 = vmax.f32 %v2539_v63, 0.0  ;;  %v2773_v35 = vadd.f32 %v5758_v59, %v2756_v10  ;;  %v2599_v31 = vmul.f32 %v5736_v0, %v4072_v41  ;;  %v2677_v58 = vmul.f32 %v5744_v60, %v4072_v41 }
 0x23d   :  { %v2633_v30 = vmax.f32 %v2617_v37, 0.0  ;;  %v2711_v3 = vmax.f32 %v2695_v38, 0.0  ;;  %v2538_v46 = vadd.f32 %v5732_v17, %v2521_v33  ;;  %v2755_v53 = vmul.f32 %v5750_v20, %v4072_v41 }
 0x23e   :  { %2566 = vmatpush.msra.mxu1 %v2555_v8  ;;  %v2789_v40 = vmax.f32 %v2773_v35, 0.0  ;;  %v2616_v28 = vadd.f32 %v5741_v4, %v2599_v31  ;;  %v2694_v11 = vadd.f32 %v5747_v1, %v2677_v58  ;;  %v2520_v57 = vmul.f32 %v5669_v6, %v4119_v50 }
 0x23f   :  { %2644 = vmatpush.msra.mxu2 %v2633_v30  ;;  %2722 = vmatpush.msra.mxu3 %v2711_v3  ;;  %v2554_v55 = vmax.f32 %v2538_v46, 0.0  ;;  %v2772_v34 = vadd.f32 %v5758_v59, %v2755_v53  ;;  %v2598_v7 = vmul.f32 %v5736_v0, %v4119_v50  ;;  %v2676_v43 = vmul.f32 %v5744_v60, %v4119_v50 }
 0x240   :  { %2800 = vmatpush.msrb.mxu0 %v2789_v40  ;;  %v2632_v47 = vmax.f32 %v2616_v28, 0.0  ;;  %v2710_v19 = vmax.f32 %v2694_v11, 0.0  ;;  %v2537_v13 = vadd.f32 %v5732_v17, %v2520_v57  ;;  %v2754_v22 = vmul.f32 %v5750_v20, %v4119_v50 }
 0x241   :  { %2567 = vmatpush.msra.mxu1 %v2554_v55  ;;  %v2788_v32 = vmax.f32 %v2772_v34, 0.0  ;;  %v2615_v18 = vadd.f32 %v5741_v4, %v2598_v7  ;;  %v2693_v29 = vadd.f32 %v5747_v1, %v2676_v43  ;;  %v2519_v21 = vmul.f32 %v5669_v6, %v4144_v12 }
 0x242   :  { %2645 = vmatpush.msra.mxu2 %v2632_v47  ;;  %2723 = vmatpush.msra.mxu3 %v2710_v19  ;;  %v2553_v9 = vmax.f32 %v2537_v13, 0.0  ;;  %v2771_v26 = vadd.f32 %v5758_v59, %v2754_v22  ;;  %v2597_v63 = vmul.f32 %v5736_v0, %v4144_v12  ;;  %v5868_v10 = vstv %s5834_s29 }
 0x243   :  { %2801 = vmatpush.msrb.mxu0 %v2788_v32  ;;  %v2631_v36 = vmax.f32 %v2615_v18, 0.0  ;;  %v2709_v16 = vmax.f32 %v2693_v29, 0.0  ;;  %v2536_v38 = vadd.f32 %v5732_v17, %v2519_v21  ;;  %v2675_v33 = vmul.f32 %v5744_v60, %v4144_v12 }
 0x244   :  { %2568 = vmatpush.msra.mxu1 %v2553_v9  ;;  %v2787_v37 = vmax.f32 %v2771_v26, 0.0  ;;  %v2753_v8 = vmul.f32 %v5750_v20, %v4144_v12  ;;  %v2614_v35 = vadd.f32 %v5741_v4, %v2597_v63  ;;  %v2518_v31 = vmul.f32 %v5669_v6, %v4199_v44 }
 0x245   :  { %2646 = vmatpush.msra.mxu2 %v2631_v36  ;;  %2724 = vmatpush.msra.mxu3 %v2709_v16  ;;  %v5879_v58 = vstv %s5846_s0  ;;  %v5882_v30 = vstv %s5841_s30  ;;  %v2552_v3 = vmax.f32 %v2536_v38, 0.0  ;;  %v2692_v46 = vadd.f32 %v5747_v1, %v2675_v33 }
 0x246   :  { %2802 = vmatpush.msrb.mxu0 %v2787_v37  ;;  %v2770_v53 = vadd.f32 %v5758_v59, %v2753_v8  ;;  %v2596_v40 = vmul.f32 %v5736_v0, %v4199_v44  ;;  %v2630_v28 = vmax.f32 %v2614_v35, 0.0  ;;  %v2535_v11 = vadd.f32 %v5732_v17, %v2518_v31 }
 0x247   :  { %v2674_v57 = vmul.f32 %v5744_v60, %v4199_v44  ;;  %v2752_v55 = vmul.f32 %v5750_v20, %v4199_v44  ;;  %2569 = vmatpush.msra.mxu1 %v2552_v3  ;;  %v2708_v34 = vmax.f32 %v2692_v46, 0.0  ;;  %v2517_v47 = vmul.f32 %v5669_v6, %v4265_v42 }
 0x248   :  { %v2786_v7 = vmax.f32 %v2770_v53, 0.0  ;;  %v2613_v43 = vadd.f32 %v5741_v4, %v2596_v40  ;;  %2647 = vmatpush.msra.mxu2 %v2630_v28  ;;  %v2551_v19 = vmax.f32 %v2535_v11, 0.0  ;;  %v2595_v32 = vmul.f32 %v5736_v0, %v4265_v42 }
 0x249   :  { %v2691_v13 = vadd.f32 %v5747_v1, %v2674_v57  ;;  %v2769_v22 = vadd.f32 %v5758_v59, %v2752_v55  ;;  %2725 = vmatpush.msra.mxu3 %v2708_v34  ;;  %v2534_v29 = vadd.f32 %v5732_v17, %v2517_v47  ;;  %v2673_v9 = vmul.f32 %v5744_v60, %v4265_v42 }
 0x24a   :  { %2803 = vmatpush.msrb.mxu0 %v2786_v7  ;;  %v2629_v18 = vmax.f32 %v2613_v43, 0.0  ;;  %v2751_v26 = vmul.f32 %v5750_v20, %v4265_v42  ;;  %2570 = vmatpush.msra.mxu1 %v2551_v19  ;;  %v2612_v16 = vadd.f32 %v5741_v4, %v2595_v32  ;;  %v2516_v63 = vmul.f32 %v5669_v6, %v4337_v39 }
 0x24b   :  { %v2707_v21 = vmax.f32 %v2691_v13, 0.0  ;;  %v2785_v36 = vmax.f32 %v2769_v22, 0.0  ;;  %v2550_v37 = vmax.f32 %v2534_v29, 0.0  ;;  %v2690_v38 = vadd.f32 %v5747_v1, %v2673_v9 }
 0x24c   :  { %2648 = vmatpush.msra.mxu2 %v2629_v18  ;;  %v2768_v33 = vadd.f32 %v5758_v59, %v2751_v26  ;;  %v2594_v8 = vmul.f32 %v5736_v0, %v4337_v39  ;;  %v2628_v35 = vmax.f32 %v2612_v16, 0.0  ;;  %v2533_v31 = vadd.f32 %v5732_v17, %v2516_v63 }
 0x24d   :  { %2726 = vmatpush.msra.mxu3 %v2707_v21  ;;  %2804 = vmatpush.msrb.mxu0 %v2785_v36  ;;  %v2672_v3 = vmul.f32 %v5744_v60, %v4337_v39  ;;  %v2750_v46 = vmul.f32 %v5750_v20, %v4337_v39  ;;  %v2706_v53 = vmax.f32 %v2690_v38, 0.0  ;;  %v2515_v11 = vmul.f32 %v5669_v6, %v4343_v56 }
 0x24e   :  { %2571 = vmatpush.msra.mxu1 %v2550_v37  ;;  %v2784_v40 = vmax.f32 %v2768_v33, 0.0  ;;  %v2611_v28 = vadd.f32 %v5741_v4, %v2594_v8  ;;  %2649 = vmatpush.msra.mxu2 %v2628_v35  ;;  %v2549_v57 = vmax.f32 %v2533_v31, 0.0  ;;  %v2593_v7 = vmul.f32 %v5736_v0, %v4343_v56 }
 0x24f   :  { %v2689_v55 = vadd.f32 %v5747_v1, %v2672_v3  ;;  %v2767_v34 = vadd.f32 %v5758_v59, %v2750_v46  ;;  %2727 = vmatpush.msra.mxu3 %v2706_v53  ;;  %v2532_v47 = vadd.f32 %v5732_v17, %v2515_v11  ;;  %v2671_v19 = vmul.f32 %v5744_v60, %v4343_v56 }
 0x250   :  { %2805 = vmatpush.msrb.mxu0 %v2784_v40  ;;  %v2627_v43 = vmax.f32 %v2611_v28, 0.0  ;;  %v2749_v13 = vmul.f32 %v5750_v20, %v4343_v56  ;;  %2572 = vmatpush.msra.mxu1 %v2549_v57  ;;  %v2610_v18 = vadd.f32 %v5741_v4, %v2593_v7  ;;  %v2514_v29 = vmul.f32 %v5669_v6, %v4394_v27 }
 0x251   :  { %v2705_v22 = vmax.f32 %v2689_v55, 0.0  ;;  %v2783_v32 = vmax.f32 %v2767_v34, 0.0  ;;  %v2548_v9 = vmax.f32 %v2532_v47, 0.0  ;;  %v2688_v26 = vadd.f32 %v5747_v1, %v2671_v19 }
 0x252   :  { %2650 = vmatpush.msra.mxu2 %v2627_v43  ;;  %v2766_v21 = vadd.f32 %v5758_v59, %v2749_v13  ;;  %v2592_v36 = vmul.f32 %v5736_v0, %v4394_v27  ;;  %v2626_v16 = vmax.f32 %v2610_v18, 0.0  ;;  %v2531_v63 = vadd.f32 %v5732_v17, %v2514_v29 }
 0x253   :  { %2728 = vmatpush.msra.mxu3 %v2705_v22  ;;  %2806 = vmatpush.msrb.mxu0 %v2783_v32  ;;  %v2670_v37 = vmul.f32 %v5744_v60, %v4394_v27  ;;  %v2748_v38 = vmul.f32 %v5750_v20, %v4394_v27  ;;  %v2704_v33 = vmax.f32 %v2688_v26, 0.0  ;;  %v2513_v31 = vmul.f32 %v5669_v6, %v4456_v62 }
 0x254   :  { %2573 = vmatpush.msra.mxu1 %v2548_v9  ;;  %v2782_v8 = vmax.f32 %v2766_v21, 0.0  ;;  %v2609_v35 = vadd.f32 %v5741_v4, %v2592_v36  ;;  %2651 = vmatpush.msra.mxu2 %v2626_v16  ;;  %v2547_v3 = vmax.f32 %v2531_v63, 0.0  ;;  %v2591_v40 = vmul.f32 %v5736_v0, %v4456_v62 }
 0x255   :  { %v2687_v46 = vadd.f32 %v5747_v1, %v2670_v37  ;;  %v2765_v53 = vadd.f32 %v5758_v59, %v2748_v38  ;;  %2729 = vmatpush.msra.mxu3 %v2704_v33  ;;  %v2530_v11 = vadd.f32 %v5732_v17, %v2513_v31  ;;  %v2669_v57 = vmul.f32 %v5744_v60, %v4456_v62 }
 0x256   :  { %2807 = vmatpush.msrb.mxu0 %v2782_v8  ;;  %v2625_v28 = vmax.f32 %v2609_v35, 0.0  ;;  %v2747_v55 = vmul.f32 %v5750_v20, %v4456_v62  ;;  %2574 = vmatpush.msra.mxu1 %v2547_v3  ;;  %v2608_v43 = vadd.f32 %v5741_v4, %v2591_v40  ;;  %v2512_v47 = vmul.f32 %v5669_v6, %v4527_v23 }
 0x257   :  { %v2703_v34 = vmax.f32 %v2687_v46, 0.0  ;;  %v2781_v7 = vmax.f32 %v2765_v53, 0.0  ;;  %v2546_v19 = vmax.f32 %v2530_v11, 0.0  ;;  %v2686_v13 = vadd.f32 %v5747_v1, %v2669_v57 }
 0x258   :  { %2652 = vmatpush.msra.mxu2 %v2625_v28  ;;  %v2764_v22 = vadd.f32 %v5758_v59, %v2747_v55  ;;  %v2590_v32 = vmul.f32 %v5736_v0, %v4527_v23  ;;  %v2624_v18 = vmax.f32 %v2608_v43, 0.0  ;;  %v2529_v29 = vadd.f32 %v5732_v17, %v2512_v47 }
 0x259   :  { %2730 = vmatpush.msra.mxu3 %v2703_v34  ;;  %2808 = vmatpush.msrb.mxu0 %v2781_v7  ;;  %v2668_v9 = vmul.f32 %v5744_v60, %v4527_v23  ;;  %v2746_v6 = vmul.f32 %v5750_v20, %v4527_v23  ;;  %v2702_v26 = vmax.f32 %v2686_v13, 0.0  ;;  %v2839_v0 = vmul.f32 %v5868_v10, %v3828_v2 }
 0x25a   :  { %2575 = vmatpush.msra.mxu1 %v2546_v19  ;;  %v2780_v21 = vmax.f32 %v2764_v22, 0.0  ;;  %v2607_v36 = vadd.f32 %v5741_v4, %v2590_v32  ;;  %2653 = vmatpush.msra.mxu2 %v2624_v18  ;;  %v2545_v16 = vmax.f32 %v2529_v29, 0.0  ;;  %v2917_v60 = vmul.f32 %v5882_v30, %v3828_v2 }
 0x25b   :  { %v2685_v17 = vadd.f32 %v5747_v1, %v2668_v9  ;;  %v2763_v63 = vadd.f32 %v5758_v59, %v2746_v6  ;;  %2731 = vmatpush.msra.mxu3 %v2702_v26  ;;  %v2856_v4 = vadd.f32 %v5879_v58, %v2839_v0  ;;  %v5984_v37 = vstv %s5936_s1 }
 0x25c   :  { %2809 = vmatpush.msrb.mxu0 %v2780_v21  ;;  %v2623_v20 = vmax.f32 %v2607_v36, 0.0  ;;  %v5987_v38 = vstv %s5943_s5  ;;  %2576 = vmatpush.msra.mxu1 %v2545_v16  ;;  %v2934_v59 = vadd.f32 %v5984_v37, %v2917_v60  ;;  %v5994_v31 = vstv %s5948_s3 }
 0x25d   :  { %v2701_v33 = vmax.f32 %v2685_v17, 0.0  ;;  %v2779_v1 = vmax.f32 %v2763_v63, 0.0  ;;  %v2995_v8 = vmul.f32 %v5987_v38, %v3828_v2  ;;  %2577 = vmatmul.f32.vlgmr.msra.gmra.mxu1 %v4722_v49  ;;  %v2872_v35 = vmax.f32 %v2856_v4, 0.0 }
 0x25e   :  { %2654 = vmatpush.msra.mxu2 %v2623_v20  ;;  %v5997_v3 = vstv %s5954_s6  ;;  %v6000_v46 = vstv %s5961_s12  ;;  %v2950_v53 = vmax.f32 %v2934_v59, 0.0  ;;  %v2838_v55 = vmul.f32 %v5868_v10, %v3883_v14 }
 0x25f   :  { %2732 = vmatpush.msra.mxu3 %v2701_v33  ;;  %2810 = vmatpush.msrb.mxu0 %v2779_v1  ;;  %v3012_v40 = vadd.f32 %v5994_v31, %v2995_v8  ;;  %v3073_v28 = vmul.f32 %v5997_v3, %v3828_v2  ;;  %v2916_v34 = vmul.f32 %v5882_v30, %v3883_v14  ;;  %v3448_v7 = vmov 25  }
 0x260   :  { %2655 = vmatmul.f32.vlgmr.msra.gmra.mxu2 %v4722_v49  ;;  %2733 = vmatmul.f32.vlgmr.msra.gmra.mxu3 %v4722_v49  ;;  %v2994_v2 = vmul.f32 %v5987_v38, %v3883_v14  ;;  %v3072_v43 = vmul.f32 %v5997_v3, %v3883_v14  ;;  %v2855_v19 = vadd.f32 %v5879_v58, %v2838_v55 }
 0x261   :  { %2811 = vmatmul.f32.vlgmr.msrb.gmra.mxu0 %v4722_v49  ;;  %2873 = vmatpush.msrb.mxu1 %v2872_v35  ;;  %v3028_v11 = vmax.f32 %v3012_v40, 0.0  ;;  %v3090_v57 = vadd.f32 %v6000_v46, %v3073_v28  ;;  %v2933_v13 = vadd.f32 %v5984_v37, %v2916_v34  ;;  %v2837_v22 = vmul.f32 %v5868_v10, %v3910_v52 }
 0x262   :  { %2951 = vmatpush.msrb.mxu2 %v2950_v53  ;;  %3290 = vset.pattern.permute.xlu1 %v3448_v7  ;;  %v3011_v32 = vadd.f32 %v5994_v31, %v2994_v2  ;;  %v3089_v18 = vadd.f32 %v6000_v46, %v3072_v43  ;;  %v2915_v29 = vmul.f32 %v5882_v30, %v3910_v52  ;;  %v2871_v9 = vmax.f32 %v2855_v19, 0.0 }
 0x263   :  { %3029 = vmatpush.msrb.mxu3 %v3028_v11  ;;  %v3106_v47 = vmax.f32 %v3090_v57, 0.0  ;;  %2660 = vperm.xlu1 %3290, %v5778_v5   ;;  %v2993_v14 = vmul.f32 %v5987_v38, %v3910_v52  ;;  %v2949_v6 = vmax.f32 %v2933_v13, 0.0  ;;  %v2854_v26 = vadd.f32 %v5879_v58, %v2837_v22 }
 0x264   :  { %v3071_v21 = vmul.f32 %v5997_v3, %v3910_v52  ;;  %v3027_v36 = vmax.f32 %v3011_v32, 0.0  ;;  %v3105_v0 = vmax.f32 %v3089_v18, 0.0  ;;  %v2932_v16 = vadd.f32 %v5984_v37, %v2915_v29  ;;  %2874 = vmatpush.msrb.mxu1 %v2871_v9 }
 0x265   :  { %3107 = vmatpush.msra.mxu0 %v3106_v47  ;;  %v3010_v17 = vadd.f32 %v5994_v31, %v2993_v14  ;;  %2952 = vmatpush.msrb.mxu2 %v2949_v6  ;;  %v2870_v63 = vmax.f32 %v2854_v26, 0.0  ;;  %v2836_v20 = vmul.f32 %v5868_v10, %v3939_v24  ;;  %v2914_v4 = vmul.f32 %v5882_v30, %v3939_v24 }
 0x266   :  { %v3088_v60 = vadd.f32 %v6000_v46, %v3071_v21  ;;  %3030 = vmatpush.msrb.mxu3 %v3027_v36  ;;  %v2948_v52 = vmax.f32 %v2932_v16, 0.0  ;;  %v2992_v1 = vmul.f32 %v5987_v38, %v3939_v24  ;;  %v3070_v59 = vmul.f32 %v5997_v3, %v3939_v24 }
 0x267   :  { %3108 = vmatpush.msra.mxu0 %v3105_v0  ;;  %v3026_v33 = vmax.f32 %v3010_v17, 0.0  ;;  %2875 = vmatpush.msrb.mxu1 %v2870_v63  ;;  %v2853_v35 = vadd.f32 %v5879_v58, %v2836_v20  ;;  %v2931_v53 = vadd.f32 %v5984_v37, %v2914_v4  ;;  %v2835_v55 = vmul.f32 %v5868_v10, %v3977_v51 }
 0x268   :  { %v3104_v8 = vmax.f32 %v3088_v60, 0.0  ;;  %2953 = vmatpush.msrb.mxu2 %v2948_v52  ;;  %v3009_v40 = vadd.f32 %v5994_v31, %v2992_v1  ;;  %v3087_v28 = vadd.f32 %v6000_v46, %v3070_v59  ;;  %v3449_v34 = vmov 27  }
 0x269   :  { %3031 = vmatpush.msrb.mxu3 %v3026_v33  ;;  %v2869_v11 = vmax.f32 %v2853_v35, 0.0  ;;  %v2947_v57 = vmax.f32 %v2931_v53, 0.0  ;;  %v2913_v2 = vmul.f32 %v5882_v30, %v3977_v51  ;;  %v2991_v43 = vmul.f32 %v5987_v38, %v3977_v51 }
 0x26a   :  { %3109 = vmatpush.msra.mxu0 %v3104_v8  ;;  %v3025_v24 = vmax.f32 %v3009_v40, 0.0  ;;  %v3103_v7 = vmax.f32 %v3087_v28, 0.0  ;;  %v2852_v47 = vadd.f32 %v5879_v58, %v2835_v55  ;;  %v3069_v19 = vmul.f32 %v5997_v3, %v3977_v51 }
 0x26b   :  { %3292 = vset.pattern.permute.xlu1 %v3449_v34  ;;  %2876 = vmatpush.msrb.mxu1 %v2869_v11  ;;  %v2930_v13 = vadd.f32 %v5984_v37, %v2913_v2  ;;  %v3008_v22 = vadd.f32 %v5994_v31, %v2991_v43  ;;  %v2834_v32 = vmul.f32 %v5868_v10, %v4024_v45 }
 0x26c   :  { %2816 = vperm.xlu1 %3292, %v5778_v5   ;;  %2954 = vmatpush.msrb.mxu2 %v2947_v57  ;;  %v2868_v18 = vmax.f32 %v2852_v47, 0.0  ;;  %v3086_v29 = vadd.f32 %v6000_v46, %v3069_v19  ;;  %v2912_v5 = vmul.f32 %v5882_v30, %v4024_v45  ;;  %v2990_v14 = vmul.f32 %v5987_v38, %v4024_v45 }
 0x26d   :  { %3032 = vmatpush.msrb.mxu3 %v3025_v24  ;;  %3110 = vmatpush.msra.mxu0 %v3103_v7  ;;  %v2946_v9 = vmax.f32 %v2930_v13, 0.0  ;;  %v3024_v51 = vmax.f32 %v3008_v22, 0.0  ;;  %v2851_v6 = vadd.f32 %v5879_v58, %v2834_v32  ;;  %v3068_v26 = vmul.f32 %v5997_v3, %v4024_v45 }
 0x26e   :  { %2877 = vmatpush.msrb.mxu1 %v2868_v18  ;;  %v3102_v21 = vmax.f32 %v3086_v29, 0.0  ;;  %v2929_v36 = vadd.f32 %v5984_v37, %v2912_v5  ;;  %v3007_v0 = vadd.f32 %v5994_v31, %v2990_v14  ;;  %v2833_v16 = vmul.f32 %v5868_v10, %v4072_v41 }
 0x26f   :  { %2955 = vmatpush.msrb.mxu2 %v2946_v9  ;;  %3033 = vmatpush.msrb.mxu3 %v3024_v51  ;;  %v2867_v17 = vmax.f32 %v2851_v6, 0.0  ;;  %v3085_v63 = vadd.f32 %v6000_v46, %v3068_v26  ;;  %v2911_v60 = vmul.f32 %v5882_v30, %v4072_v41  ;;  %v2989_v45 = vmul.f32 %v5987_v38, %v4072_v41 }
 0x270   :  { %3111 = vmatpush.msra.mxu0 %v3102_v21  ;;  %v2945_v20 = vmax.f32 %v2929_v36, 0.0  ;;  %v3023_v4 = vmax.f32 %v3007_v0, 0.0  ;;  %v2850_v52 = vadd.f32 %v5879_v58, %v2833_v16  ;;  %v3067_v33 = vmul.f32 %v5997_v3, %v4072_v41 }
 0x271   :  { %2878 = vmatpush.msrb.mxu1 %v2867_v17  ;;  %v3101_v1 = vmax.f32 %v3085_v63, 0.0  ;;  %v2928_v59 = vadd.f32 %v5984_v37, %v2911_v60  ;;  %v3006_v8 = vadd.f32 %v5994_v31, %v2989_v45  ;;  %v2832_v35 = vmul.f32 %v5868_v10, %v4119_v50 }
 0x272   :  { %2956 = vmatpush.msrb.mxu2 %v2945_v20  ;;  %3034 = vmatpush.msrb.mxu3 %v3023_v4  ;;  %v2866_v53 = vmax.f32 %v2850_v52, 0.0  ;;  %v3084_v40 = vadd.f32 %v6000_v46, %v3067_v33  ;;  %v2910_v28 = vmul.f32 %v5882_v30, %v4119_v50  ;;  %v2988_v41 = vmul.f32 %v5987_v38, %v4119_v50 }
 0x273   :  { %3112 = vmatpush.msra.mxu0 %v3101_v1  ;;  %v2944_v11 = vmax.f32 %v2928_v59, 0.0  ;;  %v3022_v57 = vmax.f32 %v3006_v8, 0.0  ;;  %v2849_v55 = vadd.f32 %v5879_v58, %v2832_v35  ;;  %v3066_v34 = vmul.f32 %v5997_v3, %v4119_v50 }
 0x274   :  { %2879 = vmatpush.msrb.mxu1 %v2866_v53  ;;  %v3100_v24 = vmax.f32 %v3084_v40, 0.0  ;;  %v2927_v7 = vadd.f32 %v5984_v37, %v2910_v28  ;;  %v3005_v2 = vadd.f32 %v5994_v31, %v2988_v41  ;;  %v2831_v43 = vmul.f32 %v5868_v10, %v4144_v12 }
 0x275   :  { %2957 = vmatpush.msrb.mxu2 %v2944_v11  ;;  %3035 = vmatpush.msrb.mxu3 %v3022_v57  ;;  %v2865_v47 = vmax.f32 %v2849_v55, 0.0  ;;  %v3083_v19 = vadd.f32 %v6000_v46, %v3066_v34  ;;  %v2909_v13 = vmul.f32 %v5882_v30, %v4144_v12  ;;  %v2987_v50 = vmul.f32 %v5987_v38, %v4144_v12 }
 0x276   :  { %3113 = vmatpush.msra.mxu0 %v3100_v24  ;;  %v2943_v22 = vmax.f32 %v2927_v7, 0.0  ;;  %v3021_v32 = vmax.f32 %v3005_v2, 0.0  ;;  %v2848_v18 = vadd.f32 %v5879_v58, %v2831_v43  ;;  %v3065_v29 = vmul.f32 %v5997_v3, %v4144_v12 }
 0x277   :  { %2880 = vmatpush.msrb.mxu1 %v2865_v47  ;;  %v3099_v5 = vmax.f32 %v3083_v19, 0.0  ;;  %v2926_v14 = vadd.f32 %v5984_v37, %v2909_v13  ;;  %v3004_v9 = vadd.f32 %v5994_v31, %v2987_v50  ;;  %v2830_v51 = vmul.f32 %v5868_v10, %v4199_v44 }
 0x278   :  { %2958 = vmatpush.msrb.mxu2 %v2943_v22  ;;  %3036 = vmatpush.msrb.mxu3 %v3021_v32  ;;  %v2864_v6 = vmax.f32 %v2848_v18, 0.0  ;;  %v3082_v26 = vadd.f32 %v6000_v46, %v3065_v29  ;;  %v2908_v21 = vmul.f32 %v5882_v30, %v4199_v44  ;;  %v2986_v12 = vmul.f32 %v5987_v38, %v4199_v44 }
 0x279   :  { %3114 = vmatpush.msra.mxu0 %v3099_v5  ;;  %v2942_v36 = vmax.f32 %v2926_v14, 0.0  ;;  %v3020_v0 = vmax.f32 %v3004_v9, 0.0  ;;  %v2847_v16 = vadd.f32 %v5879_v58, %v2830_v51  ;;  %v3064_v17 = vmul.f32 %v5997_v3, %v4199_v44 }
 0x27a   :  { %2881 = vmatpush.msrb.mxu1 %v2864_v6  ;;  %v3098_v63 = vmax.f32 %v3082_v26, 0.0  ;;  %v2925_v60 = vadd.f32 %v5984_v37, %v2908_v21  ;;  %v3003_v45 = vadd.f32 %v5994_v31, %v2986_v12  ;;  %v2829_v20 = vmul.f32 %v5868_v10, %v4265_v42 }
 0x27b   :  { %2959 = vmatpush.msrb.mxu2 %v2942_v36  ;;  %3037 = vmatpush.msrb.mxu3 %v3020_v0  ;;  %v2863_v4 = vmax.f32 %v2847_v16, 0.0  ;;  %v3081_v52 = vadd.f32 %v6000_v46, %v3064_v17  ;;  %v2907_v33 = vmul.f32 %v5882_v30, %v4265_v42  ;;  %v2985_v44 = vmul.f32 %v5987_v38, %v4265_v42 }
 0x27c   :  { %3115 = vmatpush.msra.mxu0 %v3098_v63  ;;  %v2941_v1 = vmax.f32 %v2925_v60, 0.0  ;;  %v3019_v59 = vmax.f32 %v3003_v45, 0.0  ;;  %v2846_v8 = vadd.f32 %v5879_v58, %v2829_v20  ;;  %v3063_v35 = vmul.f32 %v5997_v3, %v4265_v42 }
 0x27d   :  { %2882 = vmatpush.msrb.mxu1 %v2863_v4  ;;  %v3097_v53 = vmax.f32 %v3081_v52, 0.0  ;;  %v2924_v40 = vadd.f32 %v5984_v37, %v2907_v33  ;;  %v3002_v28 = vadd.f32 %v5994_v31, %v2985_v44  ;;  %v2828_v41 = vmul.f32 %v5868_v10, %v4337_v39 }
 0x27e   :  { %2960 = vmatpush.msrb.mxu2 %v2941_v1  ;;  %3038 = vmatpush.msrb.mxu3 %v3019_v59  ;;  %v2862_v11 = vmax.f32 %v2846_v8, 0.0  ;;  %v3080_v57 = vadd.f32 %v6000_v46, %v3063_v35  ;;  %v2906_v55 = vmul.f32 %v5882_v30, %v4337_v39  ;;  %v2984_v42 = vmul.f32 %v5987_v38, %v4337_v39 }
 0x27f   :  { %3116 = vmatpush.msra.mxu0 %v3097_v53  ;;  %v2940_v34 = vmax.f32 %v2924_v40, 0.0  ;;  %v3018_v24 = vmax.f32 %v3002_v28, 0.0  ;;  %v2845_v7 = vadd.f32 %v5879_v58, %v2828_v41  ;;  %v3062_v2 = vmul.f32 %v5997_v3, %v4337_v39 }
 0x280   :  { %2883 = vmatpush.msrb.mxu1 %v2862_v11  ;;  %v3096_v43 = vmax.f32 %v3080_v57, 0.0  ;;  %v2923_v47 = vadd.f32 %v5984_v37, %v2906_v55  ;;  %v3001_v19 = vadd.f32 %v5994_v31, %v2984_v42  ;;  %v2827_v13 = vmul.f32 %v5868_v10, %v4343_v56 }
 0x281   :  { %2961 = vmatpush.msrb.mxu2 %v2940_v34  ;;  %3039 = vmatpush.msrb.mxu3 %v3018_v24  ;;  %v2861_v50 = vmax.f32 %v2845_v7, 0.0  ;;  %v3079_v22 = vadd.f32 %v6000_v46, %v3062_v2  ;;  %v2905_v32 = vmul.f32 %v5882_v30, %v4343_v56  ;;  %v2983_v39 = vmul.f32 %v5987_v38, %v4343_v56 }
 0x282   :  { %3117 = vmatpush.msra.mxu0 %v3096_v43  ;;  %v2939_v18 = vmax.f32 %v2923_v47, 0.0  ;;  %v3017_v29 = vmax.f32 %v3001_v19, 0.0  ;;  %v2844_v5 = vadd.f32 %v5879_v58, %v2827_v13  ;;  %v3061_v14 = vmul.f32 %v5997_v3, %v4343_v56 }
 0x283   :  { %2884 = vmatpush.msrb.mxu1 %v2861_v50  ;;  %v3095_v9 = vmax.f32 %v3079_v22, 0.0  ;;  %v2922_v51 = vadd.f32 %v5984_v37, %v2905_v32  ;;  %v3000_v6 = vadd.f32 %v5994_v31, %v2983_v39  ;;  %v2826_v26 = vmul.f32 %v5868_v10, %v4394_v27 }
 0x284   :  { %2962 = vmatpush.msrb.mxu2 %v2939_v18  ;;  %3040 = vmatpush.msrb.mxu3 %v3017_v29  ;;  %v2860_v21 = vmax.f32 %v2844_v5, 0.0  ;;  %v3078_v12 = vadd.f32 %v6000_v46, %v3061_v14  ;;  %v2904_v36 = vmul.f32 %v5882_v30, %v4394_v27  ;;  %v2982_v56 = vmul.f32 %v5987_v38, %v4394_v27  ;;  %v784_v18 = vpop.f32.mrf.mxu2  ;;  %v705_v29 = vpop.f32.mrf.mxu1 }
 0x285   :  { %3118 = vmatpush.msra.mxu0 %v3095_v9  ;;  %v2938_v0 = vmax.f32 %v2922_v51, 0.0  ;;  %v3016_v16 = vmax.f32 %v3000_v6, 0.0  ;;  %v2843_v17 = vadd.f32 %v5879_v58, %v2826_v26  ;;  %v3060_v63 = vmul.f32 %v5997_v3, %v4394_v27  ;;  %v862_v51 = vpop.f32.mrf.mxu3 }
 0x286   :  { %2885 = vmatpush.msrb.mxu1 %v2860_v21  ;;  %v3094_v60 = vmax.f32 %v3078_v12, 0.0  ;;  %v2921_v45 = vadd.f32 %v5984_v37, %v2904_v36  ;;  %v2999_v20 = vadd.f32 %v5994_v31, %v2982_v56  ;;  %v2825_v4 = vmul.f32 %v5868_v10, %v4456_v62  ;;  %v940_v21 = vpop.f32.mrf.mxu0 }
 0x287   :  { %2963 = vmatpush.msrb.mxu2 %v2938_v0  ;;  %3041 = vmatpush.msrb.mxu3 %v3016_v16  ;;  %v2859_v52 = vmax.f32 %v2843_v17, 0.0  ;;  %v3077_v33 = vadd.f32 %v6000_v46, %v3060_v63  ;;  %v2903_v44 = vmul.f32 %v5882_v30, %v4456_v62  ;;  %v2981_v27 = vmul.f32 %v5987_v38, %v4456_v62 }
 0x288   :  { %3119 = vmatpush.msra.mxu0 %v3094_v60  ;;  %v2937_v1 = vmax.f32 %v2921_v45, 0.0  ;;  %v3015_v59 = vmax.f32 %v2999_v20, 0.0  ;;  %v2842_v8 = vadd.f32 %v5879_v58, %v2825_v4  ;;  %v3059_v35 = vmul.f32 %v5997_v3, %v4456_v62 }
 0x289   :  { %2886 = vmatpush.msrb.mxu1 %v2859_v52  ;;  %v3093_v53 = vmax.f32 %v3077_v33, 0.0  ;;  %v2920_v40 = vadd.f32 %v5984_v37, %v2903_v44  ;;  %v2998_v28 = vadd.f32 %v5994_v31, %v2981_v27  ;;  %v2824_v41 = vmul.f32 %v5868_v10, %v4527_v23 }
 0x28a   :  { %2964 = vmatpush.msrb.mxu2 %v2937_v1  ;;  %3042 = vmatpush.msrb.mxu3 %v3015_v59  ;;  %v2858_v11 = vmax.f32 %v2842_v8, 0.0  ;;  %v3076_v57 = vadd.f32 %v6000_v46, %v3059_v35  ;;  %v2902_v55 = vmul.f32 %v5882_v30, %v4527_v23  ;;  %v2980_v62 = vmul.f32 %v5987_v38, %v4527_v23 }
 0x28b   :  { %3120 = vmatpush.msra.mxu0 %v3093_v53  ;;  %v2936_v42 = vmax.f32 %v2920_v40, 0.0  ;;  %v3014_v34 = vmax.f32 %v2998_v28, 0.0  ;;  %v2841_v24 = vadd.f32 %v5879_v58, %v2824_v41  ;;  %v3058_v7 = vmul.f32 %v5997_v3, %v4527_v23  ;;  %v3334_v23 = vld [vmem:[%s6215_s9] sm:$0xff]  ;;  %v789_v3 = vpop.permute.xlu1 %788  ;;  %s3452_s9 = smov [#allocation9]  }
 0x28c   :  { %2887 = vmatpush.msrb.mxu1 %v2858_v11  ;;  %v3092_v10 = vmax.f32 %v3076_v57, 0.0  ;;  %v2919_v2 = vadd.f32 %v5984_v37, %v2902_v55  ;;  %v2997_v43 = vadd.f32 %v5994_v31, %v2980_v62  ;;  %v3450_v13 = vmov 29   ;;  %v867_v31 = vpop.permute.xlu2 %866  ;;  %v1018_v56 = vpop.f32.mrf.mxu1  ;;  %s3149_s13 = sshll.u32 %s3452_s9, 4  ;;  %s3150_s13 = int_to_ptr.vmem [resolvable:$true] %s3149_s13 }
 0x28d   :  { %2965 = vmatpush.msrb.mxu2 %v2936_v42  ;;  %3043 = vmatpush.msrb.mxu3 %v3014_v34  ;;  %v2857_v30 = vmax.f32 %v2841_v24, 0.0  ;;  %v3075_v47 = vadd.f32 %v6000_v46, %v3058_v7  ;;  %v3451_v37 = vmov 31   ;;  %v791_v5 = vmul.f32 %v789_v3, %v784_v18  ;;  %v1096_v17 = vpop.f32.mrf.mxu2  ;;  %v1174_v4 = vpop.f32.mrf.mxu3 }
 0x28e   :  { %3121 = vmatpush.msra.mxu0 %v3092_v10  ;;  %v2935_v38 = vmax.f32 %v2919_v2, 0.0  ;;  %v3013_v19 = vmax.f32 %v2997_v43, 0.0  ;;  %3294 = vset.pattern.permute.xlu1 %v3450_v13  ;;  %v713_v9 = vmul.f32 %v5396_v25, %v705_v29  ;;  %v869_v26 = vmul.f32 %v867_v31, %v862_v51  ;;  %v1252_v44 = vpop.f32.mrf.mxu0 }
 0x28f   :  { %2888 = vmatpush.msrb.mxu1 %v2857_v30  ;;  %v3091_v58 = vmax.f32 %v3075_v47, 0.0  ;;  %2972 = vperm.xlu1 %3294, %v3334_v23   ;;  %v947_v36 = vmul.f32 %v5437_v15, %v940_v21 }
 0x290   :  { %2966 = vmatpush.msrb.mxu2 %v2935_v38  ;;  %3044 = vmatpush.msrb.mxu3 %v3013_v19  ;;  %v792_v6 = vadd.f32 %v791_v5, %v713_v9 }
 0x291   :  { %3122 = vmatpush.msra.mxu0 %v3091_v58  ;;  %2889 = vmatmul.f32.vlgmr.msrb.gmra.mxu1 %v4722_v49 }
 0x292   :  { %2967 = vmatmul.f32.vlgmr.msrb.gmra.mxu2 %v4722_v49  ;;  %3045 = vmatmul.f32.vlgmr.msrb.gmra.mxu3 %v4722_v49  ;;  %v870_v12 = vadd.f32 %v869_v26, %v792_v6 }
 0x293   :  { %3123 = vmatmul.f32.vlgmr.msra.gmra.mxu0 %v4722_v49  ;;  %v1023_v50 = vpop.permute.xlu1 %1022 }
 0x294   :  { %v1101_v46 = vpop.permute.xlu2 %1100  ;;  %v948_v16 = vadd.f32 %v947_v36, %v870_v12  ;;  %v1025_v63 = vmul.f32 %v1023_v50, %v1018_v56  ;;  %v1330_v27 = vpop.f32.mrf.mxu1 }
 0x295   :  { %v1103_v45 = vmul.f32 %v1101_v46, %v1096_v17  ;;  %v1408_v59 = vpop.f32.mrf.mxu2  ;;  %v1337_v15 = vmul.f32 %v5492_v61, %v1330_v27  ;;  %v1486_v11 = vpop.f32.mrf.mxu3 }
 0x296   :  { %v1026_v60 = vadd.f32 %v1025_v63, %v948_v16  ;;  %v1564_v62 = vpop.f32.mrf.mxu0 }
 0x297   :  { %3296 = vset.pattern.permute.xlu1 %v3451_v37 }
 0x298   :  { %3128 = vperm.xlu1 %3296, %v3334_v23   ;;  %v1104_v33 = vadd.f32 %v1103_v45, %v1026_v60 }
 0x29b   :  { %v1179_v32 = vpop.permute.xlu1 %1178 }
 0x29c   :  { %v1257_v22 = vpop.permute.xlu2 %1256  ;;  %v1181_v25 = vmul.f32 %v1179_v32, %v1174_v4  ;;  %v1642_v42 = vpop.f32.mrf.mxu1 }
 0x29d   :  { %v1259_v8 = vmul.f32 %v1257_v22, %v1252_v44  ;;  %v1720_v7 = vpop.f32.mrf.mxu2  ;;  %v1798_v61 = vpop.f32.mrf.mxu3 }
 0x29e   :  { %v1182_v1 = vadd.f32 %v1181_v25, %v1104_v33  ;;  %v1727_v47 = vmul.f32 %v5548_v48, %v1720_v7  ;;  %v1876_v37 = vpop.f32.mrf.mxu0 }
 0x2a0   :  { %v1260_v40 = vadd.f32 %v1259_v8, %v1182_v1 }
 0x2a2   :  { %v1338_v41 = vadd.f32 %v1337_v15, %v1260_v40 }
 0x2a3   :  { %v1413_v14 = vpop.permute.xlu1 %1412 }
 0x2a4   :  { %v1491_v39 = vpop.permute.xlu2 %1490  ;;  %v1415_v28 = vmul.f32 %v1413_v14, %v1408_v59  ;;  %v1954_v31 = vpop.f32.mrf.mxu1 }
 0x2a5   :  { %v1493_v55 = vmul.f32 %v1491_v39, %v1486_v11  ;;  %v2032_v46 = vpop.f32.mrf.mxu2  ;;  %v2110_v29 = vpop.f32.mrf.mxu3 }
 0x2a6   :  { %v1416_v57 = vadd.f32 %v1415_v28, %v1338_v41  ;;  %v2117_v48 = vmul.f32 %v5593_v54, %v2110_v29  ;;  %v2188_v51 = vpop.f32.mrf.mxu0 }
 0x2a8   :  { %v1494_v24 = vadd.f32 %v1493_v55, %v1416_v57 }
 0x2ab   :  { %v1569_v0 = vpop.permute.xlu1 %1568 }
 0x2ac   :  { %v1647_v49 = vpop.permute.xlu2 %1646  ;;  %v1571_v2 = vmul.f32 %v1569_v0, %v1564_v62  ;;  %v2266_v6 = vpop.f32.mrf.mxu1 }
 0x2ad   :  { %v1649_v43 = vmul.f32 %v1647_v49, %v1642_v42 }
 0x2ae   :  { %v1572_v30 = vadd.f32 %v1571_v2, %v1494_v24 }
 0x2af   :  { %v2344_v49 = vpop.f32.mrf.mxu2  ;;  %v2422_v63 = vpop.f32.mrf.mxu3 }
 0x2b0   :  { %v1650_v38 = vadd.f32 %v1649_v43, %v1572_v30 }
 0x2b2   :  { %v1728_v19 = vadd.f32 %v1727_v47, %v1650_v38 }
 0x2b3   :  { %v1803_v52 = vpop.permute.xlu1 %1802 }
 0x2b4   :  { %v1881_v20 = vpop.permute.xlu2 %1880  ;;  %v1805_v23 = vmul.f32 %v1803_v52, %v1798_v61 }
 0x2b5   :  { %v1883_v50 = vmul.f32 %v1881_v20, %v1876_v37  ;;  %v2500_v20 = vpop.f32.mrf.mxu0 }
 0x2b6   :  { %v1806_v3 = vadd.f32 %v1805_v23, %v1728_v19 }
 0x2b8   :  { %v1884_v32 = vadd.f32 %v1883_v50, %v1806_v3 }
 0x2bb   :  { %v1959_v53 = vpop.permute.xlu1 %1958 }
 0x2bc   :  { %v2037_v35 = vpop.permute.xlu2 %2036  ;;  %v1961_v22 = vmul.f32 %v1959_v53, %v1954_v31 }
 0x2bd   :  { %v2039_v39 = vmul.f32 %v2037_v35, %v2032_v46 }
 0x2be   :  { %v1962_v18 = vadd.f32 %v1961_v22, %v1884_v32 }
 0x2c0   :  { %v2040_v14 = vadd.f32 %v2039_v39, %v1962_v18 }
 0x2c2   :  { %v2118_v26 = vadd.f32 %v2117_v48, %v2040_v14 }
 0x2c3   :  { %v2193_v10 = vpop.permute.xlu1 %2192 }
 0x2c4   :  { %v2271_v34 = vpop.permute.xlu2 %2270  ;;  %v2195_v21 = vmul.f32 %v2193_v10, %v2188_v51 }
 0x2c5   :  { %v2273_v12 = vmul.f32 %v2271_v34, %v2266_v6 }
 0x2c6   :  { %v2196_v56 = vadd.f32 %v2195_v21, %v2118_v26 }
 0x2c8   :  { %v2274_v16 = vadd.f32 %v2273_v12, %v2196_v56 }
 0x2cb   :  { %v2349_v13 = vpop.permute.xlu1 %2348 }
 0x2cc   :  { %v2427_v58 = vpop.permute.xlu2 %2426  ;;  %v2351_v0 = vmul.f32 %v2349_v13, %v2344_v49 }
 0x2cd   :  { %v2429_v45 = vmul.f32 %v2427_v58, %v2422_v63 }
 0x2ce   :  { %v2352_v60 = vadd.f32 %v2351_v0, %v2274_v16 }
 0x2d0   :  { %v2430_v52 = vadd.f32 %v2429_v45, %v2352_v60 }
 0x2d3   :  { %v2505_v5 = vpop.permute.xlu1 %2504 }
 0x2d4   :  { %v2583_v9 = vpop.permute.xlu2 %2582  ;;  %v2507_v54 = vmul.f32 %v2505_v5, %v2500_v20 }
 0x2d6   :  { %v2508_v27 = vadd.f32 %v2507_v54, %v2430_v52 }
 0x2da   :  { %v2578_v4 = vpop.f32.mrf.mxu1 }
 0x2db   :  { %v2661_v36 = vpop.permute.xlu1 %2660  ;;  %v2585_v44 = vmul.f32 %v2583_v9, %v2578_v4 }
 0x2dc   :  { %v2739_v17 = vpop.permute.xlu2 %2738 }
 0x2dd   :  { %v2586_v8 = vadd.f32 %v2585_v44, %v2508_v27 }
 0x2de   :  { %v2812_v28 = vpop.f32.mrf.mxu0 }
 0x2e3   :  { %v2817_v33 = vpop.permute.xlu1 %2816  ;;  %v2656_v25 = vpop.f32.mrf.mxu2 }
 0x2e4   :  { %v2663_v1 = vmul.f32 %v2661_v36, %v2656_v25  ;;  %v2895_v59 = vpop.permute.xlu2 %2894  ;;  %v2734_v35 = vpop.f32.mrf.mxu3  ;;  %v2819_v57 = vmul.f32 %v2817_v33, %v2812_v28 }
 0x2e5   :  { %v2741_v40 = vmul.f32 %v2739_v17, %v2734_v35 }
 0x2e6   :  { %v2664_v15 = vadd.f32 %v2663_v1, %v2586_v8 }
 0x2e8   :  { %v2742_v11 = vadd.f32 %v2741_v40, %v2664_v15 }
 0x2ea   :  { %v2820_v42 = vadd.f32 %v2819_v57, %v2742_v11 }
 0x2ec   :  { %v3051_v62 = vpop.permute.xlu2 %3050 }
 0x2f4   :  { %v3140_v13 = vpop.permute.xlu2 %3139 }
 0x301   :  { %v2973_v53 = vpop.permute.xlu1 %2972 }
 0x30a   :  { %v3129_v2 = vpop.permute.xlu1 %3128 }
 0x30e   :  { %v2890_v41 = vpop.f32.mrf.mxu1 }
 0x30f   :  { %v2897_v55 = vmul.f32 %v2895_v59, %v2890_v41 }
 0x310   :  { %v3124_v43 = vpop.f32.mrf.mxu0 }
 0x311   :  { %v2898_v7 = vadd.f32 %v2897_v55, %v2820_v42  ;;  %v3131_v38 = vmul.f32 %v3129_v2, %v3124_v43 }
 0x315   :  { %v2968_v34 = vpop.f32.mrf.mxu2  ;;  %v3046_v24 = vpop.f32.mrf.mxu3 }
 0x316   :  { %v2975_v10 = vmul.f32 %v2973_v53, %v2968_v34  ;;  %v3053_v47 = vmul.f32 %v3051_v62, %v3046_v24 }
 0x318   :  { %v2976_v30 = vadd.f32 %v2975_v10, %v2898_v7 }
 0x31a   :  { %v3054_v61 = vadd.f32 %v3053_v47, %v2976_v30 }
 0x31c   :  { %v3132_v19 = vadd.f32 %v3131_v38, %v3054_v61 }
 0x31e   :  { %v3142_v58 = vadd.f32 %v3140_v13, %v3132_v19 }
 0x320   :  { %3143 = vst [vmem:[#allocation9] sm:$0xff] %v3142_v58 }
 0x321   :  { %3154 = dma.vmem_to_hbm [thread:$0]  %s3150_s13, 128, %s3152_s15, [#allocation4]  }
 0x322   :  { %3413 = dma.done.wait [#allocation4], 128  }
 0x323   :  { %3414 = vsyncadd [#allocation4], 4294967168 }
 0x324   :  { %3159 = vsyncpa [#allocation3], 1 }
 0x325   :  { %3160 = vsyncpa [#allocation4], 1 }
 0x326   :  { %3161 = vsyncpa [#allocation5], 1 }
 0x327   :  { %3162 = vsyncpa [#allocation6], 1 }

</bundles_post_ra>
